<compile_context>
chip_gen: v5e
topology: v5e:2x2
jax: 0.10.0
libtpu: 0.0.40
codegen_flags: <defaults>
</compile_context>

<pallas_src>
import math
from functools import partial

import numpy as np
import jax
import jax.numpy as jnp
from jax.experimental import pallas as pl
from jax.experimental.pallas import tpu as pltpu

NEG_SLOPE = 0.1          # LeakyReLU negative slope used everywhere in VsNet
_LANE = 128


def _round_up(x, m):
    return (x + m - 1) // m * m


def _pick_vmem_limit():
    """Generation-aware scoped-VMEM budget (<= 48 MiB on 64 MiB/TC v7x,
    up to 96 MiB on 128 MiB v5e/v6e)."""
    cap = 64 * 1024 * 1024
    try:
        info = pltpu.get_tpu_info()
        cap = int(getattr(info, "vmem_capacity_bytes", cap) or cap)
    except Exception:
        pass
    return max(32 * 1024 * 1024, min(cap * 3 // 4, 96 * 1024 * 1024))


_VMEM_LIMIT = _pick_vmem_limit()
_MAX_TILE_M = 2048 if _VMEM_LIMIT >= 64 * 1024 * 1024 else 1024


def _choose_tiling(M):
    """Return (Mpad, bm): Mpad multiple of 128; >=2 tiles whenever Mpad >= 256."""
    Mpad = _round_up(M, _LANE)
    if Mpad < 2 * _LANE:
        return Mpad, Mpad
    max_bm = min(_MAX_TILE_M, Mpad // 2)
    bm = _LANE
    cand = _LANE
    while cand <= max_bm:
        if Mpad % cand == 0:
            bm = cand
        cand += _LANE
    return Mpad, bm


# ----------------------------------------------------------------------------
# Fused Pallas matmul kernel:
#   acc = sum_i  W_i @ A_i   (f32 accumulate, bf16 MXU operands)
#   [lrelu]  [+ residual]    -> lane-dense (N, M) output
# ----------------------------------------------------------------------------
def _fused_mm_kernel(*refs, n_parts, has_res, lrelu):
    o_ref = refs[-1]
    acc = jnp.dot(refs[0][...], refs[n_parts][...],
                  preferred_element_type=jnp.float32)
    for i in range(1, n_parts):
        acc = acc + jnp.dot(refs[i][...], refs[n_parts + i][...],
                            preferred_element_type=jnp.float32)
    if lrelu:
        acc = jnp.where(acc >= 0, acc, NEG_SLOPE * acc)
    if has_res:
        acc = acc + refs[2 * n_parts][...].astype(jnp.float32)
    o_ref[...] = acc.astype(o_ref.dtype)


def fused_matmul(w_list, a_list, residual=None, lrelu=False,
                 out_dtype=jnp.bfloat16):
    """sum_i (N,K_i)@(K_i,M) [+lrelu][+residual] -> (N, M) out_dtype."""
    n_parts = len(w_list)
    N = w_list[0].shape[0]
    M = a_list[0].shape[1]
    for a in a_list:
        assert a.shape[1] == M
    Mpad, bm = _choose_tiling(M)

    def pad_m(t):
        return jnp.pad(t, ((0, 0), (0, Mpad - M))) if Mpad != M else t

    w_list = [w.astype(jnp.bfloat16) for w in w_list]
    a_list = [pad_m(a.astype(jnp.bfloat16)) for a in a_list]

    inputs = list(w_list) + list(a_list)
    in_specs = ([pl.BlockSpec((N, w.shape[1]), lambda i: (0, 0)) for w in w_list] +
                [pl.BlockSpec((a.shape[0], bm), lambda i: (0, i)) for a in a_list])
    has_res = residual is not None
    if has_res:
        inputs.append(pad_m(residual))
        in_specs.append(pl.BlockSpec((N, bm), lambda i: (0, i)))

    out = pl.pallas_call(
        partial(_fused_mm_kernel, n_parts=n_parts, has_res=has_res, lrelu=lrelu),
        out_shape=jax.ShapeDtypeStruct((N, Mpad), out_dtype),
        grid_spec=pl.GridSpec(
            grid=(Mpad // bm,),
            in_specs=in_specs,
            out_specs=pl.BlockSpec((N, bm), lambda i: (0, i)),
        ),
        compiler_params=pltpu.CompilerParams(
            dimension_semantics=("parallel",),
            vmem_limit_bytes=_VMEM_LIMIT,
        ),
    )(*inputs)
    return out if Mpad == M else out[:, :M]


# ----------------------------------------------------------------------------
# Channel-major Conv2d: parts list (Cin_i, N, H, W) + weight (Cout, sum Cin_i*k*k)
#  -> one fused matmul (split-K over parts), optional lrelu / residual fused.
# ----------------------------------------------------------------------------
def conv2d_cm(x_parts, wmat, *, stride=1, padding=0, dilation=1,
              lrelu=False, residual=None, out_dtype=jnp.bfloat16):
    if not isinstance(x_parts, (list, tuple)):
        x_parts = [x_parts]
    Cin_total = sum(p.shape[0] for p in x_parts)
    _, N, H, W = x_parts[0].shape
    Cout, Kdim = wmat.shape
    kk = Kdim // Cin_total
    k = math.isqrt(kk)
    assert k * k == kk and kk * Cin_total == Kdim, (Cout, Kdim, Cin_total)
    Hout = (H + 2 * padding - dilation * (k - 1) - 1) // stride + 1
    Wout = (W + 2 * padding - dilation * (k - 1) - 1) // stride + 1
    M = N * Hout * Wout

    w_list, a_list = [], []
    coff = 0
    for part in x_parts:
        Cin = part.shape[0]
        w_list.append(wmat[:, coff * kk:(coff + Cin) * kk])
        coff += Cin
        if k == 1 and stride == 1 and padding == 0:
            a_list.append(part.reshape(Cin, M))
        else:
            # TODO(synk): fold this tap gather into the Pallas kernel (halo'd
            # VMEM tile) to avoid materializing the k*k-expanded A in HBM.
            xp = part
            if padding:
                xp = jnp.pad(xp, ((0, 0), (0, 0),
                                  (padding, padding), (padding, padding)))
            cols = []
            for kh in range(k):
                h0 = kh * dilation
                for kw in range(k):
                    w0 = kw * dilation
                    cols.append(xp[:, :,
                                   h0:h0 + (Hout - 1) * stride + 1:stride,
                                   w0:w0 + (Wout - 1) * stride + 1:stride])
            a_list.append(jnp.stack(cols, axis=1).reshape(Cin * kk, M))

    res = None if residual is None else residual.reshape(Cout, M)
    out = fused_matmul(w_list, a_list, residual=res, lrelu=lrelu,
                       out_dtype=out_dtype)
    return out.reshape(Cout, N, Hout, Wout)


# ----------------------------------------------------------------------------
# Channel-major layout helpers (mirror the torch view/permute glue exactly)
# ----------------------------------------------------------------------------
def SA_to_LF_input_cm(x, a):            # (B, a*a, h, w) -> (1, B, h*a, w*a)
    B, _, h, w = x.shape
    return x.reshape(B, a, a, h, w).transpose(0, 3, 1, 4, 2).reshape(B, h * a, w * a)[None]


def SA_to_LF_cm(x, a):                  # (C, B*a*a, h, w) -> (C, B, a*h, a*w)
    C, n, h, w = x.shape
    B = n // (a * a)
    return x.reshape(C, B, a, a, h, w).transpose(0, 1, 4, 2, 5, 3).reshape(C, B, a * h, a * w)


def LF_to_SA_cm(x, a):                  # (C, B, a*h, a*w) -> (C, B*a*a, h, w)
    C, B, H, W = x.shape
    h, w = H // a, W // a
    return x.reshape(C, B, h, a, w, a).transpose(0, 1, 3, 5, 2, 4).reshape(C, B * a * a, h, w)


def LF_to_SAM_cm(x, a):                 # macro-pixel -> sub-aperture mosaic
    C, B, H, W = x.shape
    h, w = H // a, W // a
    return x.reshape(C, B, h, a, w, a).transpose(0, 1, 3, 2, 5, 4).reshape(C, B, a * h, a * w)


def SAM_to_SA_cm(x, a):                 # (1, B, a*h, a*w) -> (B, a*a, h, w) batch-major
    _, B, H, W = x.shape
    h, w = H // a, W // a
    return x[0].reshape(B, a, h, a, w).transpose(0, 1, 3, 2, 4).reshape(B, a * a, h, w)


def pixel_shuffle_cm(x, r):             # (C*r*r, N, H, W) -> (C, N, H*r, W*r)
    Crr, N, H, W = x.shape
    C = Crr // (r * r)
    return x.reshape(C, r, r, N, H, W).transpose(0, 3, 4, 1, 5, 2).reshape(C, N, H * r, W * r)


# ----------------------------------------------------------------------------
# Bicubic upsample (align_corners=False, A=-0.75) + residual add:
# separable two-pass form, each pass one fused Pallas matmul;
# the residual add is fused into the second (width) pass.
# ----------------------------------------------------------------------------
def _bicubic_matrix_np(n_in, scale):
    A = -0.75
    cc1 = lambda t: ((A + 2) * t - (A + 3)) * t * t + 1
    cc2 = lambda t: ((A * t - 5 * A) * t + 8 * A) * t - 4 * A
    n_out = n_in * scale
    M = np.zeros((n_out, n_in), np.float32)
    for i in range(n_out):
        src = (i + 0.5) / scale - 0.5
        i0 = math.floor(src)
        t = src - i0
        coeffs = [cc2(t + 1.0), cc1(t), cc1(1.0 - t), cc2(2.0 - t)]
        for j in range(4):
            idx = min(max(i0 - 1 + j, 0), n_in - 1)
            M[i, idx] += coeffs[j]
    return M


def bicubic_plus_residual(x, out_SR, s):
    """bicubic_upsample(x, s) + out_SR (both (B, V, ...)) -> (B, V, h*s, w*s) f32."""
    B, V, h, w = x.shape
    hs, ws = h * s, w * s
    Mh = jnp.asarray(_bicubic_matrix_np(h, s))              # (hs, h)
    Mw = jnp.asarray(_bicubic_matrix_np(w, s))              # (ws, w)

    # pass 1 (height): (hs, h) @ (h, B*V*w)
    xr = x.transpose(2, 0, 1, 3).reshape(h, B * V * w)
    y = fused_matmul([Mh], [xr], out_dtype=jnp.bfloat16)    # (hs, B*V*w)

    # pass 2 (width) + residual: (ws, w) @ (w, B*V*hs) + out_SR
    yr = y.reshape(hs, B, V, w).transpose(3, 1, 2, 0).reshape(w, B * V * hs)
    res = out_SR.transpose(3, 0, 1, 2).reshape(ws, B * V * hs)
    out = fused_matmul([Mw], [yr], residual=res, out_dtype=jnp.float32)
    return out.reshape(ws, B, V, hs).transpose(1, 2, 3, 0)  # (B, V, hs, ws)


# ----------------------------------------------------------------------------
# Parameters: deterministic synthetic init, pre-reshaped to (Cout, Cin*k*k) bf16
# (all VsNet convs have bias=False)
# ----------------------------------------------------------------------------
def _conv_mat(key, cout, cin, k):
    w = jax.random.normal(key, (cout, cin, k, k), jnp.float32) * 0.05
    return w.reshape(cout, cin * k * k).astype(jnp.bfloat16)


def init_params(key, a, C, K, n_block, s):
    keys = iter(jax.random.split(key, 16 + 8 * K * n_block))
    nk = lambda: next(keys)
    p = {
        'AM_FE': _conv_mat(nk(), C, 1, a),
        'LF_FE': _conv_mat(nk(), C, 1, 3),
        'SA_FE': _conv_mat(nk(), C, 1, 3),
        'blocks': [],
    }
    for _ in range(K * n_block):
        p['blocks'].append(dict(
            sa_Conv=_conv_mat(nk(), C, C, 3),
            sa_Conv2=_conv_mat(nk(), C, 2 * C, 3),
            am_Conv=_conv_mat(nk(), C, C, 1),
            am_Conv2=_conv_mat(nk(), C, 2 * C, 1),
            lf_Conv=_conv_mat(nk(), C, C, 3),
            lf_Conv2=_conv_mat(nk(), C, 3 * C, 3),
            lf_am_conv=_conv_mat(nk(), C, C, a),
            am_lf_conv=_conv_mat(nk(), a * a * C, C, 1),
        ))
    p['sa_fusion'] = _conv_mat(nk(), C, K * C, 3)
    p['am_fusion1'] = _conv_mat(nk(), C, K * C, 1)
    p['am_fusion2'] = _conv_mat(nk(), a * a * C, C, 1)
    p['final_fusion'] = _conv_mat(nk(), C, (K + 2) * C, 3)
    p['PreConv'] = _conv_mat(nk(), C * s * s, C, 3)
    p['FinalConv'] = _conv_mat(nk(), 1, C, 1)
    return p


# ----------------------------------------------------------------------------
# VsNet forward (activations channel-major bf16 throughout)
# ----------------------------------------------------------------------------
def inter_block(p, a, x_am, x_lf, x_sa):
    C = x_am.shape[0]
    n_sa = x_sa.shape[1]
    n_lf = x_lf.shape[1]

    # spatial siblings share sa_Conv weights -> batch along M
    sa_out = conv2d_cm(jnp.concatenate([x_sa, LF_to_SA_cm(x_lf, a)], axis=1),
                       p['sa_Conv'], padding=1)
    inter_sa1, inter_sa2 = sa_out[:, :n_sa], sa_out[:, n_sa:]

    # light-field siblings share lf_Conv weights -> batch along M
    lf_out = conv2d_cm(jnp.concatenate([x_lf, SA_to_LF_cm(x_sa, a)], axis=1),
                       p['lf_Conv'], padding=a, dilation=a)
    inter_lf1, inter_lf3 = lf_out[:, :n_lf], lf_out[:, n_lf:]

    # am_Conv (C<-C) and am_lf_conv (a^2*C<-C) both consume x_am at 1x1:
    # row-stack their weights and run ONE matmul.
    w_stack = jnp.concatenate([p['am_Conv'], p['am_lf_conv']], axis=0)
    am_stack = conv2d_cm(x_am, w_stack)
    inter_am1 = am_stack[:C]
    inter_lf2 = pixel_shuffle_cm(am_stack[C:], a)

    inter_am2 = conv2d_cm(x_lf, p['lf_am_conv'], stride=a, lrelu=True)

    # split-K parts replace the channel concats; lrelu + residual fused
    out_am = conv2d_cm([inter_am1, inter_am2], p['am_Conv2'],
                       lrelu=True, residual=x_am)
    out_lf = conv2d_cm([inter_lf1, inter_lf2, inter_lf3], p['lf_Conv2'],
                       padding=a, dilation=a, lrelu=True, residual=x_lf)
    out_sa = conv2d_cm([inter_sa1, inter_sa2], p['sa_Conv2'],
                       padding=1, lrelu=True, residual=x_sa)
    return out_am, out_lf, out_sa


def vsnet_forward(params, x, a, K, n_block, s):
    B, _, h, w = x.shape
    x_bf = x.astype(jnp.bfloat16)                      # single cast at entry
    input_sa = x_bf.reshape(B * a * a, h, w)[None]     # (1, B*a*a, h, w)
    input_lf = SA_to_LF_input_cm(x_bf, a)              # (1, B, a*h, a*w)

    fea_am = conv2d_cm(input_lf, params['AM_FE'], stride=a)
    fea_lf = conv2d_cm(input_lf, params['LF_FE'], padding=a, dilation=a)
    fea_sa = conv2d_cm(input_sa, params['SA_FE'], padding=1)

    inter_am, inter_lf, inter_sa = fea_am, fea_lf, fea_sa
    cas_am, cas_lf, cas_sa = [], [], []
    bi = 0
    for _ in range(K):
        for _ in range(n_block):
            inter_am, inter_lf, inter_sa = inter_block(
                params['blocks'][bi], a, inter_am, inter_lf, inter_sa)
            bi += 1
        cas_am.append(inter_am)
        cas_lf.append(inter_lf)
        cas_sa.append(inter_sa)

    # Fusion: split-K over the cascade lists (no channel concats materialized)
    fu_am = conv2d_cm(cas_am, params['am_fusion1'], lrelu=True)
    fu_am = pixel_shuffle_cm(conv2d_cm(fu_am, params['am_fusion2']), a)
    fu_sa = SA_to_LF_cm(conv2d_cm(cas_sa, params['sa_fusion'],
                                  padding=1, lrelu=True), a)
    fused = conv2d_cm([fu_am] + cas_lf + [fu_sa], params['final_fusion'],
                      padding=a, dilation=a, lrelu=True)

    # Upsampling
    out_LR = conv2d_cm(fused, params['PreConv'], padding=a, dilation=a)
    out_sav_LR = LF_to_SAM_cm(out_LR, a)
    out_sav_SR = pixel_shuffle_cm(out_sav_LR, s)
    out_SR = conv2d_cm(out_sav_SR, params['FinalConv'], out_dtype=jnp.float32)
    out_SR = SAM_to_SA_cm(out_SR, a)                    # (B, a*a, h*s, w*s)

    # separable bicubic residual path (F.interpolate bicubic, AC=False) + add
    out = bicubic_plus_residual(x_bf, out_SR, s)
    return out[:, None]                                 # (B, 1, a*a, h*s, w*s)


if __name__ == "__main__":
    # Small config: angRes=3, K=2 cascades, 1 block each, 8 channels, x2 upscale
    a, K, n_block, C, s = 3, 2, 1, 8, 2
    B, h, w = 1, 8, 8

    key = jax.random.PRNGKey(0)
    pkey, xkey = jax.random.split(key)
    params = init_params(pkey, a, C, K, n_block, s)
    x = jax.random.normal(xkey, (B, a * a, h, w), jnp.float32)

    fwd = jax.jit(partial(vsnet_forward, a=a, K=K, n_block=n_block, s=s))
    out = fwd(params, x)
    jax.block_until_ready(out)
    assert out.shape == (B, 1, a * a, h * s, w * s), out.shape
    assert bool(jnp.all(jnp.isfinite(out)))
    print("KERNEL_OK")
</pallas_src>

<mosaic_0001>
module attributes {stable_mosaic.version = 11 : i64} {
  func.func @_fused_mm_kernel(%arg0: i32, %arg1: memref<8x9xbf16, #tpu.memory_space<vmem>>, %arg2: memref<9x128xbf16, #tpu.memory_space<vmem>>, %arg3: memref<8x128xbf16, #tpu.memory_space<vmem>>) attributes {dimension_semantics = [#tpu.dimension_semantics<parallel>], iteration_bounds = array<i64: 5>, scalar_prefetch = 0 : i64, scratch_operands = 0 : i64, tpu.core_type = #tpu.core_type<tc>, window_params = [{pipeline_mode = #tpu.pipeline_mode<synchronous>, transform_indices = @transform_0, window_bounds = array<i64: 8, 9>}, {transform_indices = @transform_1, window_bounds = array<i64: 9, 128>}, {transform_indices = @transform_2, window_bounds = array<i64: 8, 128>}]} {
    %c0 = arith.constant 0 : index
    %c0_0 = arith.constant 0 : index
    %0 = vector.load %arg1[%c0, %c0_0] : memref<8x9xbf16, #tpu.memory_space<vmem>>, vector<8x9xbf16>
    %c0_1 = arith.constant 0 : index
    %c0_2 = arith.constant 0 : index
    %1 = vector.load %arg2[%c0_1, %c0_2] : memref<9x128xbf16, #tpu.memory_space<vmem>>, vector<9x128xbf16>
    %cst = arith.constant dense<0.000000e+00> : vector<8x128xf32>
    %2 = tpu.matmul %0, %1, %cst {dimension_numbers = #tpu.dot_dimension_numbers<[1], [0], [0], [1], [0, 0, 1, 1], [], []>} : vector<8x9xbf16>, vector<9x128xbf16>, vector<8x128xf32> -> vector<8x128xf32>
    %3 = arith.truncf %2 : vector<8x128xf32> to vector<8x128xbf16>
    %c0_3 = arith.constant 0 : index
    %c0_4 = arith.constant 0 : index
    %4 = vector.load %arg3[%c0_3, %c0_4] : memref<8x128xbf16, #tpu.memory_space<vmem>>, vector<8x128xbf16>
    tpu.vector_store %arg3[%c0_3, %c0_4], %3 {strides = array<i32>} : memref<8x128xbf16, #tpu.memory_space<vmem>>, vector<8x128xbf16>,
    return
  }
  func.func @transform_0(%arg0: i32) -> (i32, i32) {
    %c0_i32 = arith.constant 0 : i32
    %c0_i32_0 = arith.constant 0 : i32
    %c0_i32_1 = arith.constant 0 : i32
    return %c0_i32, %c0_i32_0 : i32, i32
  }
  func.func @transform_1(%arg0: i32) -> (i32, i32) {
    %c0_i32 = arith.constant 0 : i32
    %c0_i32_0 = arith.constant 0 : i32
    return %c0_i32, %arg0 : i32, i32
  }
  func.func @transform_2(%arg0: i32) -> (i32, i32) {
    %c0_i32 = arith.constant 0 : i32
    %c0_i32_0 = arith.constant 0 : i32
    return %c0_i32, %arg0 : i32, i32
  }
}

module attributes {stable_mosaic.version = 11 : i64} {
  func.func @_fused_mm_kernel(%arg0: i32, %arg1: memref<8x9xbf16, #tpu.memory_space<vmem>>, %arg2: memref<9x128xbf16, #tpu.memory_space<vmem>>, %arg3: memref<8x128xbf16, #tpu.memory_space<vmem>>) attributes {dimension_semantics = [#tpu.dimension_semantics<parallel>], iteration_bounds = array<i64: 5>, scalar_prefetch = 0 : i64, scratch_operands = 0 : i64, tpu.core_type = #tpu.core_type<tc>, window_params = [{pipeline_mode = #tpu.pipeline_mode<synchronous>, transform_indices = @transform_0, window_bounds = array<i64: 8, 9>}, {transform_indices = @transform_1, window_bounds = array<i64: 9, 128>}, {transform_indices = @transform_2, window_bounds = array<i64: 8, 128>}]} {
    %c0 = arith.constant 0 : index
    %c0_0 = arith.constant 0 : index
    %0 = vector.load %arg1[%c0, %c0_0] : memref<8x9xbf16, #tpu.memory_space<vmem>>, vector<8x9xbf16>
    %c0_1 = arith.constant 0 : index
    %c0_2 = arith.constant 0 : index
    %1 = vector.load %arg2[%c0_1, %c0_2] : memref<9x128xbf16, #tpu.memory_space<vmem>>, vector<9x128xbf16>
    %cst = arith.constant dense<0.000000e+00> : vector<8x128xf32>
    %2 = tpu.matmul %0, %1, %cst {dimension_numbers = #tpu.dot_dimension_numbers<[1], [0], [0], [1], [0, 0, 1, 1], [], []>} : vector<8x9xbf16>, vector<9x128xbf16>, vector<8x128xf32> -> vector<8x128xf32>
    %3 = arith.truncf %2 : vector<8x128xf32> to vector<8x128xbf16>
    %c0_3 = arith.constant 0 : index
    %c0_4 = arith.constant 0 : index
    %4 = vector.load %arg3[%c0_3, %c0_4] : memref<8x128xbf16, #tpu.memory_space<vmem>>, vector<8x128xbf16>
    tpu.vector_store %arg3[%c0_3, %c0_4], %3 {strides = array<i32>} : memref<8x128xbf16, #tpu.memory_space<vmem>>, vector<8x128xbf16>,
    return
  }
  func.func @transform_0(%arg0: i32) -> (i32, i32) {
    %c0_i32 = arith.constant 0 : i32
    %c0_i32_0 = arith.constant 0 : i32
    %c0_i32_1 = arith.constant 0 : i32
    return %c0_i32, %c0_i32_0 : i32, i32
  }
  func.func @transform_1(%arg0: i32) -> (i32, i32) {
    %c0_i32 = arith.constant 0 : i32
    %c0_i32_0 = arith.constant 0 : i32
    return %c0_i32, %arg0 : i32, i32
  }
  func.func @transform_2(%arg0: i32) -> (i32, i32) {
    %c0_i32 = arith.constant 0 : i32
    %c0_i32_0 = arith.constant 0 : i32
    return %c0_i32, %arg0 : i32, i32
  }
}

module attributes {stable_mosaic.version = 11 : i64} {
  func.func @_fused_mm_kernel(%arg0: i32, %arg1: memref<8x72xbf16, #tpu.memory_space<vmem>>, %arg2: memref<72x384xbf16, #tpu.memory_space<vmem>>, %arg3: memref<8x384xbf16, #tpu.memory_space<vmem>>) attributes {dimension_semantics = [#tpu.dimension_semantics<parallel>], iteration_bounds = array<i64: 3>, scalar_prefetch = 0 : i64, scratch_operands = 0 : i64, tpu.core_type = #tpu.core_type<tc>, window_params = [{pipeline_mode = #tpu.pipeline_mode<synchronous>, transform_indices = @transform_0, window_bounds = array<i64: 8, 72>}, {transform_indices = @transform_1, window_bounds = array<i64: 72, 384>}, {transform_indices = @transform_2, window_bounds = array<i64: 8, 384>}]} {
    %c0 = arith.constant 0 : index
    %c0_0 = arith.constant 0 : index
    %0 = vector.load %arg1[%c0, %c0_0] : memref<8x72xbf16, #tpu.memory_space<vmem>>, vector<8x72xbf16>
    %c0_1 = arith.constant 0 : index
    %c0_2 = arith.constant 0 : index
    %1 = vector.load %arg2[%c0_1, %c0_2] : memref<72x384xbf16, #tpu.memory_space<vmem>>, vector<72x384xbf16>
    %cst = arith.constant dense<0.000000e+00> : vector<8x384xf32>
    %2 = tpu.matmul %0, %1, %cst {dimension_numbers = #tpu.dot_dimension_numbers<[1], [0], [0], [1], [0, 0, 1, 1], [], []>} : vector<8x72xbf16>, vector<72x384xbf16>, vector<8x384xf32> -> vector<8x384xf32>
    %3 = arith.truncf %2 : vector<8x384xf32> to vector<8x384xbf16>
    %c0_3 = arith.constant 0 : index
    %c0_4 = arith.constant 0 : index
    %4 = vector.load %arg3[%c0_3, %c0_4] : memref<8x384xbf16, #tpu.memory_space<vmem>>, vector<8x384xbf16>
    tpu.vector_store %arg3[%c0_3, %c0_4], %3 {strides = array<i32>} : memref<8x384xbf16, #tpu.memory_space<vmem>>, vector<8x384xbf16>,
    return
  }
  func.func @transform_0(%arg0: i32) -> (i32, i32) {
    %c0_i32 = arith.constant 0 : i32
    %c0_i32_0 = arith.constant 0 : i32
    %c0_i32_1 = arith.constant 0 : i32
    return %c0_i32, %c0_i32_0 : i32, i32
  }
  func.func @transform_1(%arg0: i32) -> (i32, i32) {
    %c0_i32 = arith.constant 0 : i32
    %c0_i32_0 = arith.constant 0 : i32
    return %c0_i32, %arg0 : i32, i32
  }
  func.func @transform_2(%arg0: i32) -> (i32, i32) {
    %c0_i32 = arith.constant 0 : i32
    %c0_i32_0 = arith.constant 0 : i32
    return %c0_i32, %arg0 : i32, i32
  }
}

module attributes {stable_mosaic.version = 11 : i64} {
  func.func @_fused_mm_kernel(%arg0: i32, %arg1: memref<8x72xbf16, #tpu.memory_space<vmem>>, %arg2: memref<8x72xbf16, #tpu.memory_space<vmem>>, %arg3: memref<72x128xbf16, #tpu.memory_space<vmem>>, %arg4: memref<72x128xbf16, #tpu.memory_space<vmem>>, %arg5: memref<8x128xbf16, #tpu.memory_space<vmem>>, %arg6: memref<8x128xbf16, #tpu.memory_space<vmem>>) attributes {dimension_semantics = [#tpu.dimension_semantics<parallel>], iteration_bounds = array<i64: 5>, scalar_prefetch = 0 : i64, scratch_operands = 0 : i64, tpu.core_type = #tpu.core_type<tc>, window_params = [{pipeline_mode = #tpu.pipeline_mode<synchronous>, transform_indices = @transform_0, window_bounds = array<i64: 8, 72>}, {pipeline_mode = #tpu.pipeline_mode<synchronous>, transform_indices = @transform_1, window_bounds = array<i64: 8, 72>}, {transform_indices = @transform_2, window_bounds = array<i64: 72, 128>}, {transform_indices = @transform_3, window_bounds = array<i64: 72, 128>}, {transform_indices = @transform_4, window_bounds = array<i64: 8, 128>}, {transform_indices = @transform_5, window_bounds = array<i64: 8, 128>}]} {
    %c0 = arith.constant 0 : index
    %c0_0 = arith.constant 0 : index
    %0 = vector.load %arg1[%c0, %c0_0] : memref<8x72xbf16, #tpu.memory_space<vmem>>, vector<8x72xbf16>
    %c0_1 = arith.constant 0 : index
    %c0_2 = arith.constant 0 : index
    %1 = vector.load %arg3[%c0_1, %c0_2] : memref<72x128xbf16, #tpu.memory_space<vmem>>, vector<72x128xbf16>
    %cst = arith.constant dense<0.000000e+00> : vector<8x128xf32>
    %2 = tpu.matmul %0, %1, %cst {dimension_numbers = #tpu.dot_dimension_numbers<[1], [0], [0], [1], [0, 0, 1, 1], [], []>} : vector<8x72xbf16>, vector<72x128xbf16>, vector<8x128xf32> -> vector<8x128xf32>
    %c0_3 = arith.constant 0 : index
    %c0_4 = arith.constant 0 : index
    %3 = vector.load %arg2[%c0_3, %c0_4] : memref<8x72xbf16, #tpu.memory_space<vmem>>, vector<8x72xbf16>
    %c0_5 = arith.constant 0 : index
    %c0_6 = arith.constant 0 : index
    %4 = vector.load %arg4[%c0_5, %c0_6] : memref<72x128xbf16, #tpu.memory_space<vmem>>, vector<72x128xbf16>
    %cst_7 = arith.constant dense<0.000000e+00> : vector<8x128xf32>
    %5 = tpu.matmul %3, %4, %cst_7 {dimension_numbers = #tpu.dot_dimension_numbers<[1], [0], [0], [1], [0, 0, 1, 1], [], []>} : vector<8x72xbf16>, vector<72x128xbf16>, vector<8x128xf32> -> vector<8x128xf32>
    %6 = arith.addf %2, %5 : vector<8x128xf32>
    %cst_8 = arith.constant 0.000000e+00 : f32
    %7 = vector.broadcast %cst_8 : f32 to vector<8x128xf32>
    %8 = arith.cmpf oge, %6, %7 : vector<8x128xf32>
    %cst_9 = arith.constant 1.000000e-01 : f32
    %9 = vector.broadcast %cst_9 : f32 to vector<8x128xf32>
    %10 = arith.mulf %9, %6 : vector<8x128xf32>
    %11 = arith.select %8, %6, %10 : vector<8x128xi1>, vector<8x128xf32>
    %c0_10 = arith.constant 0 : index
    %c0_11 = arith.constant 0 : index
    %12 = vector.load %arg5[%c0_10, %c0_11] : memref<8x128xbf16, #tpu.memory_space<vmem>>, vector<8x128xbf16>
    %13 = arith.extf %12 : vector<8x128xbf16> to vector<8x128xf32>
    %14 = arith.addf %11, %13 : vector<8x128xf32>
    %15 = arith.truncf %14 : vector<8x128xf32> to vector<8x128xbf16>
    %c0_12 = arith.constant 0 : index
    %c0_13 = arith.constant 0 : index
    %16 = vector.load %arg6[%c0_12, %c0_13] : memref<8x128xbf16, #tpu.memory_space<vmem>>, vector<8x128xbf16>
    tpu.vector_store %arg6[%c0_12, %c0_13], %15 {strides = array<i32>} : memref<8x128xbf16, #tpu.memory_space<vmem>>, vector<8x128xbf16>,
    return
  }
  func.func @transform_0(%arg0: i32) -> (i32, i32) {
    %c0_i32 = arith.constant 0 : i32
    %c0_i32_0 = arith.constant 0 : i32
    %c0_i32_1 = arith.constant 0 : i32
    return %c0_i32, %c0_i32_0 : i32, i32
  }
  func.func @transform_1(%arg0: i32) -> (i32, i32) {
    %c0_i32 = arith.constant 0 : i32
    %c0_i32_0 = arith.constant 0 : i32
    %c0_i32_1 = arith.constant 0 : i32
    return %c0_i32, %c0_i32_0 : i32, i32
  }
  func.func @transform_2(%arg0: i32) -> (i32, i32) {
    %c0_i32 = arith.constant 0 : i32
    %c0_i32_0 = arith.constant 0 : i32
    return %c0_i32, %arg0 : i32, i32
  }
  func.func @transform_3(%arg0: i32) -> (i32, i32) {
    %c0_i32 = arith.constant 0 : i32
    %c0_i32_0 = arith.constant 0 : i32
    return %c0_i32, %arg0 : i32, i32
  }
  func.func @transform_4(%arg0: i32) -> (i32, i32) {
    %c0_i32 = arith.constant 0 : i32
    %c0_i32_0 = arith.constant 0 : i32
    return %c0_i32, %arg0 : i32, i32
  }
  func.func @transform_5(%arg0: i32) -> (i32, i32) {
    %c0_i32 = arith.constant 0 : i32
    %c0_i32_0 = arith.constant 0 : i32
    return %c0_i32, %arg0 : i32, i32
  }
}

module attributes {stable_mosaic.version = 11 : i64} {
  func.func @_fused_mm_kernel(%arg0: i32, %arg1: memref<8x72xbf16, #tpu.memory_space<vmem>>, %arg2: memref<72x128xbf16, #tpu.memory_space<vmem>>, %arg3: memref<8x128xbf16, #tpu.memory_space<vmem>>) attributes {dimension_semantics = [#tpu.dimension_semantics<parallel>], iteration_bounds = array<i64: 1>, scalar_prefetch = 0 : i64, scratch_operands = 0 : i64, tpu.core_type = #tpu.core_type<tc>, window_params = [{pipeline_mode = #tpu.pipeline_mode<synchronous>, transform_indices = @transform_0, window_bounds = array<i64: 8, 72>}, {transform_indices = @transform_1, window_bounds = array<i64: 72, 128>}, {transform_indices = @transform_2, window_bounds = array<i64: 8, 128>}]} {
    %c0 = arith.constant 0 : index
    %c0_0 = arith.constant 0 : index
    %0 = vector.load %arg1[%c0, %c0_0] : memref<8x72xbf16, #tpu.memory_space<vmem>>, vector<8x72xbf16>
    %c0_1 = arith.constant 0 : index
    %c0_2 = arith.constant 0 : index
    %1 = vector.load %arg2[%c0_1, %c0_2] : memref<72x128xbf16, #tpu.memory_space<vmem>>, vector<72x128xbf16>
    %cst = arith.constant dense<0.000000e+00> : vector<8x128xf32>
    %2 = tpu.matmul %0, %1, %cst {dimension_numbers = #tpu.dot_dimension_numbers<[1], [0], [0], [1], [0, 0, 1, 1], [], []>} : vector<8x72xbf16>, vector<72x128xbf16>, vector<8x128xf32> -> vector<8x128xf32>
    %cst_3 = arith.constant 0.000000e+00 : f32
    %3 = vector.broadcast %cst_3 : f32 to vector<8x128xf32>
    %4 = arith.cmpf oge, %2, %3 : vector<8x128xf32>
    %cst_4 = arith.constant 1.000000e-01 : f32
    %5 = vector.broadcast %cst_4 : f32 to vector<8x128xf32>
    %6 = arith.mulf %5, %2 : vector<8x128xf32>
    %7 = arith.select %4, %2, %6 : vector<8x128xi1>, vector<8x128xf32>
    %8 = arith.truncf %7 : vector<8x128xf32> to vector<8x128xbf16>
    %c0_5 = arith.constant 0 : index
    %c0_6 = arith.constant 0 : index
    %9 = vector.load %arg3[%c0_5, %c0_6] : memref<8x128xbf16, #tpu.memory_space<vmem>>, vector<8x128xbf16>
    tpu.vector_store %arg3[%c0_5, %c0_6], %8 {strides = array<i32>} : memref<8x128xbf16, #tpu.memory_space<vmem>>, vector<8x128xbf16>,
    return
  }
  func.func @transform_0(%arg0: i32) -> (i32, i32) {
    %c0_i32 = arith.constant 0 : i32
    %c0_i32_0 = arith.constant 0 : i32
    %c0_i32_1 = arith.constant 0 : i32
    return %c0_i32, %c0_i32_0 : i32, i32
  }
  func.func @transform_1(%arg0: i32) -> (i32, i32) {
    %c0_i32 = arith.constant 0 : i32
    %c0_i32_0 = arith.constant 0 : i32
    return %c0_i32, %arg0 : i32, i32
  }
  func.func @transform_2(%arg0: i32) -> (i32, i32) {
    %c0_i32 = arith.constant 0 : i32
    %c0_i32_0 = arith.constant 0 : i32
    return %c0_i32, %arg0 : i32, i32
  }
}

module attributes {stable_mosaic.version = 11 : i64} {
  func.func @_fused_mm_kernel(%arg0: i32, %arg1: memref<8x9xbf16, #tpu.memory_space<vmem>>, %arg2: memref<9x128xbf16, #tpu.memory_space<vmem>>, %arg3: memref<8x128xbf16, #tpu.memory_space<vmem>>) attributes {dimension_semantics = [#tpu.dimension_semantics<parallel>], iteration_bounds = array<i64: 1>, scalar_prefetch = 0 : i64, scratch_operands = 0 : i64, tpu.core_type = #tpu.core_type<tc>, window_params = [{pipeline_mode = #tpu.pipeline_mode<synchronous>, transform_indices = @transform_0, window_bounds = array<i64: 8, 9>}, {transform_indices = @transform_1, window_bounds = array<i64: 9, 128>}, {transform_indices = @transform_2, window_bounds = array<i64: 8, 128>}]} {
    %c0 = arith.constant 0 : index
    %c0_0 = arith.constant 0 : index
    %0 = vector.load %arg1[%c0, %c0_0] : memref<8x9xbf16, #tpu.memory_space<vmem>>, vector<8x9xbf16>
    %c0_1 = arith.constant 0 : index
    %c0_2 = arith.constant 0 : index
    %1 = vector.load %arg2[%c0_1, %c0_2] : memref<9x128xbf16, #tpu.memory_space<vmem>>, vector<9x128xbf16>
    %cst = arith.constant dense<0.000000e+00> : vector<8x128xf32>
    %2 = tpu.matmul %0, %1, %cst {dimension_numbers = #tpu.dot_dimension_numbers<[1], [0], [0], [1], [0, 0, 1, 1], [], []>} : vector<8x9xbf16>, vector<9x128xbf16>, vector<8x128xf32> -> vector<8x128xf32>
    %3 = arith.truncf %2 : vector<8x128xf32> to vector<8x128xbf16>
    %c0_3 = arith.constant 0 : index
    %c0_4 = arith.constant 0 : index
    %4 = vector.load %arg3[%c0_3, %c0_4] : memref<8x128xbf16, #tpu.memory_space<vmem>>, vector<8x128xbf16>
    tpu.vector_store %arg3[%c0_3, %c0_4], %3 {strides = array<i32>} : memref<8x128xbf16, #tpu.memory_space<vmem>>, vector<8x128xbf16>,
    return
  }
  func.func @transform_0(%arg0: i32) -> (i32, i32) {
    %c0_i32 = arith.constant 0 : i32
    %c0_i32_0 = arith.constant 0 : i32
    %c0_i32_1 = arith.constant 0 : i32
    return %c0_i32, %c0_i32_0 : i32, i32
  }
  func.func @transform_1(%arg0: i32) -> (i32, i32) {
    %c0_i32 = arith.constant 0 : i32
    %c0_i32_0 = arith.constant 0 : i32
    return %c0_i32, %arg0 : i32, i32
  }
  func.func @transform_2(%arg0: i32) -> (i32, i32) {
    %c0_i32 = arith.constant 0 : i32
    %c0_i32_0 = arith.constant 0 : i32
    return %c0_i32, %arg0 : i32, i32
  }
}

module attributes {stable_mosaic.version = 11 : i64} {
  func.func @_fused_mm_kernel(%arg0: i32, %arg1: memref<80x8xbf16, #tpu.memory_space<vmem>>, %arg2: memref<8x128xbf16, #tpu.memory_space<vmem>>, %arg3: memref<80x128xbf16, #tpu.memory_space<vmem>>) attributes {dimension_semantics = [#tpu.dimension_semantics<parallel>], iteration_bounds = array<i64: 1>, scalar_prefetch = 0 : i64, scratch_operands = 0 : i64, tpu.core_type = #tpu.core_type<tc>, window_params = [{pipeline_mode = #tpu.pipeline_mode<synchronous>, transform_indices = @transform_0, window_bounds = array<i64: 80, 8>}, {transform_indices = @transform_1, window_bounds = array<i64: 8, 128>}, {transform_indices = @transform_2, window_bounds = array<i64: 80, 128>}]} {
    %c0 = arith.constant 0 : index
    %c0_0 = arith.constant 0 : index
    %0 = vector.load %arg1[%c0, %c0_0] : memref<80x8xbf16, #tpu.memory_space<vmem>>, vector<80x8xbf16>
    %c0_1 = arith.constant 0 : index
    %c0_2 = arith.constant 0 : index
    %1 = vector.load %arg2[%c0_1, %c0_2] : memref<8x128xbf16, #tpu.memory_space<vmem>>, vector<8x128xbf16>
    %cst = arith.constant dense<0.000000e+00> : vector<80x128xf32>
    %2 = tpu.matmul %0, %1, %cst {dimension_numbers = #tpu.dot_dimension_numbers<[1], [0], [0], [1], [0, 0, 1, 1], [], []>} : vector<80x8xbf16>, vector<8x128xbf16>, vector<80x128xf32> -> vector<80x128xf32>
    %3 = arith.truncf %2 : vector<80x128xf32> to vector<80x128xbf16>
    %c0_3 = arith.constant 0 : index
    %c0_4 = arith.constant 0 : index
    %4 = vector.load %arg3[%c0_3, %c0_4] : memref<80x128xbf16, #tpu.memory_space<vmem>>, vector<80x128xbf16>
    tpu.vector_store %arg3[%c0_3, %c0_4], %3 {strides = array<i32>} : memref<80x128xbf16, #tpu.memory_space<vmem>>, vector<80x128xbf16>,
    return
  }
  func.func @transform_0(%arg0: i32) -> (i32, i32) {
    %c0_i32 = arith.constant 0 : i32
    %c0_i32_0 = arith.constant 0 : i32
    %c0_i32_1 = arith.constant 0 : i32
    return %c0_i32, %c0_i32_0 : i32, i32
  }
  func.func @transform_1(%arg0: i32) -> (i32, i32) {
    %c0_i32 = arith.constant 0 : i32
    %c0_i32_0 = arith.constant 0 : i32
    return %c0_i32, %arg0 : i32, i32
  }
  func.func @transform_2(%arg0: i32) -> (i32, i32) {
    %c0_i32 = arith.constant 0 : i32
    %c0_i32_0 = arith.constant 0 : i32
    return %c0_i32, %arg0 : i32, i32
  }
}

module attributes {stable_mosaic.version = 11 : i64} {
  func.func @_fused_mm_kernel(%arg0: i32, %arg1: memref<8x72xbf16, #tpu.memory_space<vmem>>, %arg2: memref<8x72xbf16, #tpu.memory_space<vmem>>, %arg3: memref<8x72xbf16, #tpu.memory_space<vmem>>, %arg4: memref<72x128xbf16, #tpu.memory_space<vmem>>, %arg5: memref<72x128xbf16, #tpu.memory_space<vmem>>, %arg6: memref<72x128xbf16, #tpu.memory_space<vmem>>, %arg7: memref<8x128xbf16, #tpu.memory_space<vmem>>, %arg8: memref<8x128xbf16, #tpu.memory_space<vmem>>) attributes {dimension_semantics = [#tpu.dimension_semantics<parallel>], iteration_bounds = array<i64: 5>, scalar_prefetch = 0 : i64, scratch_operands = 0 : i64, tpu.core_type = #tpu.core_type<tc>, window_params = [{pipeline_mode = #tpu.pipeline_mode<synchronous>, transform_indices = @transform_0, window_bounds = array<i64: 8, 72>}, {pipeline_mode = #tpu.pipeline_mode<synchronous>, transform_indices = @transform_1, window_bounds = array<i64: 8, 72>}, {pipeline_mode = #tpu.pipeline_mode<synchronous>, transform_indices = @transform_2, window_bounds = array<i64: 8, 72>}, {transform_indices = @transform_3, window_bounds = array<i64: 72, 128>}, {transform_indices = @transform_4, window_bounds = array<i64: 72, 128>}, {transform_indices = @transform_5, window_bounds = array<i64: 72, 128>}, {transform_indices = @transform_6, window_bounds = array<i64: 8, 128>}, {transform_indices = @transform_7, window_bounds = array<i64: 8, 128>}]} {
    %c0 = arith.constant 0 : index
    %c0_0 = arith.constant 0 : index
    %0 = vector.load %arg1[%c0, %c0_0] : memref<8x72xbf16, #tpu.memory_space<vmem>>, vector<8x72xbf16>
    %c0_1 = arith.constant 0 : index
    %c0_2 = arith.constant 0 : index
    %1 = vector.load %arg4[%c0_1, %c0_2] : memref<72x128xbf16, #tpu.memory_space<vmem>>, vector<72x128xbf16>
    %cst = arith.constant dense<0.000000e+00> : vector<8x128xf32>
    %2 = tpu.matmul %0, %1, %cst {dimension_numbers = #tpu.dot_dimension_numbers<[1], [0], [0], [1], [0, 0, 1, 1], [], []>} : vector<8x72xbf16>, vector<72x128xbf16>, vector<8x128xf32> -> vector<8x128xf32>
    %c0_3 = arith.constant 0 : index
    %c0_4 = arith.constant 0 : index
    %3 = vector.load %arg2[%c0_3, %c0_4] : memref<8x72xbf16, #tpu.memory_space<vmem>>, vector<8x72xbf16>
    %c0_5 = arith.constant 0 : index
    %c0_6 = arith.constant 0 : index
    %4 = vector.load %arg5[%c0_5, %c0_6] : memref<72x128xbf16, #tpu.memory_space<vmem>>, vector<72x128xbf16>
    %cst_7 = arith.constant dense<0.000000e+00> : vector<8x128xf32>
    %5 = tpu.matmul %3, %4, %cst_7 {dimension_numbers = #tpu.dot_dimension_numbers<[1], [0], [0], [1], [0, 0, 1, 1], [], []>} : vector<8x72xbf16>, vector<72x128xbf16>, vector<8x128xf32> -> vector<8x128xf32>
    %6 = arith.addf %2, %5 : vector<8x128xf32>
    %c0_8 = arith.constant 0 : index
    %c0_9 = arith.constant 0 : index
    %7 = vector.load %arg3[%c0_8, %c0_9] : memref<8x72xbf16, #tpu.memory_space<vmem>>, vector<8x72xbf16>
    %c0_10 = arith.constant 0 : index
    %c0_11 = arith.constant 0 : index
    %8 = vector.load %arg6[%c0_10, %c0_11] : memref<72x128xbf16, #tpu.memory_space<vmem>>, vector<72x128xbf16>
    %cst_12 = arith.constant dense<0.000000e+00> : vector<8x128xf32>
    %9 = tpu.matmul %7, %8, %cst_12 {dimension_numbers = #tpu.dot_dimension_numbers<[1], [0], [0], [1], [0, 0, 1, 1], [], []>} : vector<8x72xbf16>, vector<72x128xbf16>, vector<8x128xf32> -> vector<8x128xf32>
    %10 = arith.addf %6, %9 : vector<8x128xf32>
    %cst_13 = arith.constant 0.000000e+00 : f32
    %11 = vector.broadcast %cst_13 : f32 to vector<8x128xf32>
    %12 = arith.cmpf oge, %10, %11 : vector<8x128xf32>
    %cst_14 = arith.constant 1.000000e-01 : f32
    %13 = vector.broadcast %cst_14 : f32 to vector<8x128xf32>
    %14 = arith.mulf %13, %10 : vector<8x128xf32>
    %15 = arith.select %12, %10, %14 : vector<8x128xi1>, vector<8x128xf32>
    %c0_15 = arith.constant 0 : index
    %c0_16 = arith.constant 0 : index
    %16 = vector.load %arg7[%c0_15, %c0_16] : memref<8x128xbf16, #tpu.memory_space<vmem>>, vector<8x128xbf16>
    %17 = arith.extf %16 : vector<8x128xbf16> to vector<8x128xf32>
    %18 = arith.addf %15, %17 : vector<8x128xf32>
    %19 = arith.truncf %18 : vector<8x128xf32> to vector<8x128xbf16>
    %c0_17 = arith.constant 0 : index
    %c0_18 = arith.constant 0 : index
    %20 = vector.load %arg8[%c0_17, %c0_18] : memref<8x128xbf16, #tpu.memory_space<vmem>>, vector<8x128xbf16>
    tpu.vector_store %arg8[%c0_17, %c0_18], %19 {strides = array<i32>} : memref<8x128xbf16, #tpu.memory_space<vmem>>, vector<8x128xbf16>,
    return
  }
  func.func @transform_0(%arg0: i32) -> (i32, i32) {
    %c0_i32 = arith.constant 0 : i32
    %c0_i32_0 = arith.constant 0 : i32
    %c0_i32_1 = arith.constant 0 : i32
    return %c0_i32, %c0_i32_0 : i32, i32
  }
  func.func @transform_1(%arg0: i32) -> (i32, i32) {
    %c0_i32 = arith.constant 0 : i32
    %c0_i32_0 = arith.constant 0 : i32
    %c0_i32_1 = arith.constant 0 : i32
    return %c0_i32, %c0_i32_0 : i32, i32
  }
  func.func @transform_2(%arg0: i32) -> (i32, i32) {
    %c0_i32 = arith.constant 0 : i32
    %c0_i32_0 = arith.constant 0 : i32
    %c0_i32_1 = arith.constant 0 : i32
    return %c0_i32, %c0_i32_0 : i32, i32
  }
  func.func @transform_3(%arg0: i32) -> (i32, i32) {
    %c0_i32 = arith.constant 0 : i32
    %c0_i32_0 = arith.constant 0 : i32
    return %c0_i32, %arg0 : i32, i32
  }
  func.func @transform_4(%arg0: i32) -> (i32, i32) {
    %c0_i32 = arith.constant 0 : i32
    %c0_i32_0 = arith.constant 0 : i32
    return %c0_i32, %arg0 : i32, i32
  }
  func.func @transform_5(%arg0: i32) -> (i32, i32) {
    %c0_i32 = arith.constant 0 : i32
    %c0_i32_0 = arith.constant 0 : i32
    return %c0_i32, %arg0 : i32, i32
  }
  func.func @transform_6(%arg0: i32) -> (i32, i32) {
    %c0_i32 = arith.constant 0 : i32
    %c0_i32_0 = arith.constant 0 : i32
    return %c0_i32, %arg0 : i32, i32
  }
  func.func @transform_7(%arg0: i32) -> (i32, i32) {
    %c0_i32 = arith.constant 0 : i32
    %c0_i32_0 = arith.constant 0 : i32
    return %c0_i32, %arg0 : i32, i32
  }
}

module attributes {stable_mosaic.version = 11 : i64} {
  func.func @_fused_mm_kernel(%arg0: i32, %arg1: memref<8x72xbf16, #tpu.memory_space<vmem>>, %arg2: memref<8x72xbf16, #tpu.memory_space<vmem>>, %arg3: memref<72x128xbf16, #tpu.memory_space<vmem>>, %arg4: memref<72x128xbf16, #tpu.memory_space<vmem>>, %arg5: memref<8x128xbf16, #tpu.memory_space<vmem>>) attributes {dimension_semantics = [#tpu.dimension_semantics<parallel>], iteration_bounds = array<i64: 5>, scalar_prefetch = 0 : i64, scratch_operands = 0 : i64, tpu.core_type = #tpu.core_type<tc>, window_params = [{pipeline_mode = #tpu.pipeline_mode<synchronous>, transform_indices = @transform_0, window_bounds = array<i64: 8, 72>}, {pipeline_mode = #tpu.pipeline_mode<synchronous>, transform_indices = @transform_1, window_bounds = array<i64: 8, 72>}, {transform_indices = @transform_2, window_bounds = array<i64: 72, 128>}, {transform_indices = @transform_3, window_bounds = array<i64: 72, 128>}, {transform_indices = @transform_4, window_bounds = array<i64: 8, 128>}]} {
    %c0 = arith.constant 0 : index
    %c0_0 = arith.constant 0 : index
    %0 = vector.load %arg1[%c0, %c0_0] : memref<8x72xbf16, #tpu.memory_space<vmem>>, vector<8x72xbf16>
    %c0_1 = arith.constant 0 : index
    %c0_2 = arith.constant 0 : index
    %1 = vector.load %arg3[%c0_1, %c0_2] : memref<72x128xbf16, #tpu.memory_space<vmem>>, vector<72x128xbf16>
    %cst = arith.constant dense<0.000000e+00> : vector<8x128xf32>
    %2 = tpu.matmul %0, %1, %cst {dimension_numbers = #tpu.dot_dimension_numbers<[1], [0], [0], [1], [0, 0, 1, 1], [], []>} : vector<8x72xbf16>, vector<72x128xbf16>, vector<8x128xf32> -> vector<8x128xf32>
    %c0_3 = arith.constant 0 : index
    %c0_4 = arith.constant 0 : index
    %3 = vector.load %arg2[%c0_3, %c0_4] : memref<8x72xbf16, #tpu.memory_space<vmem>>, vector<8x72xbf16>
    %c0_5 = arith.constant 0 : index
    %c0_6 = arith.constant 0 : index
    %4 = vector.load %arg4[%c0_5, %c0_6] : memref<72x128xbf16, #tpu.memory_space<vmem>>, vector<72x128xbf16>
    %cst_7 = arith.constant dense<0.000000e+00> : vector<8x128xf32>
    %5 = tpu.matmul %3, %4, %cst_7 {dimension_numbers = #tpu.dot_dimension_numbers<[1], [0], [0], [1], [0, 0, 1, 1], [], []>} : vector<8x72xbf16>, vector<72x128xbf16>, vector<8x128xf32> -> vector<8x128xf32>
    %6 = arith.addf %2, %5 : vector<8x128xf32>
    %cst_8 = arith.constant 0.000000e+00 : f32
    %7 = vector.broadcast %cst_8 : f32 to vector<8x128xf32>
    %8 = arith.cmpf oge, %6, %7 : vector<8x128xf32>
    %cst_9 = arith.constant 1.000000e-01 : f32
    %9 = vector.broadcast %cst_9 : f32 to vector<8x128xf32>
    %10 = arith.mulf %9, %6 : vector<8x128xf32>
    %11 = arith.select %8, %6, %10 : vector<8x128xi1>, vector<8x128xf32>
    %12 = arith.truncf %11 : vector<8x128xf32> to vector<8x128xbf16>
    %c0_10 = arith.constant 0 : index
    %c0_11 = arith.constant 0 : index
    %13 = vector.load %arg5[%c0_10, %c0_11] : memref<8x128xbf16, #tpu.memory_space<vmem>>, vector<8x128xbf16>
    tpu.vector_store %arg5[%c0_10, %c0_11], %12 {strides = array<i32>} : memref<8x128xbf16, #tpu.memory_space<vmem>>, vector<8x128xbf16>,
    return
  }
  func.func @transform_0(%arg0: i32) -> (i32, i32) {
    %c0_i32 = arith.constant 0 : i32
    %c0_i32_0 = arith.constant 0 : i32
    %c0_i32_1 = arith.constant 0 : i32
    return %c0_i32, %c0_i32_0 : i32, i32
  }
  func.func @transform_1(%arg0: i32) -> (i32, i32) {
    %c0_i32 = arith.constant 0 : i32
    %c0_i32_0 = arith.constant 0 : i32
    %c0_i32_1 = arith.constant 0 : i32
    return %c0_i32, %c0_i32_0 : i32, i32
  }
  func.func @transform_2(%arg0: i32) -> (i32, i32) {
    %c0_i32 = arith.constant 0 : i32
    %c0_i32_0 = arith.constant 0 : i32
    return %c0_i32, %arg0 : i32, i32
  }
  func.func @transform_3(%arg0: i32) -> (i32, i32) {
    %c0_i32 = arith.constant 0 : i32
    %c0_i32_0 = arith.constant 0 : i32
    return %c0_i32, %arg0 : i32, i32
  }
  func.func @transform_4(%arg0: i32) -> (i32, i32) {
    %c0_i32 = arith.constant 0 : i32
    %c0_i32_0 = arith.constant 0 : i32
    return %c0_i32, %arg0 : i32, i32
  }
}

module attributes {stable_mosaic.version = 11 : i64} {
  func.func @_fused_mm_kernel(%arg0: i32, %arg1: memref<8x8xbf16, #tpu.memory_space<vmem>>, %arg2: memref<8x8xbf16, #tpu.memory_space<vmem>>, %arg3: memref<8x128xbf16, #tpu.memory_space<vmem>>, %arg4: memref<8x128xbf16, #tpu.memory_space<vmem>>, %arg5: memref<8x128xbf16, #tpu.memory_space<vmem>>, %arg6: memref<8x128xbf16, #tpu.memory_space<vmem>>) attributes {dimension_semantics = [#tpu.dimension_semantics<parallel>], iteration_bounds = array<i64: 1>, scalar_prefetch = 0 : i64, scratch_operands = 0 : i64, tpu.core_type = #tpu.core_type<tc>, window_params = [{pipeline_mode = #tpu.pipeline_mode<synchronous>, transform_indices = @transform_0, window_bounds = array<i64: 8, 8>}, {pipeline_mode = #tpu.pipeline_mode<synchronous>, transform_indices = @transform_1, window_bounds = array<i64: 8, 8>}, {transform_indices = @transform_2, window_bounds = array<i64: 8, 128>}, {transform_indices = @transform_3, window_bounds = array<i64: 8, 128>}, {transform_indices = @transform_4, window_bounds = array<i64: 8, 128>}, {transform_indices = @transform_5, window_bounds = array<i64: 8, 128>}]} {
    %c0 = arith.constant 0 : index
    %c0_0 = arith.constant 0 : index
    %0 = vector.load %arg1[%c0, %c0_0] : memref<8x8xbf16, #tpu.memory_space<vmem>>, vector<8x8xbf16>
    %c0_1 = arith.constant 0 : index
    %c0_2 = arith.constant 0 : index
    %1 = vector.load %arg3[%c0_1, %c0_2] : memref<8x128xbf16, #tpu.memory_space<vmem>>, vector<8x128xbf16>
    %cst = arith.constant dense<0.000000e+00> : vector<8x128xf32>
    %2 = tpu.matmul %0, %1, %cst {dimension_numbers = #tpu.dot_dimension_numbers<[1], [0], [0], [1], [0, 0, 1, 1], [], []>} : vector<8x8xbf16>, vector<8x128xbf16>, vector<8x128xf32> -> vector<8x128xf32>
    %c0_3 = arith.constant 0 : index
    %c0_4 = arith.constant 0 : index
    %3 = vector.load %arg2[%c0_3, %c0_4] : memref<8x8xbf16, #tpu.memory_space<vmem>>, vector<8x8xbf16>
    %c0_5 = arith.constant 0 : index
    %c0_6 = arith.constant 0 : index
    %4 = vector.load %arg4[%c0_5, %c0_6] : memref<8x128xbf16, #tpu.memory_space<vmem>>, vector<8x128xbf16>
    %cst_7 = arith.constant dense<0.000000e+00> : vector<8x128xf32>
    %5 = tpu.matmul %3, %4, %cst_7 {dimension_numbers = #tpu.dot_dimension_numbers<[1], [0], [0], [1], [0, 0, 1, 1], [], []>} : vector<8x8xbf16>, vector<8x128xbf16>, vector<8x128xf32> -> vector<8x128xf32>
    %6 = arith.addf %2, %5 : vector<8x128xf32>
    %cst_8 = arith.constant 0.000000e+00 : f32
    %7 = vector.broadcast %cst_8 : f32 to vector<8x128xf32>
    %8 = arith.cmpf oge, %6, %7 : vector<8x128xf32>
    %cst_9 = arith.constant 1.000000e-01 : f32
    %9 = vector.broadcast %cst_9 : f32 to vector<8x128xf32>
    %10 = arith.mulf %9, %6 : vector<8x128xf32>
    %11 = arith.select %8, %6, %10 : vector<8x128xi1>, vector<8x128xf32>
    %c0_10 = arith.constant 0 : index
    %c0_11 = arith.constant 0 : index
    %12 = vector.load %arg5[%c0_10, %c0_11] : memref<8x128xbf16, #tpu.memory_space<vmem>>, vector<8x128xbf16>
    %13 = arith.extf %12 : vector<8x128xbf16> to vector<8x128xf32>
    %14 = arith.addf %11, %13 : vector<8x128xf32>
    %15 = arith.truncf %14 : vector<8x128xf32> to vector<8x128xbf16>
    %c0_12 = arith.constant 0 : index
    %c0_13 = arith.constant 0 : index
    %16 = vector.load %arg6[%c0_12, %c0_13] : memref<8x128xbf16, #tpu.memory_space<vmem>>, vector<8x128xbf16>
    tpu.vector_store %arg6[%c0_12, %c0_13], %15 {strides = array<i32>} : memref<8x128xbf16, #tpu.memory_space<vmem>>, vector<8x128xbf16>,
    return
  }
  func.func @transform_0(%arg0: i32) -> (i32, i32) {
    %c0_i32 = arith.constant 0 : i32
    %c0_i32_0 = arith.constant 0 : i32
    %c0_i32_1 = arith.constant 0 : i32
    return %c0_i32, %c0_i32_0 : i32, i32
  }
  func.func @transform_1(%arg0: i32) -> (i32, i32) {
    %c0_i32 = arith.constant 0 : i32
    %c0_i32_0 = arith.constant 0 : i32
    %c0_i32_1 = arith.constant 0 : i32
    return %c0_i32, %c0_i32_0 : i32, i32
  }
  func.func @transform_2(%arg0: i32) -> (i32, i32) {
    %c0_i32 = arith.constant 0 : i32
    %c0_i32_0 = arith.constant 0 : i32
    return %c0_i32, %arg0 : i32, i32
  }
  func.func @transform_3(%arg0: i32) -> (i32, i32) {
    %c0_i32 = arith.constant 0 : i32
    %c0_i32_0 = arith.constant 0 : i32
    return %c0_i32, %arg0 : i32, i32
  }
  func.func @transform_4(%arg0: i32) -> (i32, i32) {
    %c0_i32 = arith.constant 0 : i32
    %c0_i32_0 = arith.constant 0 : i32
    return %c0_i32, %arg0 : i32, i32
  }
  func.func @transform_5(%arg0: i32) -> (i32, i32) {
    %c0_i32 = arith.constant 0 : i32
    %c0_i32_0 = arith.constant 0 : i32
    return %c0_i32, %arg0 : i32, i32
  }
}

module attributes {stable_mosaic.version = 11 : i64} {
  func.func @_fused_mm_kernel(%arg0: i32, %arg1: memref<8x8xbf16, #tpu.memory_space<vmem>>, %arg2: memref<8x8xbf16, #tpu.memory_space<vmem>>, %arg3: memref<8x128xbf16, #tpu.memory_space<vmem>>, %arg4: memref<8x128xbf16, #tpu.memory_space<vmem>>, %arg5: memref<8x128xbf16, #tpu.memory_space<vmem>>) attributes {dimension_semantics = [#tpu.dimension_semantics<parallel>], iteration_bounds = array<i64: 1>, scalar_prefetch = 0 : i64, scratch_operands = 0 : i64, tpu.core_type = #tpu.core_type<tc>, window_params = [{pipeline_mode = #tpu.pipeline_mode<synchronous>, transform_indices = @transform_0, window_bounds = array<i64: 8, 8>}, {pipeline_mode = #tpu.pipeline_mode<synchronous>, transform_indices = @transform_1, window_bounds = array<i64: 8, 8>}, {transform_indices = @transform_2, window_bounds = array<i64: 8, 128>}, {transform_indices = @transform_3, window_bounds = array<i64: 8, 128>}, {transform_indices = @transform_4, window_bounds = array<i64: 8, 128>}]} {
    %c0 = arith.constant 0 : index
    %c0_0 = arith.constant 0 : index
    %0 = vector.load %arg1[%c0, %c0_0] : memref<8x8xbf16, #tpu.memory_space<vmem>>, vector<8x8xbf16>
    %c0_1 = arith.constant 0 : index
    %c0_2 = arith.constant 0 : index
    %1 = vector.load %arg3[%c0_1, %c0_2] : memref<8x128xbf16, #tpu.memory_space<vmem>>, vector<8x128xbf16>
    %cst = arith.constant dense<0.000000e+00> : vector<8x128xf32>
    %2 = tpu.matmul %0, %1, %cst {dimension_numbers = #tpu.dot_dimension_numbers<[1], [0], [0], [1], [0, 0, 1, 1], [], []>} : vector<8x8xbf16>, vector<8x128xbf16>, vector<8x128xf32> -> vector<8x128xf32>
    %c0_3 = arith.constant 0 : index
    %c0_4 = arith.constant 0 : index
    %3 = vector.load %arg2[%c0_3, %c0_4] : memref<8x8xbf16, #tpu.memory_space<vmem>>, vector<8x8xbf16>
    %c0_5 = arith.constant 0 : index
    %c0_6 = arith.constant 0 : index
    %4 = vector.load %arg4[%c0_5, %c0_6] : memref<8x128xbf16, #tpu.memory_space<vmem>>, vector<8x128xbf16>
    %cst_7 = arith.constant dense<0.000000e+00> : vector<8x128xf32>
    %5 = tpu.matmul %3, %4, %cst_7 {dimension_numbers = #tpu.dot_dimension_numbers<[1], [0], [0], [1], [0, 0, 1, 1], [], []>} : vector<8x8xbf16>, vector<8x128xbf16>, vector<8x128xf32> -> vector<8x128xf32>
    %6 = arith.addf %2, %5 : vector<8x128xf32>
    %cst_8 = arith.constant 0.000000e+00 : f32
    %7 = vector.broadcast %cst_8 : f32 to vector<8x128xf32>
    %8 = arith.cmpf oge, %6, %7 : vector<8x128xf32>
    %cst_9 = arith.constant 1.000000e-01 : f32
    %9 = vector.broadcast %cst_9 : f32 to vector<8x128xf32>
    %10 = arith.mulf %9, %6 : vector<8x128xf32>
    %11 = arith.select %8, %6, %10 : vector<8x128xi1>, vector<8x128xf32>
    %12 = arith.truncf %11 : vector<8x128xf32> to vector<8x128xbf16>
    %c0_10 = arith.constant 0 : index
    %c0_11 = arith.constant 0 : index
    %13 = vector.load %arg5[%c0_10, %c0_11] : memref<8x128xbf16, #tpu.memory_space<vmem>>, vector<8x128xbf16>
    tpu.vector_store %arg5[%c0_10, %c0_11], %12 {strides = array<i32>} : memref<8x128xbf16, #tpu.memory_space<vmem>>, vector<8x128xbf16>,
    return
  }
  func.func @transform_0(%arg0: i32) -> (i32, i32) {
    %c0_i32 = arith.constant 0 : i32
    %c0_i32_0 = arith.constant 0 : i32
    %c0_i32_1 = arith.constant 0 : i32
    return %c0_i32, %c0_i32_0 : i32, i32
  }
  func.func @transform_1(%arg0: i32) -> (i32, i32) {
    %c0_i32 = arith.constant 0 : i32
    %c0_i32_0 = arith.constant 0 : i32
    %c0_i32_1 = arith.constant 0 : i32
    return %c0_i32, %c0_i32_0 : i32, i32
  }
  func.func @transform_2(%arg0: i32) -> (i32, i32) {
    %c0_i32 = arith.constant 0 : i32
    %c0_i32_0 = arith.constant 0 : i32
    return %c0_i32, %arg0 : i32, i32
  }
  func.func @transform_3(%arg0: i32) -> (i32, i32) {
    %c0_i32 = arith.constant 0 : i32
    %c0_i32_0 = arith.constant 0 : i32
    return %c0_i32, %arg0 : i32, i32
  }
  func.func @transform_4(%arg0: i32) -> (i32, i32) {
    %c0_i32 = arith.constant 0 : i32
    %c0_i32_0 = arith.constant 0 : i32
    return %c0_i32, %arg0 : i32, i32
  }
}

module attributes {stable_mosaic.version = 11 : i64} {
  func.func @_fused_mm_kernel(%arg0: i32, %arg1: memref<72x8xbf16, #tpu.memory_space<vmem>>, %arg2: memref<8x128xbf16, #tpu.memory_space<vmem>>, %arg3: memref<72x128xbf16, #tpu.memory_space<vmem>>) attributes {dimension_semantics = [#tpu.dimension_semantics<parallel>], iteration_bounds = array<i64: 1>, scalar_prefetch = 0 : i64, scratch_operands = 0 : i64, tpu.core_type = #tpu.core_type<tc>, window_params = [{pipeline_mode = #tpu.pipeline_mode<synchronous>, transform_indices = @transform_0, window_bounds = array<i64: 72, 8>}, {transform_indices = @transform_1, window_bounds = array<i64: 8, 128>}, {transform_indices = @transform_2, window_bounds = array<i64: 72, 128>}]} {
    %c0 = arith.constant 0 : index
    %c0_0 = arith.constant 0 : index
    %0 = vector.load %arg1[%c0, %c0_0] : memref<72x8xbf16, #tpu.memory_space<vmem>>, vector<72x8xbf16>
    %c0_1 = arith.constant 0 : index
    %c0_2 = arith.constant 0 : index
    %1 = vector.load %arg2[%c0_1, %c0_2] : memref<8x128xbf16, #tpu.memory_space<vmem>>, vector<8x128xbf16>
    %cst = arith.constant dense<0.000000e+00> : vector<72x128xf32>
    %2 = tpu.matmul %0, %1, %cst {dimension_numbers = #tpu.dot_dimension_numbers<[1], [0], [0], [1], [0, 0, 1, 1], [], []>} : vector<72x8xbf16>, vector<8x128xbf16>, vector<72x128xf32> -> vector<72x128xf32>
    %3 = arith.truncf %2 : vector<72x128xf32> to vector<72x128xbf16>
    %c0_3 = arith.constant 0 : index
    %c0_4 = arith.constant 0 : index
    %4 = vector.load %arg3[%c0_3, %c0_4] : memref<72x128xbf16, #tpu.memory_space<vmem>>, vector<72x128xbf16>
    tpu.vector_store %arg3[%c0_3, %c0_4], %3 {strides = array<i32>} : memref<72x128xbf16, #tpu.memory_space<vmem>>, vector<72x128xbf16>,
    return
  }
  func.func @transform_0(%arg0: i32) -> (i32, i32) {
    %c0_i32 = arith.constant 0 : i32
    %c0_i32_0 = arith.constant 0 : i32
    %c0_i32_1 = arith.constant 0 : i32
    return %c0_i32, %c0_i32_0 : i32, i32
  }
  func.func @transform_1(%arg0: i32) -> (i32, i32) {
    %c0_i32 = arith.constant 0 : i32
    %c0_i32_0 = arith.constant 0 : i32
    return %c0_i32, %arg0 : i32, i32
  }
  func.func @transform_2(%arg0: i32) -> (i32, i32) {
    %c0_i32 = arith.constant 0 : i32
    %c0_i32_0 = arith.constant 0 : i32
    return %c0_i32, %arg0 : i32, i32
  }
}

module attributes {stable_mosaic.version = 11 : i64} {
  func.func @_fused_mm_kernel(%arg0: i32, %arg1: memref<8x72xbf16, #tpu.memory_space<vmem>>, %arg2: memref<8x72xbf16, #tpu.memory_space<vmem>>, %arg3: memref<8x72xbf16, #tpu.memory_space<vmem>>, %arg4: memref<8x72xbf16, #tpu.memory_space<vmem>>, %arg5: memref<72x128xbf16, #tpu.memory_space<vmem>>, %arg6: memref<72x128xbf16, #tpu.memory_space<vmem>>, %arg7: memref<72x128xbf16, #tpu.memory_space<vmem>>, %arg8: memref<72x128xbf16, #tpu.memory_space<vmem>>, %arg9: memref<8x128xbf16, #tpu.memory_space<vmem>>) attributes {dimension_semantics = [#tpu.dimension_semantics<parallel>], iteration_bounds = array<i64: 5>, scalar_prefetch = 0 : i64, scratch_operands = 0 : i64, tpu.core_type = #tpu.core_type<tc>, window_params = [{pipeline_mode = #tpu.pipeline_mode<synchronous>, transform_indices = @transform_0, window_bounds = array<i64: 8, 72>}, {pipeline_mode = #tpu.pipeline_mode<synchronous>, transform_indices = @transform_1, window_bounds = array<i64: 8, 72>}, {pipeline_mode = #tpu.pipeline_mode<synchronous>, transform_indices = @transform_2, window_bounds = array<i64: 8, 72>}, {pipeline_mode = #tpu.pipeline_mode<synchronous>, transform_indices = @transform_3, window_bounds = array<i64: 8, 72>}, {transform_indices = @transform_4, window_bounds = array<i64: 72, 128>}, {transform_indices = @transform_5, window_bounds = array<i64: 72, 128>}, {transform_indices = @transform_6, window_bounds = array<i64: 72, 128>}, {transform_indices = @transform_7, window_bounds = array<i64: 72, 128>}, {transform_indices = @transform_8, window_bounds = array<i64: 8, 128>}]} {
    %c0 = arith.constant 0 : index
    %c0_0 = arith.constant 0 : index
    %0 = vector.load %arg1[%c0, %c0_0] : memref<8x72xbf16, #tpu.memory_space<vmem>>, vector<8x72xbf16>
    %c0_1 = arith.constant 0 : index
    %c0_2 = arith.constant 0 : index
    %1 = vector.load %arg5[%c0_1, %c0_2] : memref<72x128xbf16, #tpu.memory_space<vmem>>, vector<72x128xbf16>
    %cst = arith.constant dense<0.000000e+00> : vector<8x128xf32>
    %2 = tpu.matmul %0, %1, %cst {dimension_numbers = #tpu.dot_dimension_numbers<[1], [0], [0], [1], [0, 0, 1, 1], [], []>} : vector<8x72xbf16>, vector<72x128xbf16>, vector<8x128xf32> -> vector<8x128xf32>
    %c0_3 = arith.constant 0 : index
    %c0_4 = arith.constant 0 : index
    %3 = vector.load %arg2[%c0_3, %c0_4] : memref<8x72xbf16, #tpu.memory_space<vmem>>, vector<8x72xbf16>
    %c0_5 = arith.constant 0 : index
    %c0_6 = arith.constant 0 : index
    %4 = vector.load %arg6[%c0_5, %c0_6] : memref<72x128xbf16, #tpu.memory_space<vmem>>, vector<72x128xbf16>
    %cst_7 = arith.constant dense<0.000000e+00> : vector<8x128xf32>
    %5 = tpu.matmul %3, %4, %cst_7 {dimension_numbers = #tpu.dot_dimension_numbers<[1], [0], [0], [1], [0, 0, 1, 1], [], []>} : vector<8x72xbf16>, vector<72x128xbf16>, vector<8x128xf32> -> vector<8x128xf32>
    %6 = arith.addf %2, %5 : vector<8x128xf32>
    %c0_8 = arith.constant 0 : index
    %c0_9 = arith.constant 0 : index
    %7 = vector.load %arg3[%c0_8, %c0_9] : memref<8x72xbf16, #tpu.memory_space<vmem>>, vector<8x72xbf16>
    %c0_10 = arith.constant 0 : index
    %c0_11 = arith.constant 0 : index
    %8 = vector.load %arg7[%c0_10, %c0_11] : memref<72x128xbf16, #tpu.memory_space<vmem>>, vector<72x128xbf16>
    %cst_12 = arith.constant dense<0.000000e+00> : vector<8x128xf32>
    %9 = tpu.matmul %7, %8, %cst_12 {dimension_numbers = #tpu.dot_dimension_numbers<[1], [0], [0], [1], [0, 0, 1, 1], [], []>} : vector<8x72xbf16>, vector<72x128xbf16>, vector<8x128xf32> -> vector<8x128xf32>
    %10 = arith.addf %6, %9 : vector<8x128xf32>
    %c0_13 = arith.constant 0 : index
    %c0_14 = arith.constant 0 : index
    %11 = vector.load %arg4[%c0_13, %c0_14] : memref<8x72xbf16, #tpu.memory_space<vmem>>, vector<8x72xbf16>
    %c0_15 = arith.constant 0 : index
    %c0_16 = arith.constant 0 : index
    %12 = vector.load %arg8[%c0_15, %c0_16] : memref<72x128xbf16, #tpu.memory_space<vmem>>, vector<72x128xbf16>
    %cst_17 = arith.constant dense<0.000000e+00> : vector<8x128xf32>
    %13 = tpu.matmul %11, %12, %cst_17 {dimension_numbers = #tpu.dot_dimension_numbers<[1], [0], [0], [1], [0, 0, 1, 1], [], []>} : vector<8x72xbf16>, vector<72x128xbf16>, vector<8x128xf32> -> vector<8x128xf32>
    %14 = arith.addf %10, %13 : vector<8x128xf32>
    %cst_18 = arith.constant 0.000000e+00 : f32
    %15 = vector.broadcast %cst_18 : f32 to vector<8x128xf32>
    %16 = arith.cmpf oge, %14, %15 : vector<8x128xf32>
    %cst_19 = arith.constant 1.000000e-01 : f32
    %17 = vector.broadcast %cst_19 : f32 to vector<8x128xf32>
    %18 = arith.mulf %17, %14 : vector<8x128xf32>
    %19 = arith.select %16, %14, %18 : vector<8x128xi1>, vector<8x128xf32>
    %20 = arith.truncf %19 : vector<8x128xf32> to vector<8x128xbf16>
    %c0_20 = arith.constant 0 : index
    %c0_21 = arith.constant 0 : index
    %21 = vector.load %arg9[%c0_20, %c0_21] : memref<8x128xbf16, #tpu.memory_space<vmem>>, vector<8x128xbf16>
    tpu.vector_store %arg9[%c0_20, %c0_21], %20 {strides = array<i32>} : memref<8x128xbf16, #tpu.memory_space<vmem>>, vector<8x128xbf16>,
    return
  }
  func.func @transform_0(%arg0: i32) -> (i32, i32) {
    %c0_i32 = arith.constant 0 : i32
    %c0_i32_0 = arith.constant 0 : i32
    %c0_i32_1 = arith.constant 0 : i32
    return %c0_i32, %c0_i32_0 : i32, i32
  }
  func.func @transform_1(%arg0: i32) -> (i32, i32) {
    %c0_i32 = arith.constant 0 : i32
    %c0_i32_0 = arith.constant 0 : i32
    %c0_i32_1 = arith.constant 0 : i32
    return %c0_i32, %c0_i32_0 : i32, i32
  }
  func.func @transform_2(%arg0: i32) -> (i32, i32) {
    %c0_i32 = arith.constant 0 : i32
    %c0_i32_0 = arith.constant 0 : i32
    %c0_i32_1 = arith.constant 0 : i32
    return %c0_i32, %c0_i32_0 : i32, i32
  }
  func.func @transform_3(%arg0: i32) -> (i32, i32) {
    %c0_i32 = arith.constant 0 : i32
    %c0_i32_0 = arith.constant 0 : i32
    %c0_i32_1 = arith.constant 0 : i32
    return %c0_i32, %c0_i32_0 : i32, i32
  }
  func.func @transform_4(%arg0: i32) -> (i32, i32) {
    %c0_i32 = arith.constant 0 : i32
    %c0_i32_0 = arith.constant 0 : i32
    return %c0_i32, %arg0 : i32, i32
  }
  func.func @transform_5(%arg0: i32) -> (i32, i32) {
    %c0_i32 = arith.constant 0 : i32
    %c0_i32_0 = arith.constant 0 : i32
    return %c0_i32, %arg0 : i32, i32
  }
  func.func @transform_6(%arg0: i32) -> (i32, i32) {
    %c0_i32 = arith.constant 0 : i32
    %c0_i32_0 = arith.constant 0 : i32
    return %c0_i32, %arg0 : i32, i32
  }
  func.func @transform_7(%arg0: i32) -> (i32, i32) {
    %c0_i32 = arith.constant 0 : i32
    %c0_i32_0 = arith.constant 0 : i32
    return %c0_i32, %arg0 : i32, i32
  }
  func.func @transform_8(%arg0: i32) -> (i32, i32) {
    %c0_i32 = arith.constant 0 : i32
    %c0_i32_0 = arith.constant 0 : i32
    return %c0_i32, %arg0 : i32, i32
  }
}

module attributes {stable_mosaic.version = 11 : i64} {
  func.func @_fused_mm_kernel(%arg0: i32, %arg1: memref<32x72xbf16, #tpu.memory_space<vmem>>, %arg2: memref<72x128xbf16, #tpu.memory_space<vmem>>, %arg3: memref<32x128xbf16, #tpu.memory_space<vmem>>) attributes {dimension_semantics = [#tpu.dimension_semantics<parallel>], iteration_bounds = array<i64: 5>, scalar_prefetch = 0 : i64, scratch_operands = 0 : i64, tpu.core_type = #tpu.core_type<tc>, window_params = [{pipeline_mode = #tpu.pipeline_mode<synchronous>, transform_indices = @transform_0, window_bounds = array<i64: 32, 72>}, {transform_indices = @transform_1, window_bounds = array<i64: 72, 128>}, {transform_indices = @transform_2, window_bounds = array<i64: 32, 128>}]} {
    %c0 = arith.constant 0 : index
    %c0_0 = arith.constant 0 : index
    %0 = vector.load %arg1[%c0, %c0_0] : memref<32x72xbf16, #tpu.memory_space<vmem>>, vector<32x72xbf16>
    %c0_1 = arith.constant 0 : index
    %c0_2 = arith.constant 0 : index
    %1 = vector.load %arg2[%c0_1, %c0_2] : memref<72x128xbf16, #tpu.memory_space<vmem>>, vector<72x128xbf16>
    %cst = arith.constant dense<0.000000e+00> : vector<32x128xf32>
    %2 = tpu.matmul %0, %1, %cst {dimension_numbers = #tpu.dot_dimension_numbers<[1], [0], [0], [1], [0, 0, 1, 1], [], []>} : vector<32x72xbf16>, vector<72x128xbf16>, vector<32x128xf32> -> vector<32x128xf32>
    %3 = arith.truncf %2 : vector<32x128xf32> to vector<32x128xbf16>
    %c0_3 = arith.constant 0 : index
    %c0_4 = arith.constant 0 : index
    %4 = vector.load %arg3[%c0_3, %c0_4] : memref<32x128xbf16, #tpu.memory_space<vmem>>, vector<32x128xbf16>
    tpu.vector_store %arg3[%c0_3, %c0_4], %3 {strides = array<i32>} : memref<32x128xbf16, #tpu.memory_space<vmem>>, vector<32x128xbf16>,
    return
  }
  func.func @transform_0(%arg0: i32) -> (i32, i32) {
    %c0_i32 = arith.constant 0 : i32
    %c0_i32_0 = arith.constant 0 : i32
    %c0_i32_1 = arith.constant 0 : i32
    return %c0_i32, %c0_i32_0 : i32, i32
  }
  func.func @transform_1(%arg0: i32) -> (i32, i32) {
    %c0_i32 = arith.constant 0 : i32
    %c0_i32_0 = arith.constant 0 : i32
    return %c0_i32, %arg0 : i32, i32
  }
  func.func @transform_2(%arg0: i32) -> (i32, i32) {
    %c0_i32 = arith.constant 0 : i32
    %c0_i32_0 = arith.constant 0 : i32
    return %c0_i32, %arg0 : i32, i32
  }
}

module attributes {stable_mosaic.version = 11 : i64} {
  func.func @_fused_mm_kernel(%arg0: i32, %arg1: memref<1x8xbf16, #tpu.memory_space<vmem>>, %arg2: memref<8x768xbf16, #tpu.memory_space<vmem>>, %arg3: memref<1x768xf32, #tpu.memory_space<vmem>>) attributes {dimension_semantics = [#tpu.dimension_semantics<parallel>], iteration_bounds = array<i64: 3>, scalar_prefetch = 0 : i64, scratch_operands = 0 : i64, tpu.core_type = #tpu.core_type<tc>, window_params = [{pipeline_mode = #tpu.pipeline_mode<synchronous>, transform_indices = @transform_0, window_bounds = array<i64: 1, 8>}, {transform_indices = @transform_1, window_bounds = array<i64: 8, 768>}, {transform_indices = @transform_2, window_bounds = array<i64: 1, 768>}]} {
    %c0 = arith.constant 0 : index
    %c0_0 = arith.constant 0 : index
    %0 = vector.load %arg1[%c0, %c0_0] : memref<1x8xbf16, #tpu.memory_space<vmem>>, vector<1x8xbf16>
    %c0_1 = arith.constant 0 : index
    %c0_2 = arith.constant 0 : index
    %1 = vector.load %arg2[%c0_1, %c0_2] : memref<8x768xbf16, #tpu.memory_space<vmem>>, vector<8x768xbf16>
    %cst = arith.constant dense<0.000000e+00> : vector<1x768xf32>
    %2 = tpu.matmul %0, %1, %cst {dimension_numbers = #tpu.dot_dimension_numbers<[1], [0], [0], [1], [0, 0, 1, 1], [], []>} : vector<1x8xbf16>, vector<8x768xbf16>, vector<1x768xf32> -> vector<1x768xf32>
    %c0_3 = arith.constant 0 : index
    %c0_4 = arith.constant 0 : index
    %3 = vector.load %arg3[%c0_3, %c0_4] : memref<1x768xf32, #tpu.memory_space<vmem>>, vector<1x768xf32>
    tpu.vector_store %arg3[%c0_3, %c0_4], %2 {strides = array<i32>} : memref<1x768xf32, #tpu.memory_space<vmem>>, vector<1x768xf32>,
    return
  }
  func.func @transform_0(%arg0: i32) -> (i32, i32) {
    %c0_i32 = arith.constant 0 : i32
    %c0_i32_0 = arith.constant 0 : i32
    %c0_i32_1 = arith.constant 0 : i32
    return %c0_i32, %c0_i32_0 : i32, i32
  }
  func.func @transform_1(%arg0: i32) -> (i32, i32) {
    %c0_i32 = arith.constant 0 : i32
    %c0_i32_0 = arith.constant 0 : i32
    return %c0_i32, %arg0 : i32, i32
  }
  func.func @transform_2(%arg0: i32) -> (i32, i32) {
    %c0_i32 = arith.constant 0 : i32
    %c0_i32_0 = arith.constant 0 : i32
    return %c0_i32, %arg0 : i32, i32
  }
}

module attributes {stable_mosaic.version = 11 : i64} {
  func.func @_fused_mm_kernel(%arg0: i32, %arg1: memref<16x8xbf16, #tpu.memory_space<vmem>>, %arg2: memref<8x128xbf16, #tpu.memory_space<vmem>>, %arg3: memref<16x128xbf16, #tpu.memory_space<vmem>>) attributes {dimension_semantics = [#tpu.dimension_semantics<parallel>], iteration_bounds = array<i64: 1>, scalar_prefetch = 0 : i64, scratch_operands = 0 : i64, tpu.core_type = #tpu.core_type<tc>, window_params = [{pipeline_mode = #tpu.pipeline_mode<synchronous>, transform_indices = @transform_0, window_bounds = array<i64: 16, 8>}, {transform_indices = @transform_1, window_bounds = array<i64: 8, 128>}, {transform_indices = @transform_2, window_bounds = array<i64: 16, 128>}]} {
    %c0 = arith.constant 0 : index
    %c0_0 = arith.constant 0 : index
    %0 = vector.load %arg1[%c0, %c0_0] : memref<16x8xbf16, #tpu.memory_space<vmem>>, vector<16x8xbf16>
    %c0_1 = arith.constant 0 : index
    %c0_2 = arith.constant 0 : index
    %1 = vector.load %arg2[%c0_1, %c0_2] : memref<8x128xbf16, #tpu.memory_space<vmem>>, vector<8x128xbf16>
    %cst = arith.constant dense<0.000000e+00> : vector<16x128xf32>
    %2 = tpu.matmul %0, %1, %cst {dimension_numbers = #tpu.dot_dimension_numbers<[1], [0], [0], [1], [0, 0, 1, 1], [], []>} : vector<16x8xbf16>, vector<8x128xbf16>, vector<16x128xf32> -> vector<16x128xf32>
    %3 = arith.truncf %2 : vector<16x128xf32> to vector<16x128xbf16>
    %c0_3 = arith.constant 0 : index
    %c0_4 = arith.constant 0 : index
    %4 = vector.load %arg3[%c0_3, %c0_4] : memref<16x128xbf16, #tpu.memory_space<vmem>>, vector<16x128xbf16>
    tpu.vector_store %arg3[%c0_3, %c0_4], %3 {strides = array<i32>} : memref<16x128xbf16, #tpu.memory_space<vmem>>, vector<16x128xbf16>,
    return
  }
  func.func @transform_0(%arg0: i32) -> (i32, i32) {
    %c0_i32 = arith.constant 0 : i32
    %c0_i32_0 = arith.constant 0 : i32
    %c0_i32_1 = arith.constant 0 : i32
    return %c0_i32, %c0_i32_0 : i32, i32
  }
  func.func @transform_1(%arg0: i32) -> (i32, i32) {
    %c0_i32 = arith.constant 0 : i32
    %c0_i32_0 = arith.constant 0 : i32
    return %c0_i32, %arg0 : i32, i32
  }
  func.func @transform_2(%arg0: i32) -> (i32, i32) {
    %c0_i32 = arith.constant 0 : i32
    %c0_i32_0 = arith.constant 0 : i32
    return %c0_i32, %arg0 : i32, i32
  }
}

module attributes {stable_mosaic.version = 11 : i64} {
  func.func @_fused_mm_kernel(%arg0: i32, %arg1: memref<16x8xbf16, #tpu.memory_space<vmem>>, %arg2: memref<8x128xbf16, #tpu.memory_space<vmem>>, %arg3: memref<16x128xf32, #tpu.memory_space<vmem>>, %arg4: memref<16x128xf32, #tpu.memory_space<vmem>>) attributes {dimension_semantics = [#tpu.dimension_semantics<parallel>], iteration_bounds = array<i64: 2>, scalar_prefetch = 0 : i64, scratch_operands = 0 : i64, tpu.core_type = #tpu.core_type<tc>, window_params = [{pipeline_mode = #tpu.pipeline_mode<synchronous>, transform_indices = @transform_0, window_bounds = array<i64: 16, 8>}, {transform_indices = @transform_1, window_bounds = array<i64: 8, 128>}, {transform_indices = @transform_2, window_bounds = array<i64: 16, 128>}, {transform_indices = @transform_3, window_bounds = array<i64: 16, 128>}]} {
    %c0 = arith.constant 0 : index
    %c0_0 = arith.constant 0 : index
    %0 = vector.load %arg1[%c0, %c0_0] : memref<16x8xbf16, #tpu.memory_space<vmem>>, vector<16x8xbf16>
    %c0_1 = arith.constant 0 : index
    %c0_2 = arith.constant 0 : index
    %1 = vector.load %arg2[%c0_1, %c0_2] : memref<8x128xbf16, #tpu.memory_space<vmem>>, vector<8x128xbf16>
    %cst = arith.constant dense<0.000000e+00> : vector<16x128xf32>
    %2 = tpu.matmul %0, %1, %cst {dimension_numbers = #tpu.dot_dimension_numbers<[1], [0], [0], [1], [0, 0, 1, 1], [], []>} : vector<16x8xbf16>, vector<8x128xbf16>, vector<16x128xf32> -> vector<16x128xf32>
    %c0_3 = arith.constant 0 : index
    %c0_4 = arith.constant 0 : index
    %3 = vector.load %arg3[%c0_3, %c0_4] : memref<16x128xf32, #tpu.memory_space<vmem>>, vector<16x128xf32>
    %4 = arith.addf %2, %3 : vector<16x128xf32>
    %c0_5 = arith.constant 0 : index
    %c0_6 = arith.constant 0 : index
    %5 = vector.load %arg4[%c0_5, %c0_6] : memref<16x128xf32, #tpu.memory_space<vmem>>, vector<16x128xf32>
    tpu.vector_store %arg4[%c0_5, %c0_6], %4 {strides = array<i32>} : memref<16x128xf32, #tpu.memory_space<vmem>>, vector<16x128xf32>,
    return
  }
  func.func @transform_0(%arg0: i32) -> (i32, i32) {
    %c0_i32 = arith.constant 0 : i32
    %c0_i32_0 = arith.constant 0 : i32
    %c0_i32_1 = arith.constant 0 : i32
    return %c0_i32, %c0_i32_0 : i32, i32
  }
  func.func @transform_1(%arg0: i32) -> (i32, i32) {
    %c0_i32 = arith.constant 0 : i32
    %c0_i32_0 = arith.constant 0 : i32
    return %c0_i32, %arg0 : i32, i32
  }
  func.func @transform_2(%arg0: i32) -> (i32, i32) {
    %c0_i32 = arith.constant 0 : i32
    %c0_i32_0 = arith.constant 0 : i32
    return %c0_i32, %arg0 : i32, i32
  }
  func.func @transform_3(%arg0: i32) -> (i32, i32) {
    %c0_i32 = arith.constant 0 : i32
    %c0_i32_0 = arith.constant 0 : i32
    return %c0_i32, %arg0 : i32, i32
  }
}

</mosaic_0001>

<bundles_post_ra>
// kernel: vsnet_forward.26
= control target key start
LH: loop header
LB: loop body
LE: loop exit
PB: predicated region body
PF: predicated region fallthrough
CT: control target
= control target key end

     0   :  { %7 = vsyncpa [#allocation3], 0  ;;  %s440_s9 = smov 0   ;;  %s442_s10 = smov 0   ;;  %s518_s0 = inlined_call_operand.hbm [shape: bf16[8,9], index: 0, kind: input, shape index: {}]   ;;  %s519_s1 = inlined_call_operand.vmem [shape: bf16[9,640], index: 1, kind: input, shape index: {}]   ;;  %s520_s2 = inlined_call_operand.vmem [shape: bf16[8,640], index: 2, kind: output, shape index: {}]  }
   0x1   :  { %s444_s11 = smov 0  }
   0x2 LB: > { %s456_s12 = sadd.s32 4294967295, %s421_s11   ;;  %s459_s13 = sadd.s32 1, %s421_s11   ;;  %s421_s11 = sphi %s444_s11, %s525_s11   ;;  %s417_s10 = sphi %s442_s10, %s524_s10   ;;  %s413_s9 = sphi %s440_s9, %s523_s9  }
   0x3   : > { %s38_s14 = ssub.s32 %s421_s11, %s459_s13  ;;  %s41_s15 = sadd.s32 1, %s417_s10 }
   0x4   : > { %p39_p0 = scmp.eq.s32.totalorder %s38_s14, 0  ;;  %p48_p1 = scmp.ne.s32.totalorder %s417_s10, %s413_s9 }
   0x5   : > { %p49_p2 = scmp.eq.s32.totalorder %s421_s11, 0  ;;  %p312_p3 = scmp.ge.s32.totalorder %s421_s11, 1 }
   0x6   : > { %s469_s16 = scalar_select %p39_p0, %s417_s10, %s41_s15  }
   0x7   : > { %p471_p4 = por %p49_p2, %p48_p1  ;;  %p91_p5 = scmp.lt.s32.totalorder %s421_s11, 6 }
   0x8   : > { %p337_p6 = scmp.eq.s32.totalorder %s456_s12, 0  ;;  %s103_s21 = sshll.u32 %s518_s0, 4  ;;  %s104_s21 = int_to_ptr.hbm [resolvable:$true] %s103_s21 }
   0x9   : > { %p477_p7 = pnand %p312_p3, %p91_p5  ;;  %s423_s22 = smov [#allocation2]  }
   0xa   : > { %s105_s23 = sshll.u32 %s423_s22, 4  ;;  %p314_p10 = scmp.ge.s32.totalorder %s421_s11, 5  ;;  %s106_s23 = int_to_ptr.vmem [resolvable:$true] %s105_s23 }
   0xb   : > { %p333_p8 = pneg %p477_p7 }
   0xc   : > { %112 = sbr.rel (%p314_p10) target bundleno = 23 (0x17), region = 20 }
   0xd   : > { %p334_p9 = pnand %p337_p6, %p333_p8 }
   0xf   : > { %336 = dma.hbm_to_vmem [thread:$0]  (!%p334_p9), %s104_s21, 64, %s106_s23, [#allocation3]  }
  0x11   : > { %115 = sbr.rel (!%p471_p4) target bundleno = 23 (0x17), region = 24  ;;  %s117_s24 = sand.u32 (%p471_p4), 1, %s417_s10  }
  0x12   : > { %s316_s25 = sshll.u32 (%p471_p4), %s421_s11, 2  ;;  %s315_s26 = sshll.u32 (%p471_p4), %s117_s24, 3 }
  0x13   : > { %s121_s29 = scalar_lea.vmem (%p471_p4), %s519_s1, %s316_s25  ;;  %s119_s30 = scalar_lea.vmem (%p471_p4), [#allocation4], %s315_s26 }
  0x14   : > { %v138_v0 = vld [vmem:[%s121_s29] sm:$0xf] (%p471_p4)  ;;  %v140_v1 = vld [vmem:[%s121_s29 + $0x14] sm:$0xf] (%p471_p4) }
  0x15   : > { %139 = vst [vmem:[%s119_s30] sm:$0xf] (%p471_p4), %v138_v0 }
  0x16   : > { %141 = vst [vmem:[%s119_s30 + $0x4] sm:$0xf] %v140_v1 }
  0x17 PF: > { %172 = sbr.rel (%p477_p7) target bundleno = 174 (0xae), region = 65 }
  0x1c   : > { %408 = dma.done.wait (%p337_p6), [#allocation3], 64  }
  0x1d   : > { %410 = vsyncadd (%p337_p6), [#allocation3], 4294967232  ;;  %s180_s3 = sand.u32 1, %s413_s9   ;;  %vm217_vm0 = vcmask 1043456   ;;  %vm218_vm1 = vcmask 1044480   ;;  %v424_v2 = vmov 65535  }
  0x1e   : > { %s319_s4 = sshll.u32 %s180_s3, 3  ;;  %v219_v3 = vsel %vm217_vm0, 4294967295, %v424_v2  ;;  %v205_v9 = vld [vmem:[#allocation2] sm:$0xf]  ;;  %vm213_vm2 = vcmask 72704   ;;  %p200_p11 = scmp.lt.s32.totalorder %s456_s12, 4 }
  0x1f   : > { %s182_s5 = scalar_lea.vmem [#allocation4], %s319_s4  ;;  %v220_v6 = vsel %vm218_vm1, %v219_v3, 0 }
  0x20   : > { %v323_v4 = vld [vmem:[%s182_s5] sm:$0xf]  ;;  %v328_v5 = vld [vmem:[%s182_s5] sm:$0x10]  ;;  %s527_s12 = smov (!%p200_p11, %s456_s12), 4 }
  0x21   : > { %v324_v7 = vor.u32 %v328_v5, %v323_v4  ;;  %s320_s6 = sshll.u32 %s527_s12, 2 }
  0x22   : > { %s203_s9 = scalar_lea.vmem %s520_s2, %s320_s6 }
  0x23   : > { %v222_v8 = vand.u32 %v324_v7, %v220_v6 }
  0x25   : > { %231 = vmatpush.bf16.msra.mxu0 %v222_v8 }
  0x28   : > { %325 = vmatmul.msk.bf16.vlgmr.msra.gmra.mxu0 %vm213_vm2, %v205_v9 }
  0xa5   : > { %v233_v10 = vpop.f32.mrf.mxu0 }
  0xa6   : > { %v237_v11 = vpack.c.bf16 %v233_v10, %v233_v10 }
  0xa8   : > { %238 = vst [vmem:[%s203_s9] sm:$0xf] %v237_v11 }
  0xad   : > { %v235_v12 = vpop.f32.mrf.mxu0 }
  0xae PF: > { %p10_p12 = scmp.ge.s32.totalorder %s459_s13, 7   ;;  %s523_s9 = smov %s417_s10 }
  0xaf   : > { %s524_s10 = smov %s469_s16  ;;  %s525_s11 = smov %s459_s13 }
  0xb0   :  { %12 = sbr.rel (!%p10_p12) target bundleno = 2 (0x2), region = 109 }
  0xb5   :  { %258 = vsyncpa [#allocation3], 1 }
  0xb6   :  { %260 = vsyncpa [#allocation3 + $0x1], 1 }

// kernel: vsnet_forward.27
= control target key start
LH: loop header
LB: loop body
LE: loop exit
PB: predicated region body
PF: predicated region fallthrough
CT: control target
= control target key end

     0   :  { %s365_s9 = smov 0   ;;  %s367_s10 = smov 0   ;;  %s422_s0 = inlined_call_operand.vmem [shape: bf16[8,9], index: 0, kind: input, shape index: {}]   ;;  %s423_s1 = inlined_call_operand.vmem [shape: bf16[9,640], index: 1, kind: input, shape index: {}]   ;;  %s424_s2 = inlined_call_operand.vmem [shape: bf16[8,640], index: 2, kind: output, shape index: {}]  }
   0x1   :  { %s369_s11 = smov 0  }
   0x2 LB: > { %s283_s12 = sadd.s32 4294967295, %s347_s11   ;;  %s382_s13 = sadd.s32 1, %s347_s11   ;;  %s347_s11 = sphi %s369_s11, %s427_s11   ;;  %s343_s10 = sphi %s367_s10, %s426_s10   ;;  %s339_s9 = sphi %s365_s9, %s425_s9  }
   0x3   : > { %s37_s14 = ssub.s32 %s347_s11, %s382_s13  ;;  %s40_s15 = sadd.s32 1, %s343_s10 }
   0x4   : > { %p38_p0 = scmp.eq.s32.totalorder %s37_s14, 0  ;;  %p47_p1 = scmp.ne.s32.totalorder %s343_s10, %s339_s9 }
   0x5   : > { %p48_p2 = scmp.eq.s32.totalorder %s347_s11, 0  ;;  %p286_p4 = scmp.ge.s32.totalorder %s347_s11, 5 }
   0x6   : > { %s391_s16 = scalar_select %p38_p0, %s343_s10, %s40_s15  }
   0x7   : > { %p49_p3 = por %p48_p2, %p47_p1  ;;  %102 = sbr.rel (%p286_p4) target bundleno = 18 (0x12), region = 20 }
   0xc   : > { %105 = sbr.rel (!%p49_p3) target bundleno = 18 (0x12), region = 24  ;;  %s107_s17 = sand.u32 (%p49_p3), 1, %s343_s10  }
   0xd   : > { %s288_s18 = sshll.u32 (%p49_p3), %s347_s11, 2  ;;  %s287_s19 = sshll.u32 (%p49_p3), %s107_s17, 3 }
   0xe   : > { %s111_s22 = scalar_lea.vmem (%p49_p3), %s423_s1, %s288_s18  ;;  %s109_s23 = scalar_lea.vmem (%p49_p3), [#allocation2], %s287_s19 }
   0xf   : > { %v128_v0 = vld [vmem:[%s111_s22] sm:$0xf] (%p49_p3)  ;;  %v130_v1 = vld [vmem:[%s111_s22 + $0x14] sm:$0xf] (%p49_p3) }
  0x10   : > { %129 = vst [vmem:[%s109_s23] sm:$0xf] (%p49_p3), %v128_v0 }
  0x11   : > { %131 = vst [vmem:[%s109_s23 + $0x4] sm:$0xf] %v130_v1 }
  0x12 PF: > { %p289_p5 = scmp.ge.s32.totalorder %s347_s11, 1  ;;  %p158_p6 = scmp.lt.s32.totalorder %s347_s11, 6 }
  0x14   : > { %p159_p7 = pnand %p289_p5, %p158_p6 }
  0x15   : > { %s165_s24 = sand.u32 (!%p159_p7), 1, %s339_s9   ;;  %p185_p8 = scmp.lt.s32.totalorder (!%p159_p7), %s283_s12, 4 }
  0x16   : > { %162 = sbr.rel (%p159_p7) target bundleno = 170 (0xaa), region = 65  ;;  %s290_s25 = sshll.u32 (!%p159_p7), %s165_s24, 3 }
  0x17   : > { %s167_s26 = scalar_lea.vmem (!%p159_p7), [#allocation2], %s290_s25 }
  0x1b   : > { %vm202_vm0 = vcmask 1043456   ;;  %vm203_vm1 = vcmask 1044480   ;;  %v349_v2 = vmov 65535   ;;  %v294_v4 = vld [vmem:[%s167_s26] sm:$0xf]  ;;  %vm198_vm2 = vcmask 72704  }
  0x1c   : > { %v204_v3 = vsel %vm202_vm0, 4294967295, %v349_v2  ;;  %v299_v5 = vld [vmem:[%s167_s26] sm:$0x10]  ;;  %v190_v9 = vld [vmem:[%s422_s0] sm:$0xf]  ;;  %s429_s12 = smov (!%p185_p8, %s283_s12), 4 }
  0x1d   : > { %v205_v6 = vsel %vm203_vm1, %v204_v3, 0  ;;  %v295_v7 = vor.u32 %v299_v5, %v294_v4  ;;  %s291_s29 = sshll.u32 %s429_s12, 2 }
  0x1e   : > { %s188_s4 = scalar_lea.vmem %s424_s2, %s291_s29 }
  0x1f   : > { %v207_v8 = vand.u32 %v295_v7, %v205_v6 }
  0x21   : > { %216 = vmatpush.bf16.msra.mxu0 %v207_v8 }
  0x24   : > { %296 = vmatmul.msk.bf16.vlgmr.msra.gmra.mxu0 %vm198_vm2, %v190_v9 }
  0xa1   : > { %v218_v10 = vpop.f32.mrf.mxu0 }
  0xa2   : > { %v222_v11 = vpack.c.bf16 %v218_v10, %v218_v10 }
  0xa4   : > { %223 = vst [vmem:[%s188_s4] sm:$0xf] %v222_v11 }
  0xa9   : > { %v220_v12 = vpop.f32.mrf.mxu0 }
  0xaa PF: > { %p9_p9 = scmp.ge.s32.totalorder %s382_s13, 7   ;;  %s425_s9 = smov %s343_s10 }
  0xab   : > { %s426_s10 = smov %s391_s16  ;;  %s427_s11 = smov %s382_s13 }
  0xac   :  { %11 = sbr.rel (!%p9_p9) target bundleno = 2 (0x2), region = 104 }

// kernel: vsnet_forward.28
= control target key start
LH: loop header
LB: loop body
LE: loop exit
PB: predicated region body
PF: predicated region fallthrough
CT: control target
= control target key end

     0   :  { %s581_s9 = smov 0   ;;  %s583_s10 = smov 0   ;;  %s704_s0 = inlined_call_operand.vmem [shape: bf16[8,72], index: 0, kind: input, shape index: {}]   ;;  %s705_s1 = inlined_call_operand.vmem [shape: bf16[72,1152], index: 1, kind: input, shape index: {}]   ;;  %s706_s2 = inlined_call_operand.vmem [shape: bf16[8,1152], index: 2, kind: output, shape index: {}]  }
   0x1   :  { %s585_s11 = smov 0  }
   0x2 LB: > { %s425_s12 = sadd.s32 4294967295, %s564_s11   ;;  %s598_s13 = sadd.s32 1, %s564_s11   ;;  %s564_s11 = sphi %s585_s11, %s709_s11   ;;  %s560_s10 = sphi %s583_s10, %s708_s10   ;;  %s556_s9 = sphi %s581_s9, %s707_s9  }
   0x3   : > { %s37_s14 = ssub.s32 %s564_s11, %s598_s13  ;;  %s40_s15 = sadd.s32 1, %s560_s10 }
   0x4   : > { %p38_p0 = scmp.eq.s32.totalorder %s37_s14, 0  ;;  %p47_p1 = scmp.ne.s32.totalorder %s560_s10, %s556_s9 }
   0x5   : > { %p48_p2 = scmp.eq.s32.totalorder %s564_s11, 0  ;;  %p428_p4 = scmp.ge.s32.totalorder %s564_s11, 3 }
   0x6   : > { %s607_s16 = scalar_select %p38_p0, %s560_s10, %s40_s15  }
   0x7   : > { %p49_p3 = por %p48_p2, %p47_p1  ;;  %102 = sbr.rel (%p428_p4) target bundleno = 35 (0x23), region = 20 }
   0xc   : > { %105 = sbr.rel (!%p49_p3) target bundleno = 35 (0x23), region = 24  ;;  %s107_s17 = sand.u32 (%p49_p3), 1, %s560_s10  }
   0xd   : > { %s503_s18 = smul.u32 (%p49_p3), 12, %s564_s11 }
   0xe   : > { %s516_s19 = smul.u32 (%p49_p3), 108, %s107_s17 }
   0xf   : > { %s615_s22 = scalar_lea.vmem (%p49_p3), %s705_s1, %s503_s18 }
  0x10   : > { %v127_v0 = vld [vmem:[%s615_s22] sm:$0xff] (%p49_p3)  ;;  %v131_v2 = vld [vmem:[%s615_s22 + $0x48] sm:$0xff] (%p49_p3)  ;;  %s620_s23 = scalar_lea.vmem (%p49_p3), [#allocation2], %s516_s19  ;;  %v135_v4 = vld [vmem:[%s615_s22 + $0x90] sm:$0xff] (%p49_p3) }
  0x11   : > { %v129_v1 = vld [vmem:[%s615_s22 + $0x24] sm:$0xff]  ;;  %128 = vst [vmem:[%s620_s23] sm:$0xff] %v127_v0  ;;  %v133_v3 = vld [vmem:[%s615_s22 + $0x6c] sm:$0xff]  ;;  %v137_v5 = vld [vmem:[%s615_s22 + $0xb4] sm:$0xff] }
  0x12   : > { %130 = vst [vmem:[%s620_s23 + $0xc] sm:$0xff] %v129_v1  ;;  %v139_v6 = vld [vmem:[%s615_s22 + $0xd8] sm:$0xff]  ;;  %v143_v8 = vld [vmem:[%s615_s22 + $0x120] sm:$0xff]  ;;  %v430_v9 = vld [vmem:[%s615_s22 + $0x8] sm:$0xf] }
  0x13   : > { %132 = vst [vmem:[%s620_s23 + $0x18] sm:$0xff] %v131_v2  ;;  %v141_v7 = vld [vmem:[%s615_s22 + $0xfc] sm:$0xff]  ;;  %v432_v10 = vld [vmem:[%s615_s22 + $0x2c] sm:$0xf]  ;;  %v434_v11 = vld [vmem:[%s615_s22 + $0x50] sm:$0xf] }
  0x14   : > { %134 = vst [vmem:[%s620_s23 + $0x24] sm:$0xff] %v133_v3  ;;  %v436_v12 = vld [vmem:[%s615_s22 + $0x74] sm:$0xf]  ;;  %v438_v13 = vld [vmem:[%s615_s22 + $0x98] sm:$0xf] }
  0x15   : > { %136 = vst [vmem:[%s620_s23 + $0x30] sm:$0xff] %v135_v4  ;;  %v440_v14 = vld [vmem:[%s615_s22 + $0xbc] sm:$0xf]  ;;  %v442_v15 = vld [vmem:[%s615_s22 + $0xe0] sm:$0xf] }
  0x16   : > { %138 = vst [vmem:[%s620_s23 + $0x3c] sm:$0xff] %v137_v5  ;;  %v444_v16 = vld [vmem:[%s615_s22 + $0x104] sm:$0xf]  ;;  %v446_v17 = vld [vmem:[%s615_s22 + $0x128] sm:$0xf] }
  0x17   : > { %140 = vst [vmem:[%s620_s23 + $0x48] sm:$0xff] %v139_v6 }
  0x18   : > { %142 = vst [vmem:[%s620_s23 + $0x54] sm:$0xff] %v141_v7 }
  0x19   : > { %144 = vst [vmem:[%s620_s23 + $0x60] sm:$0xff] %v143_v8 }
  0x1a   : > { %431 = vst [vmem:[%s620_s23 + $0x8] sm:$0xf] %v430_v9 }
  0x1b   : > { %433 = vst [vmem:[%s620_s23 + $0x14] sm:$0xf] %v432_v10 }
  0x1c   : > { %435 = vst [vmem:[%s620_s23 + $0x20] sm:$0xf] %v434_v11 }
  0x1d   : > { %437 = vst [vmem:[%s620_s23 + $0x2c] sm:$0xf] %v436_v12 }
  0x1e   : > { %439 = vst [vmem:[%s620_s23 + $0x38] sm:$0xf] %v438_v13 }
  0x1f   : > { %441 = vst [vmem:[%s620_s23 + $0x44] sm:$0xf] %v440_v14 }
  0x20   : > { %443 = vst [vmem:[%s620_s23 + $0x50] sm:$0xf] %v442_v15 }
  0x21   : > { %445 = vst [vmem:[%s620_s23 + $0x5c] sm:$0xf] %v444_v16 }
  0x22   : > { %447 = vst [vmem:[%s620_s23 + $0x68] sm:$0xf] %v446_v17 }
  0x23 PF: > { %p448_p5 = scmp.ge.s32.totalorder %s564_s11, 1  ;;  %p175_p6 = scmp.lt.s32.totalorder %s564_s11, 4 }
  0x25   : > { %p176_p7 = pnand %p448_p5, %p175_p6 }
  0x26   : > { %s182_s24 = sand.u32 (!%p176_p7), 1, %s556_s9   ;;  %s204_s29 = smul.u32 (!%p176_p7), 3, %s425_s12 }
  0x27   : > { %179 = sbr.rel (%p176_p7) target bundleno = 210 (0xd2), region = 50 }
  0x28   : > { %s517_s25 = smul.u32 (!%p176_p7), 108, %s182_s24  ;;  %p205_p8 = scmp.lt.s32.totalorder (!%p176_p7), %s204_s29, 8 }
  0x2a   : > { %s658_s26 = scalar_lea.vmem (!%p176_p7), [#allocation2], %s517_s25 }
  0x2c   : > { %v228_v18 = vld [vmem:[%s658_s26 + $0x60] sm:$0xff]  ;;  %v229_v19 = vld [vmem:[%s658_s26 + $0x68] sm:$0xf]  ;;  %vm306_vm0 = vcmask 1043456   ;;  %v514_v27 = vld [vmem:[%s658_s26 + $0x50] sm:$0xf0] }
  0x2d   : > { %v272_v20 = vunpack.c.l.b16 %v228_v18  ;;  %v273_v21 = vunpack.c.h.b16 %v228_v18  ;;  %v274_v22 = vunpack.c.l.b16 %v229_v19  ;;  %v488_v23 = vld [vmem:[%s658_s26 + $0x48] sm:$0xf]  ;;  %v513_v28 = vld [vmem:[%s658_s26 + $0x4c] sm:$0xf]  ;;  %v490_v29 = vld [vmem:[%s658_s26 + $0x54] sm:$0xf0] }
  0x2e   : > { %v496_v30 = vld [vmem:[%s658_s26 + $0x50] sm:$0xf]  ;;  %v515_v31 = vld [vmem:[%s658_s26 + $0x58] sm:$0xf0]  ;;  %v489_v35 = vor.u32 %v514_v27, %v488_v23  ;;  %v493_v36 = vor.u32 %v513_v28, %v490_v29  ;;  %v510_v40 = vld [vmem:[%s658_s26 + $0x34] sm:$0xf] }
  0x2f   : > { %v287_v24 = vpack.c.b16 %v272_v20, %v272_v20  ;;  %v288_v25 = vpack.c.b16 %v273_v21, %v273_v21  ;;  %v289_v26 = vpack.c.b16 %v274_v22, %v274_v22  ;;  %v476_v37 = vld [vmem:[%s658_s26 + $0x30] sm:$0xf]  ;;  %v497_v38 = vor.u32 %v515_v31, %v496_v30  ;;  %v511_v39 = vld [vmem:[%s658_s26 + $0x38] sm:$0xf0]  ;;  %v478_v41 = vld [vmem:[%s658_s26 + $0x3c] sm:$0xf0] }
  0x30   : > { %v484_v42 = vld [vmem:[%s658_s26 + $0x38] sm:$0xf]  ;;  %v512_v43 = vld [vmem:[%s658_s26 + $0x40] sm:$0xf0]  ;;  %v477_v44 = vor.u32 %v511_v39, %v476_v37  ;;  %v481_v45 = vor.u32 %v510_v40, %v478_v41  ;;  %v507_v49 = vld [vmem:[%s658_s26 + $0x1c] sm:$0xf] }
  0x31   : > { %v308_v32 = vsel %vm306_vm0, %v287_v24, 0  ;;  %v311_v33 = vsel %vm306_vm0, %v288_v25, 0  ;;  %v314_v34 = vsel %vm306_vm0, %v289_v26, 0  ;;  %v464_v46 = vld [vmem:[%s658_s26 + $0x18] sm:$0xf]  ;;  %v485_v47 = vor.u32 %v512_v43, %v484_v42  ;;  %s711_s29 = smov (!%p205_p8, %s204_s29), 8 }
  0x32   : > { %319 = vmatpush.bf16.msra.mxu0 %v308_v32  ;;  %332 = vmatpush.bf16.msra.mxu1 %v311_v33  ;;  %v508_v48 = vld [vmem:[%s658_s26 + $0x20] sm:$0xf0]  ;;  %v466_v50 = vld [vmem:[%s658_s26 + $0x24] sm:$0xf0]  ;;  %v472_v51 = vld [vmem:[%s658_s26 + $0x20] sm:$0xf] }
  0x33   : > { %345 = vmatpush.bf16.msra.mxu2 %v314_v34  ;;  %v509_v52 = vld [vmem:[%s658_s26 + $0x28] sm:$0xf0]  ;;  %v465_v53 = vor.u32 %v508_v48, %v464_v46  ;;  %v469_v54 = vor.u32 %v507_v49, %v466_v50  ;;  %v452_v55 = vld [vmem:[%s658_s26] sm:$0xf]  ;;  %v504_v58 = vld [vmem:[%s658_s26 + $0x4] sm:$0xf] }
  0x34   : > { %v473_v56 = vor.u32 %v509_v52, %v472_v51  ;;  %v505_v57 = vld [vmem:[%s658_s26 + $0x8] sm:$0xf0]  ;;  %v454_v59 = vld [vmem:[%s658_s26 + $0xc] sm:$0xf0]  ;;  %v460_v60 = vld [vmem:[%s658_s26 + $0x8] sm:$0xf] }
  0x35   : > { %v506_v61 = vld [vmem:[%s658_s26 + $0x10] sm:$0xf0]  ;;  %v453_v62 = vor.u32 %v505_v57, %v452_v55  ;;  %v457_v63 = vor.u32 %v504_v58, %v454_v59  ;;  %vm302_vm1 = vcmask 588800   ;;  %s449_s30 = sshll.u32 %s711_s29, 2 }
  0x36   : > { %320 = vmatpush.bf16.msra.mxu0 %v489_v35  ;;  %333 = vmatpush.bf16.msra.mxu1 %v493_v36  ;;  %v461_v0 = vor.u32 %v506_v61, %v460_v60  ;;  %v211_v1 = vld [vmem:[%s704_s0] sm:$0xf]  ;;  %s208_s5 = scalar_lea.vmem %s706_s2, %s449_s30 }
  0x37   : > { %346 = vmatpush.bf16.msra.mxu2 %v497_v38 }
  0x3a   : > { %321 = vmatpush.bf16.msra.mxu0 %v477_v44  ;;  %334 = vmatpush.bf16.msra.mxu1 %v481_v45 }
  0x3b   : > { %347 = vmatpush.bf16.msra.mxu2 %v485_v47 }
  0x3e   : > { %322 = vmatpush.bf16.msra.mxu0 %v465_v53  ;;  %335 = vmatpush.bf16.msra.mxu1 %v469_v54 }
  0x3f   : > { %348 = vmatpush.bf16.msra.mxu2 %v473_v56 }
  0x42   : > { %323 = vmatpush.bf16.msra.mxu0 %v453_v62  ;;  %336 = vmatpush.bf16.msra.mxu1 %v457_v63 }
  0x43   : > { %349 = vmatpush.bf16.msra.mxu2 %v461_v0 }
  0x45   : > { %498 = vmatmul.msk.bf16.vlgmr.msra.gmra.mxu0 %vm302_vm1, %v211_v1  ;;  %499 = vmatmul.msk.bf16.vlgmr.msra.gmra.mxu1 %vm302_vm1, %v211_v1 }
  0x46   : > { %500 = vmatmul.msk.bf16.vlgmr.msra.gmra.mxu2 %vm302_vm1, %v211_v1 }
  0xc2   : > { %v325_v2 = vpop.f32.mrf.mxu0  ;;  %v338_v3 = vpop.f32.mrf.mxu1 }
  0xc3   : > { %v355_v4 = vpack.c.bf16 %v338_v3, %v325_v2 }
  0xc5   : > { %357 = vst [vmem:[%s208_s5] sm:$0xff] %v355_v4 }
  0xc9   : > { %v351_v5 = vpop.f32.mrf.mxu2 }
  0xca   : > { %v356_v6 = vpack.c.bf16 %v351_v5, %v351_v5  ;;  %v327_v7 = vpop.f32.mrf.mxu0  ;;  %v340_v8 = vpop.f32.mrf.mxu1 }
  0xcc   : > { %358 = vst [vmem:[%s208_s5 + $0x8] sm:$0xf] %v356_v6 }
  0xd1   : > { %v353_v9 = vpop.f32.mrf.mxu2 }
  0xd2 PF: > { %p9_p9 = scmp.ge.s32.totalorder %s598_s13, 5   ;;  %s707_s9 = smov %s560_s10 }
  0xd3   : > { %s708_s10 = smov %s607_s16  ;;  %s709_s11 = smov %s598_s13 }
  0xd4   :  { %11 = sbr.rel (!%p9_p9) target bundleno = 2 (0x2), region = 95 }

// kernel: vsnet_forward.34
= control target key start
LH: loop header
LB: loop body
LE: loop exit
PB: predicated region body
PF: predicated region fallthrough
CT: control target
= control target key end

     0   :  { %s756_s18 = smov 0   ;;  %s758_s19 = smov 0   ;;  %s832_s0 = inlined_call_operand.vmem [shape: bf16[8,72], index: 0, kind: input, shape index: {}]   ;;  %s833_s1 = inlined_call_operand.vmem [shape: bf16[8,72], index: 1, kind: input, shape index: {}]   ;;  %s834_s2 = inlined_call_operand.vmem [shape: bf16[72,640], index: 2, kind: input, shape index: {}]   ;;  %s835_s3 = inlined_call_operand.vmem [shape: bf16[72,640], index: 3, kind: input, shape index: {}]   ;;  %s836_s4 = inlined_call_operand.vmem [shape: bf16[8,640], index: 4, kind: input, shape index: {}]   ;;  %s837_s5 = inlined_call_operand.vmem [shape: bf16[8,640], index: 5, kind: output, shape index: {}]  }
   0x1   :  { %s760_s20 = smov 0  }
   0x2 LB: > { %s622_s21 = sadd.s32 4294967295, %s724_s20   ;;  %s773_s22 = sadd.s32 1, %s724_s20   ;;  %s724_s20 = sphi %s760_s20, %s841_s20   ;;  %s720_s19 = sphi %s758_s19, %s840_s19   ;;  %s716_s18 = sphi %s756_s18, %s839_s18  }
   0x3   : > { %s61_s23 = ssub.s32 %s724_s20, %s773_s22  ;;  %s64_s24 = sadd.s32 1, %s720_s19 }
   0x4   : > { %p62_p0 = scmp.eq.s32.totalorder %s61_s23, 0  ;;  %p71_p1 = scmp.ne.s32.totalorder %s720_s19, %s716_s18 }
   0x5   : > { %p72_p2 = scmp.eq.s32.totalorder %s724_s20, 0  ;;  %p625_p4 = scmp.ge.s32.totalorder %s724_s20, 5 }
   0x6   : > { %s782_s25 = scalar_select %p62_p0, %s720_s19, %s64_s24  }
   0x7   : > { %p784_p3 = por %p72_p2, %p71_p1  ;;  %181 = sbr.rel (%p625_p4) target bundleno = 40 (0x28), region = 24 }
   0xc   : > { %184 = sbr.rel (!%p784_p3) target bundleno = 26 (0x1a), region = 28  ;;  %s186_s27 = sand.u32 (%p784_p3), 1, %s720_s19  }
   0xd   : > { %s626_s28 = sshll.u32 (%p784_p3), %s724_s20, 2  ;;  %s675_s29 = smul.u32 (%p784_p3), 36, %s186_s27 }
   0xe   : > { %s190_s7 = scalar_lea.vmem (%p784_p3), %s834_s2, %s626_s28 }
   0xf   : > { %v207_v0 = vld [vmem:[%s190_s7] sm:$0xf] (%p784_p3)  ;;  %v209_v1 = vld [vmem:[%s190_s7 + $0x14] sm:$0xf] (%p784_p3)  ;;  %v211_v2 = vld [vmem:[%s190_s7 + $0x28] sm:$0xf] (%p784_p3) }
  0x10   : > { %s188_s8 = scalar_lea.vmem (%p784_p3), [#allocation2], %s675_s29  ;;  %v213_v3 = vld [vmem:[%s190_s7 + $0x3c] sm:$0xf] (%p784_p3)  ;;  %v215_v4 = vld [vmem:[%s190_s7 + $0x50] sm:$0xf] (%p784_p3) }
  0x11   : > { %208 = vst [vmem:[%s188_s8] sm:$0xf] %v207_v0  ;;  %v217_v5 = vld [vmem:[%s190_s7 + $0x64] sm:$0xf]  ;;  %v219_v6 = vld [vmem:[%s190_s7 + $0x78] sm:$0xf] }
  0x12   : > { %210 = vst [vmem:[%s188_s8 + $0x4] sm:$0xf] %v209_v1  ;;  %v221_v7 = vld [vmem:[%s190_s7 + $0x8c] sm:$0xf]  ;;  %v223_v8 = vld [vmem:[%s190_s7 + $0xa0] sm:$0xf] }
  0x13   : > { %212 = vst [vmem:[%s188_s8 + $0x8] sm:$0xf] %v211_v2 }
  0x14   : > { %214 = vst [vmem:[%s188_s8 + $0xc] sm:$0xf] %v213_v3 }
  0x15   : > { %216 = vst [vmem:[%s188_s8 + $0x10] sm:$0xf] %v215_v4 }
  0x16   : > { %218 = vst [vmem:[%s188_s8 + $0x14] sm:$0xf] %v217_v5 }
  0x17   : > { %220 = vst [vmem:[%s188_s8 + $0x18] sm:$0xf] %v219_v6 }
  0x18   : > { %222 = vst [vmem:[%s188_s8 + $0x1c] sm:$0xf] %v221_v7 }
  0x19   : > { %224 = vst [vmem:[%s188_s8 + $0x20] sm:$0xf] %v223_v8 }
  0x1a PF: > { %266 = sbr.rel (!%p784_p3) target bundleno = 40 (0x28), region = 69  ;;  %s268_s9 = sand.u32 (%p784_p3), 1, %s720_s19  }
  0x1b   : > { %s627_s10 = sshll.u32 (%p784_p3), %s724_s20, 2  ;;  %s676_s11 = smul.u32 (%p784_p3), 36, %s268_s9 }
  0x1c   : > { %s272_s14 = scalar_lea.vmem (%p784_p3), %s835_s3, %s627_s10 }
  0x1d   : > { %v289_v9 = vld [vmem:[%s272_s14] sm:$0xf] (%p784_p3)  ;;  %v291_v10 = vld [vmem:[%s272_s14 + $0x14] sm:$0xf] (%p784_p3)  ;;  %v293_v11 = vld [vmem:[%s272_s14 + $0x28] sm:$0xf] (%p784_p3) }
  0x1e   : > { %s270_s15 = scalar_lea.vmem (%p784_p3), [#allocation3], %s676_s11  ;;  %v295_v12 = vld [vmem:[%s272_s14 + $0x3c] sm:$0xf] (%p784_p3)  ;;  %v297_v13 = vld [vmem:[%s272_s14 + $0x50] sm:$0xf] (%p784_p3) }
  0x1f   : > { %290 = vst [vmem:[%s270_s15] sm:$0xf] %v289_v9  ;;  %v299_v14 = vld [vmem:[%s272_s14 + $0x64] sm:$0xf]  ;;  %v301_v15 = vld [vmem:[%s272_s14 + $0x78] sm:$0xf] }
  0x20   : > { %292 = vst [vmem:[%s270_s15 + $0x4] sm:$0xf] %v291_v10  ;;  %v303_v16 = vld [vmem:[%s272_s14 + $0x8c] sm:$0xf]  ;;  %v305_v17 = vld [vmem:[%s272_s14 + $0xa0] sm:$0xf] }
  0x21   : > { %294 = vst [vmem:[%s270_s15 + $0x8] sm:$0xf] %v293_v11 }
  0x22   : > { %296 = vst [vmem:[%s270_s15 + $0xc] sm:$0xf] %v295_v12 }
  0x23   : > { %298 = vst [vmem:[%s270_s15 + $0x10] sm:$0xf] %v297_v13 }
  0x24   : > { %300 = vst [vmem:[%s270_s15 + $0x14] sm:$0xf] %v299_v14 }
  0x25   : > { %302 = vst [vmem:[%s270_s15 + $0x18] sm:$0xf] %v301_v15 }
  0x26   : > { %304 = vst [vmem:[%s270_s15 + $0x1c] sm:$0xf] %v303_v16 }
  0x27   : > { %306 = vst [vmem:[%s270_s15 + $0x20] sm:$0xf] %v305_v17 }
  0x28 PF: > { %p628_p5 = scmp.ge.s32.totalorder %s724_s20, 1  ;;  %p354_p6 = scmp.lt.s32.totalorder %s724_s20, 6 }
  0x2a   : > { %p355_p7 = pnand %p628_p5, %p354_p6 }
  0x2b   : > { %s361_s16 = sand.u32 (!%p355_p7), 1, %s716_s18   ;;  %p402_p8 = scmp.lt.s32.totalorder (!%p355_p7), %s622_s21, 4 }
  0x2c   : > { %358 = sbr.rel (%p355_p7) target bundleno = 210 (0xd2), region = 114 }
  0x2d   : > { %s677_s17 = smul.u32 (!%p355_p7), 36, %s361_s16 }
  0x2f   : > { %s370_s23 = scalar_lea.vmem (!%p355_p7), [#allocation3], %s677_s17  ;;  %s363_s24 = scalar_lea.vmem (!%p355_p7), [#allocation2], %s677_s17 }
  0x31   : > { %v430_v18 = vld [vmem:[%s370_s23 + $0x20] sm:$0xf]  ;;  %v420_v19 = vld [vmem:[%s363_s24 + $0x20] sm:$0xf]  ;;  %vm462_vm0 = vcmask 1043456   ;;  %v670_v27 = vld [vmem:[%s363_s24 + $0x18] sm:$0xff] }
  0x32   : > { %v448_v20 = vunpack.c.l.b16 %v430_v18  ;;  %v496_v21 = vunpack.c.l.b16 %v420_v19  ;;  %v674_v26 = vld [vmem:[%s370_s23 + $0x18] sm:$0xff]  ;;  %v673_v28 = vld [vmem:[%s370_s23 + $0x10] sm:$0xff]  ;;  %v669_v29 = vld [vmem:[%s363_s24 + $0x10] sm:$0xff]  ;;  %vm458_vm1 = vcmask 588800   ;;  %s843_s21 = smov (!%p402_p8, %s622_s21), 4 }
  0x33   : > { %v672_v30 = vld [vmem:[%s370_s23 + $0x8] sm:$0xff]  ;;  %v668_v31 = vld [vmem:[%s363_s24 + $0x8] sm:$0xff]  ;;  %v667_v33 = vld [vmem:[%s363_s24] sm:$0xff]  ;;  %s629_s29 = sshll.u32 %s843_s21, 2 }
  0x34   : > { %v453_v22 = vpack.c.b16 %v448_v20, %v448_v20  ;;  %v501_v23 = vpack.c.b16 %v496_v21, %v496_v21  ;;  %v671_v32 = vld [vmem:[%s370_s23] sm:$0xff]  ;;  %v421_v34 = vld [vmem:[%s833_s1] sm:$0xf]  ;;  %s405_s7 = scalar_lea.vmem %s836_s4, %s629_s29  ;;  %s409_s10 = scalar_lea.vmem %s837_s5, %s629_s29 }
  0x35   : > { %v411_v35 = vld [vmem:[%s832_s0] sm:$0xf] }
  0x36   : > { %v464_v24 = vsel %vm462_vm0, %v453_v22, 0  ;;  %v510_v25 = vsel %vm462_vm0, %v501_v23, 0  ;;  %v528_v36 = vld [vmem:[%s405_s7] sm:$0xf] }
  0x37   : > { %469 = vmatpush.bf16.msra.mxu0 %v464_v24  ;;  %515 = vmatpush.bf16.msra.mxu1 %v510_v25  ;;  %v529_v40 = vunpack.c.l.bf16 %v528_v36 }
  0x3b   : > { %470 = vmatpush.bf16.msra.mxu0 %v674_v26  ;;  %516 = vmatpush.bf16.msra.mxu1 %v670_v27 }
  0x3f   : > { %471 = vmatpush.bf16.msra.mxu0 %v673_v28  ;;  %517 = vmatpush.bf16.msra.mxu1 %v669_v29 }
  0x43   : > { %472 = vmatpush.bf16.msra.mxu0 %v672_v30  ;;  %518 = vmatpush.bf16.msra.mxu1 %v668_v31 }
  0x47   : > { %473 = vmatpush.bf16.msra.mxu0 %v671_v32  ;;  %519 = vmatpush.bf16.msra.mxu1 %v667_v33 }
  0x4a   : > { %647 = vmatmul.msk.bf16.vlgmr.msra.gmra.mxu0 %vm458_vm1, %v421_v34  ;;  %664 = vmatmul.msk.bf16.vlgmr.msra.gmra.mxu1 %vm458_vm1, %v411_v35 }
  0xc7   : > { %v475_v37 = vpop.f32.mrf.mxu0  ;;  %v521_v38 = vpop.f32.mrf.mxu1 }
  0xc8   : > { %v522_v39 = vadd.f32 %v521_v38, %v475_v37 }
  0xca   : > { %vm525_vm2 = vcmp.ge.f32.partialorder %v522_v39, 0.0  ;;  %v526_v41 = vmul.f32 0.1, %v522_v39 }
  0xcc   : > { %v527_v42 = vsel %vm525_vm2, %v522_v39, %v526_v41 }
  0xcd   : > { %v530_v43 = vadd.f32 %v529_v40, %v527_v42 }
  0xcf   : > { %v531_v44 = vpack.c.bf16 %v530_v43, %v530_v43  ;;  %v477_v45 = vpop.f32.mrf.mxu0  ;;  %v523_v46 = vpop.f32.mrf.mxu1 }
  0xd1   : > { %532 = vst [vmem:[%s409_s10] sm:$0xf] %v531_v44 }
  0xd2 PF: > { %p12_p9 = scmp.ge.s32.totalorder %s773_s22, 7   ;;  %s839_s18 = smov %s720_s19 }
  0xd3   : > { %s840_s19 = smov %s782_s25  ;;  %s841_s20 = smov %s773_s22 }
  0xd4   :  { %14 = sbr.rel (!%p12_p9) target bundleno = 2 (0x2), region = 168 }

// kernel: vsnet_forward.31
= control target key start
LH: loop header
LB: loop body
LE: loop exit
PB: predicated region body
PF: predicated region fallthrough
CT: control target
= control target key end

     0   :  { %vm53_vm0 = vcmask 1043456   ;;  %vm49_vm1 = vcmask 588800   ;;  %s136_s1 = inlined_call_operand.vmem [shape: bf16[72,128], index: 1, kind: input, shape index: {}]   ;;  %s137_s0 = inlined_call_operand.vmem [shape: bf16[8,72], index: 0, kind: input, shape index: {}]   ;;  %s138_s2 = inlined_call_operand.vmem [shape: bf16[8,128], index: 2, kind: output, shape index: {}]  }
   0x1   :  { %v21_v0 = vld [vmem:[%s136_s1 + $0x20] sm:$0xf]  ;;  %v99_v4 = vld [vmem:[%s136_s1 + $0x18] sm:$0xff]  ;;  %v98_v5 = vld [vmem:[%s136_s1 + $0x10] sm:$0xff] }
   0x2   :  { %v39_v1 = vunpack.c.l.b16 %v21_v0  ;;  %v97_v6 = vld [vmem:[%s136_s1 + $0x8] sm:$0xff]  ;;  %v96_v7 = vld [vmem:[%s136_s1] sm:$0xff] }
   0x3   :  { %v12_v8 = vld [vmem:[%s137_s0] sm:$0xf] }
   0x4   :  { %v44_v2 = vpack.c.b16 %v39_v1, %v39_v1 }
   0x6   :  { %v55_v3 = vsel %vm53_vm0, %v44_v2, 0 }
   0x7   :  { %60 = vmatpush.bf16.msra.mxu0 %v55_v3 }
   0xb   :  { %61 = vmatpush.bf16.msra.mxu0 %v99_v4 }
   0xf   :  { %62 = vmatpush.bf16.msra.mxu0 %v98_v5 }
  0x13   :  { %63 = vmatpush.bf16.msra.mxu0 %v97_v6 }
  0x17   :  { %64 = vmatpush.bf16.msra.mxu0 %v96_v7 }
  0x1a   :  { %95 = vmatmul.msk.bf16.vlgmr.msra.gmra.mxu0 %vm49_vm1, %v12_v8 }
  0x97   :  { %v66_v9 = vpop.f32.mrf.mxu0 }
  0x98   :  { %vm70_vm2 = vcmp.ge.f32.partialorder %v66_v9, 0.0  ;;  %v71_v10 = vmul.f32 0.1, %v66_v9 }
  0x9a   :  { %v72_v11 = vsel %vm70_vm2, %v66_v9, %v71_v10 }
  0x9b   :  { %v73_v12 = vpack.c.bf16 %v72_v11, %v72_v11 }
  0x9d   :  { %74 = vst [vmem:[%s138_s2] sm:$0xf] %v73_v12 }
  0x9f   :  { %v68_v13 = vpop.f32.mrf.mxu0 }

// kernel: vsnet_forward.25
= control target key start
LH: loop header
LB: loop body
LE: loop exit
PB: predicated region body
PF: predicated region fallthrough
CT: control target
= control target key end

     0   :  { %vm24_vm0 = vcmask 1043456   ;;  %vm25_vm1 = vcmask 1044480   ;;  %v57_v2 = vmov 65535   ;;  %vm20_vm2 = vcmask 72704   ;;  %s85_s1 = inlined_call_operand.vmem [shape: bf16[9,128], index: 1, kind: input, shape index: {}]   ;;  %s86_s0 = inlined_call_operand.vmem [shape: bf16[8,9], index: 0, kind: input, shape index: {}]   ;;  %s87_s2 = inlined_call_operand.vmem [shape: bf16[8,128], index: 2, kind: output, shape index: {}]  }
   0x1   :  { %v52_v0 = vld [vmem:[%s85_s1] sm:$0xf]  ;;  %v55_v1 = vld [vmem:[%s85_s1] sm:$0x10]  ;;  %v26_v3 = vsel %vm24_vm0, 4294967295, %v57_v2 }
   0x2   :  { %v53_v4 = vor.u32 %v55_v1, %v52_v0  ;;  %v27_v5 = vsel %vm25_vm1, %v26_v3, 0  ;;  %v12_v7 = vld [vmem:[%s86_s0] sm:$0xf] }
   0x4   :  { %v29_v6 = vand.u32 %v53_v4, %v27_v5 }
   0x6   :  { %38 = vmatpush.bf16.msra.mxu0 %v29_v6 }
   0x9   :  { %54 = vmatmul.msk.bf16.vlgmr.msra.gmra.mxu0 %vm20_vm2, %v12_v7 }
  0x86   :  { %v40_v8 = vpop.f32.mrf.mxu0 }
  0x87   :  { %v44_v9 = vpack.c.bf16 %v40_v8, %v40_v8 }
  0x89   :  { %45 = vst [vmem:[%s87_s2] sm:$0xf] %v44_v9 }
  0x8e   :  { %v42_v10 = vpop.f32.mrf.mxu0 }

// kernel: vsnet_forward.30
= control target key start
LH: loop header
LB: loop body
LE: loop exit
PB: predicated region body
PF: predicated region fallthrough
CT: control target
= control target key end

     0   :  { %vm64_vm0 = vcmask 1043456   ;;  %vm48_vm1 = vcmask 64512   ;;  %s236_s1 = inlined_call_operand.vmem [shape: bf16[8,128], index: 1, kind: input, shape index: {}]   ;;  %s237_s0 = inlined_call_operand.vmem [shape: bf16[80,8], index: 0, kind: input, shape index: {}]   ;;  %s238_s2 = inlined_call_operand.vmem [shape: bf16[80,128], index: 2, kind: output, shape index: {}]  }
   0x1   :  { %v22_v0 = vld [vmem:[%s236_s1] sm:$0xf]  ;;  %v153_v2 = vld [vmem:[%s237_s0 + $0x10] sm:$0xff]  ;;  %v152_v5 = vld [vmem:[%s237_s0 + $0x8] sm:$0xff] }
   0x2   :  { %v66_v1 = vsel %vm64_vm0, %v22_v0, 0  ;;  %v155_v3 = vld [vmem:[%s237_s0 + $0x20] sm:$0xff]  ;;  %v154_v6 = vld [vmem:[%s237_s0 + $0x18] sm:$0xff] }
   0x3   :  { %186 = vmatpush.bf16.msra.mxu2 %v66_v1  ;;  %187 = vmatpush.bf16.msra.mxu3 %v66_v1  ;;  %v151_v4 = vld [vmem:[%s237_s0] sm:$0xff] }
   0x4   :  { %75 = vmatpush.bf16.msra.mxu0 %v66_v1  ;;  %185 = vmatpush.bf16.msra.mxu1 %v66_v1 }
   0x6   :  { %148 = vmatmul.msk.bf16.vlgmr.msra.gmra.mxu2 %vm48_vm1, %v153_v2  ;;  %150 = vmatmul.msk.bf16.vlgmr.msra.gmra.mxu3 %vm48_vm1, %v155_v3 }
   0x7   :  { %146 = vmatmul.msk.bf16.vlgmr.msra.gmra.mxu0 %vm48_vm1, %v151_v4  ;;  %147 = vmatmul.msk.bf16.vlgmr.msra.gmra.mxu1 %vm48_vm1, %v152_v5 }
  0x16   :  { %149 = vmatmul.msk.bf16.gmra.mxu2 %vm48_vm1, %v154_v6 }
  0x84   :  { %v77_v7 = vpop.f32.mrf.mxu0  ;;  %v82_v8 = vpop.f32.mrf.mxu1 }
  0x89   :  { %v87_v9 = vpop.f32.mrf.mxu2  ;;  %v97_v10 = vpop.f32.mrf.mxu3 }
  0x8c   :  { %v79_v11 = vpop.f32.mrf.mxu0  ;;  %v84_v12 = vpop.f32.mrf.mxu1 }
  0x8d   :  { %v159_v13 = vpack.c.bf16 %v79_v11, %v77_v7  ;;  %v164_v14 = vpack.c.bf16 %v84_v12, %v82_v8 }
  0x8f   :  { %160 = vst [vmem:[%s238_s2] sm:$0xff] %v159_v13  }
  0x90   :  { %181 = vst [vmem:[%s238_s2 + $0x8] sm:$0xff] %v164_v14  }
  0x91   :  { %v89_v15 = vpop.f32.mrf.mxu2  ;;  %v99_v16 = vpop.f32.mrf.mxu3 }
  0x92   :  { %v169_v17 = vpack.c.bf16 %v89_v15, %v87_v9  ;;  %v179_v18 = vpack.c.bf16 %v99_v16, %v97_v10 }
  0x94   :  { %182 = vst [vmem:[%s238_s2 + $0x10] sm:$0xff] %v169_v17  }
  0x95   :  { %184 = vst [vmem:[%s238_s2 + $0x20] sm:$0xff] %v179_v18  }
  0x99   :  { %v92_v19 = vpop.f32.mrf.mxu2 }
  0xa1   :  { %v94_v20 = vpop.f32.mrf.mxu2 }
  0xa2   :  { %v174_v21 = vpack.c.bf16 %v94_v20, %v92_v19 }
  0xa4   :  { %183 = vst [vmem:[%s238_s2 + $0x18] sm:$0xff] %v174_v21  }

// kernel: vsnet_forward.33
= control target key start
LH: loop header
LB: loop body
LE: loop exit
PB: predicated region body
PF: predicated region fallthrough
CT: control target
= control target key end

     0   :  { %s1013_s24 = smov 0   ;;  %s1015_s25 = smov 0   ;;  %s1120_s0 = inlined_call_operand.vmem [shape: bf16[8,72], index: 0, kind: input, shape index: {}]   ;;  %s1121_s1 = inlined_call_operand.vmem [shape: bf16[8,72], index: 1, kind: input, shape index: {}]   ;;  %s1122_s2 = inlined_call_operand.vmem [shape: bf16[8,72], index: 2, kind: input, shape index: {}]   ;;  %s1123_s3 = inlined_call_operand.vmem [shape: bf16[72,640], index: 3, kind: input, shape index: {}]   ;;  %s1124_s4 = inlined_call_operand.vmem [shape: bf16[72,640], index: 4, kind: input, shape index: {}]   ;;  %s1125_s5 = inlined_call_operand.vmem [shape: bf16[72,640], index: 5, kind: input, shape index: {}]   ;;  %s1126_s6 = inlined_call_operand.vmem [shape: bf16[8,640], index: 6, kind: input, shape index: {}]   ;;  %s1127_s7 = inlined_call_operand.vmem [shape: bf16[8,640], index: 7, kind: output, shape index: {}]  }
   0x1   :  { %s1017_s26 = smov 0  }
   0x2 LB: > { %s846_s27 = sadd.s32 4294967295, %s971_s26   ;;  %s1030_s28 = sadd.s32 1, %s971_s26   ;;  %s971_s26 = sphi %s1017_s26, %s1131_s26   ;;  %s967_s25 = sphi %s1015_s25, %s1130_s25   ;;  %s963_s24 = sphi %s1013_s24, %s1129_s24  }
   0x3   : > { %s84_s29 = ssub.s32 %s971_s26, %s1030_s28  ;;  %s87_s30 = sadd.s32 1, %s967_s25 }
   0x4   : > { %p85_p0 = scmp.eq.s32.totalorder %s84_s29, 0  ;;  %p94_p1 = scmp.ne.s32.totalorder %s967_s25, %s963_s24 }
   0x5   : > { %p95_p2 = scmp.eq.s32.totalorder %s971_s26, 0  ;;  %p849_p4 = scmp.ge.s32.totalorder %s971_s26, 5 }
   0x6   : > { %s1039_s8 = scalar_select %p85_p0, %s967_s25, %s87_s30  }
   0x7   : > { %p1041_p3 = por %p95_p2, %p94_p1  ;;  %233 = sbr.rel (%p849_p4) target bundleno = 54 (0x36), region = 28 }
   0xc   : > { %236 = sbr.rel (!%p1041_p3) target bundleno = 26 (0x1a), region = 32  ;;  %s238_s10 = sand.u32 (%p1041_p3), 1, %s967_s25  }
   0xd   : > { %s850_s11 = sshll.u32 (%p1041_p3), %s971_s26, 2  ;;  %s921_s12 = smul.u32 (%p1041_p3), 36, %s238_s10 }
   0xe   : > { %s242_s15 = scalar_lea.vmem (%p1041_p3), %s1123_s3, %s850_s11 }
   0xf   : > { %v259_v0 = vld [vmem:[%s242_s15] sm:$0xf] (%p1041_p3)  ;;  %v261_v1 = vld [vmem:[%s242_s15 + $0x14] sm:$0xf] (%p1041_p3)  ;;  %v263_v2 = vld [vmem:[%s242_s15 + $0x28] sm:$0xf] (%p1041_p3) }
  0x10   : > { %s240_s16 = scalar_lea.vmem (%p1041_p3), [#allocation2], %s921_s12  ;;  %v265_v3 = vld [vmem:[%s242_s15 + $0x3c] sm:$0xf] (%p1041_p3)  ;;  %v267_v4 = vld [vmem:[%s242_s15 + $0x50] sm:$0xf] (%p1041_p3) }
  0x11   : > { %260 = vst [vmem:[%s240_s16] sm:$0xf] %v259_v0  ;;  %v269_v5 = vld [vmem:[%s242_s15 + $0x64] sm:$0xf]  ;;  %v271_v6 = vld [vmem:[%s242_s15 + $0x78] sm:$0xf] }
  0x12   : > { %262 = vst [vmem:[%s240_s16 + $0x4] sm:$0xf] %v261_v1  ;;  %v273_v7 = vld [vmem:[%s242_s15 + $0x8c] sm:$0xf]  ;;  %v275_v8 = vld [vmem:[%s242_s15 + $0xa0] sm:$0xf] }
  0x13   : > { %264 = vst [vmem:[%s240_s16 + $0x8] sm:$0xf] %v263_v2 }
  0x14   : > { %266 = vst [vmem:[%s240_s16 + $0xc] sm:$0xf] %v265_v3 }
  0x15   : > { %268 = vst [vmem:[%s240_s16 + $0x10] sm:$0xf] %v267_v4 }
  0x16   : > { %270 = vst [vmem:[%s240_s16 + $0x14] sm:$0xf] %v269_v5 }
  0x17   : > { %272 = vst [vmem:[%s240_s16 + $0x18] sm:$0xf] %v271_v6 }
  0x18   : > { %274 = vst [vmem:[%s240_s16 + $0x1c] sm:$0xf] %v273_v7 }
  0x19   : > { %276 = vst [vmem:[%s240_s16 + $0x20] sm:$0xf] %v275_v8 }
  0x1a PF: > { %318 = sbr.rel (!%p1041_p3) target bundleno = 40 (0x28), region = 73  ;;  %s320_s17 = sand.u32 (%p1041_p3), 1, %s967_s25  }
  0x1b   : > { %s851_s18 = sshll.u32 (%p1041_p3), %s971_s26, 2  ;;  %s922_s19 = smul.u32 (%p1041_p3), 36, %s320_s17 }
  0x1c   : > { %s324_s22 = scalar_lea.vmem (%p1041_p3), %s1124_s4, %s851_s18 }
  0x1d   : > { %v341_v9 = vld [vmem:[%s324_s22] sm:$0xf] (%p1041_p3)  ;;  %v343_v10 = vld [vmem:[%s324_s22 + $0x14] sm:$0xf] (%p1041_p3)  ;;  %v345_v11 = vld [vmem:[%s324_s22 + $0x28] sm:$0xf] (%p1041_p3) }
  0x1e   : > { %s322_s23 = scalar_lea.vmem (%p1041_p3), [#allocation3], %s922_s19  ;;  %v347_v12 = vld [vmem:[%s324_s22 + $0x3c] sm:$0xf] (%p1041_p3)  ;;  %v349_v13 = vld [vmem:[%s324_s22 + $0x50] sm:$0xf] (%p1041_p3) }
  0x1f   : > { %342 = vst [vmem:[%s322_s23] sm:$0xf] %v341_v9  ;;  %v351_v14 = vld [vmem:[%s324_s22 + $0x64] sm:$0xf]  ;;  %v353_v15 = vld [vmem:[%s324_s22 + $0x78] sm:$0xf] }
  0x20   : > { %344 = vst [vmem:[%s322_s23 + $0x4] sm:$0xf] %v343_v10  ;;  %v355_v16 = vld [vmem:[%s324_s22 + $0x8c] sm:$0xf]  ;;  %v357_v17 = vld [vmem:[%s324_s22 + $0xa0] sm:$0xf] }
  0x21   : > { %346 = vst [vmem:[%s322_s23 + $0x8] sm:$0xf] %v345_v11 }
  0x22   : > { %348 = vst [vmem:[%s322_s23 + $0xc] sm:$0xf] %v347_v12 }
  0x23   : > { %350 = vst [vmem:[%s322_s23 + $0x10] sm:$0xf] %v349_v13 }
  0x24   : > { %352 = vst [vmem:[%s322_s23 + $0x14] sm:$0xf] %v351_v14 }
  0x25   : > { %354 = vst [vmem:[%s322_s23 + $0x18] sm:$0xf] %v353_v15 }
  0x26   : > { %356 = vst [vmem:[%s322_s23 + $0x1c] sm:$0xf] %v355_v16 }
  0x27   : > { %358 = vst [vmem:[%s322_s23 + $0x20] sm:$0xf] %v357_v17 }
  0x28 PF: > { %400 = sbr.rel (!%p1041_p3) target bundleno = 54 (0x36), region = 114  ;;  %s402_s29 = sand.u32 (%p1041_p3), 1, %s967_s25  }
  0x29   : > { %s852_s30 = sshll.u32 (%p1041_p3), %s971_s26, 2  ;;  %s923_s10 = smul.u32 (%p1041_p3), 36, %s402_s29 }
  0x2a   : > { %s406_s13 = scalar_lea.vmem (%p1041_p3), %s1125_s5, %s852_s30 }
  0x2b   : > { %v423_v18 = vld [vmem:[%s406_s13] sm:$0xf] (%p1041_p3)  ;;  %v425_v19 = vld [vmem:[%s406_s13 + $0x14] sm:$0xf] (%p1041_p3)  ;;  %v427_v20 = vld [vmem:[%s406_s13 + $0x28] sm:$0xf] (%p1041_p3) }
  0x2c   : > { %s404_s14 = scalar_lea.vmem (%p1041_p3), [#allocation4], %s923_s10  ;;  %v429_v21 = vld [vmem:[%s406_s13 + $0x3c] sm:$0xf] (%p1041_p3)  ;;  %v431_v22 = vld [vmem:[%s406_s13 + $0x50] sm:$0xf] (%p1041_p3) }
  0x2d   : > { %424 = vst [vmem:[%s404_s14] sm:$0xf] %v423_v18  ;;  %v433_v23 = vld [vmem:[%s406_s13 + $0x64] sm:$0xf]  ;;  %v435_v24 = vld [vmem:[%s406_s13 + $0x78] sm:$0xf] }
  0x2e   : > { %426 = vst [vmem:[%s404_s14 + $0x4] sm:$0xf] %v425_v19  ;;  %v437_v25 = vld [vmem:[%s406_s13 + $0x8c] sm:$0xf]  ;;  %v439_v26 = vld [vmem:[%s406_s13 + $0xa0] sm:$0xf] }
  0x2f   : > { %428 = vst [vmem:[%s404_s14 + $0x8] sm:$0xf] %v427_v20 }
  0x30   : > { %430 = vst [vmem:[%s404_s14 + $0xc] sm:$0xf] %v429_v21 }
  0x31   : > { %432 = vst [vmem:[%s404_s14 + $0x10] sm:$0xf] %v431_v22 }
  0x32   : > { %434 = vst [vmem:[%s404_s14 + $0x14] sm:$0xf] %v433_v23 }
  0x33   : > { %436 = vst [vmem:[%s404_s14 + $0x18] sm:$0xf] %v435_v24 }
  0x34   : > { %438 = vst [vmem:[%s404_s14 + $0x1c] sm:$0xf] %v437_v25 }
  0x35   : > { %440 = vst [vmem:[%s404_s14 + $0x20] sm:$0xf] %v439_v26 }
  0x36 PF: > { %p853_p5 = scmp.ge.s32.totalorder %s971_s26, 1  ;;  %p488_p6 = scmp.lt.s32.totalorder %s971_s26, 6 }
  0x38   : > { %p489_p7 = pnand %p853_p5, %p488_p6 }
  0x39   : > { %s495_s9 = sand.u32 (!%p489_p7), 1, %s963_s24   ;;  %p551_p8 = scmp.lt.s32.totalorder (!%p489_p7), %s846_s27, 4 }
  0x3a   : > { %492 = sbr.rel (%p489_p7) target bundleno = 231 (0xe7), region = 159 }
  0x3b   : > { %s924_s15 = smul.u32 (!%p489_p7), 36, %s495_s9 }
  0x3d   : > { %s1070_s16 = scalar_lea.vmem (!%p489_p7), [#allocation3], %s924_s15  ;;  %s1073_s17 = scalar_lea.vmem (!%p489_p7), [#allocation2], %s924_s15 }
  0x3e   : > { %s1076_s18 = scalar_lea.vmem (!%p489_p7), [#allocation4], %s924_s15 }
  0x3f   : > { %v579_v27 = vld [vmem:[%s1070_s16 + $0x20] sm:$0xf]  ;;  %v569_v28 = vld [vmem:[%s1073_s17 + $0x20] sm:$0xf]  ;;  %v683_v31 = vld [vmem:[%s1076_s18 + $0x20] sm:$0xf] }
  0x40   : > { %v597_v29 = vunpack.c.l.b16 %v579_v27  ;;  %v645_v30 = vunpack.c.l.b16 %v569_v28  ;;  %vm611_vm0 = vcmask 1043456   ;;  %v701_v32 = vunpack.c.l.b16 %v683_v31  ;;  %v916_v39 = vld [vmem:[%s1070_s16 + $0x18] sm:$0xff]  ;;  %v912_v40 = vld [vmem:[%s1073_s17 + $0x18] sm:$0xff]  ;;  %v920_v41 = vld [vmem:[%s1076_s18 + $0x18] sm:$0xff]  ;;  %s1133_s27 = smov (!%p551_p8, %s846_s27), 4 }
  0x41   : > { %v915_v42 = vld [vmem:[%s1070_s16 + $0x10] sm:$0xff]  ;;  %v911_v43 = vld [vmem:[%s1073_s17 + $0x10] sm:$0xff]  ;;  %v919_v44 = vld [vmem:[%s1076_s18 + $0x10] sm:$0xff]  ;;  %vm607_vm1 = vcmask 588800   ;;  %s854_s29 = sshll.u32 %s1133_s27, 2 }
  0x42   : > { %v602_v33 = vpack.c.b16 %v597_v29, %v597_v29  ;;  %v650_v34 = vpack.c.b16 %v645_v30, %v645_v30  ;;  %v706_v35 = vpack.c.b16 %v701_v32, %v701_v32  ;;  %v914_v45 = vld [vmem:[%s1070_s16 + $0x8] sm:$0xff]  ;;  %v910_v46 = vld [vmem:[%s1073_s17 + $0x8] sm:$0xff]  ;;  %v918_v47 = vld [vmem:[%s1076_s18 + $0x8] sm:$0xff]  ;;  %s554_s11 = scalar_lea.vmem %s1126_s6, %s854_s29  ;;  %s558_s13 = scalar_lea.vmem %s1127_s7, %s854_s29 }
  0x43   : > { %v913_v48 = vld [vmem:[%s1070_s16] sm:$0xff]  ;;  %v909_v49 = vld [vmem:[%s1073_s17] sm:$0xff]  ;;  %v917_v50 = vld [vmem:[%s1076_s18] sm:$0xff] }
  0x44   : > { %v613_v36 = vsel %vm611_vm0, %v602_v33, 0  ;;  %v659_v37 = vsel %vm611_vm0, %v650_v34, 0  ;;  %v715_v38 = vsel %vm611_vm0, %v706_v35, 0  ;;  %v570_v51 = vld [vmem:[%s1121_s1] sm:$0xf] }
  0x45   : > { %618 = vmatpush.bf16.msra.mxu0 %v613_v36  ;;  %664 = vmatpush.bf16.msra.mxu1 %v659_v37  ;;  %v560_v52 = vld [vmem:[%s1120_s0] sm:$0xf] }
  0x46   : > { %720 = vmatpush.bf16.msra.mxu2 %v715_v38  ;;  %v674_v53 = vld [vmem:[%s1122_s2] sm:$0xf] }
  0x47   : > { %v734_v57 = vld [vmem:[%s554_s11] sm:$0xf] }
  0x48   : > { %v735_v62 = vunpack.c.l.bf16 %v734_v57 }
  0x49   : > { %619 = vmatpush.bf16.msra.mxu0 %v916_v39  ;;  %665 = vmatpush.bf16.msra.mxu1 %v912_v40 }
  0x4a   : > { %721 = vmatpush.bf16.msra.mxu2 %v920_v41 }
  0x4d   : > { %620 = vmatpush.bf16.msra.mxu0 %v915_v42  ;;  %666 = vmatpush.bf16.msra.mxu1 %v911_v43 }
  0x4e   : > { %722 = vmatpush.bf16.msra.mxu2 %v919_v44 }
  0x51   : > { %621 = vmatpush.bf16.msra.mxu0 %v914_v45  ;;  %667 = vmatpush.bf16.msra.mxu1 %v910_v46 }
  0x52   : > { %723 = vmatpush.bf16.msra.mxu2 %v918_v47 }
  0x55   : > { %622 = vmatpush.bf16.msra.mxu0 %v913_v48  ;;  %668 = vmatpush.bf16.msra.mxu1 %v909_v49 }
  0x56   : > { %724 = vmatpush.bf16.msra.mxu2 %v917_v50 }
  0x58   : > { %872 = vmatmul.msk.bf16.vlgmr.msra.gmra.mxu0 %vm607_vm1, %v570_v51  ;;  %889 = vmatmul.msk.bf16.vlgmr.msra.gmra.mxu1 %vm607_vm1, %v560_v52 }
  0x59   : > { %906 = vmatmul.msk.bf16.vlgmr.msra.gmra.mxu2 %vm607_vm1, %v674_v53 }
  0xd5   : > { %v624_v54 = vpop.f32.mrf.mxu0  ;;  %v670_v55 = vpop.f32.mrf.mxu1 }
  0xd6   : > { %v671_v56 = vadd.f32 %v670_v55, %v624_v54 }
  0xdc   : > { %v726_v58 = vpop.f32.mrf.mxu2 }
  0xdd   : > { %v730_v59 = vadd.f32 %v726_v58, %v671_v56  ;;  %v626_v60 = vpop.f32.mrf.mxu0  ;;  %v672_v61 = vpop.f32.mrf.mxu1 }
  0xdf   : > { %vm731_vm2 = vcmp.ge.f32.partialorder %v730_v59, 0.0  ;;  %v732_v63 = vmul.f32 0.1, %v730_v59 }
  0xe1   : > { %v733_v0 = vsel %vm731_vm2, %v730_v59, %v732_v63 }
  0xe2   : > { %v736_v1 = vadd.f32 %v735_v62, %v733_v0 }
  0xe4   : > { %v737_v2 = vpack.c.bf16 %v736_v1, %v736_v1  ;;  %v728_v3 = vpop.f32.mrf.mxu2 }
  0xe6   : > { %738 = vst [vmem:[%s558_s13] sm:$0xf] %v737_v2 }
  0xe7 PF: > { %p14_p9 = scmp.ge.s32.totalorder %s1030_s28, 7   ;;  %s1129_s24 = smov %s967_s25 }
  0xe8   : > { %s1130_s25 = smov %s1039_s8  ;;  %s1131_s26 = smov %s1030_s28 }
  0xe9   :  { %16 = sbr.rel (!%p14_p9) target bundleno = 2 (0x2), region = 225 }

// kernel: vsnet_forward.44
= control target key start
LH: loop header
LB: loop body
LE: loop exit
PB: predicated region body
PF: predicated region fallthrough
CT: control target
= control target key end

     0   :  { %s691_s15 = smov 0   ;;  %s693_s16 = smov 0   ;;  %s764_s0 = inlined_call_operand.vmem [shape: bf16[8,72], index: 0, kind: input, shape index: {}]   ;;  %s765_s1 = inlined_call_operand.vmem [shape: bf16[8,72], index: 1, kind: input, shape index: {}]   ;;  %s766_s2 = inlined_call_operand.vmem [shape: bf16[72,640], index: 2, kind: input, shape index: {}]   ;;  %s767_s3 = inlined_call_operand.vmem [shape: bf16[72,640], index: 3, kind: input, shape index: {}]   ;;  %s768_s4 = inlined_call_operand.vmem [shape: bf16[8,640], index: 4, kind: output, shape index: {}]  }
   0x1   :  { %s695_s17 = smov 0  }
   0x2 LB: > { %s563_s18 = sadd.s32 4294967295, %s664_s17   ;;  %s708_s19 = sadd.s32 1, %s664_s17   ;;  %s664_s17 = sphi %s695_s17, %s772_s17   ;;  %s660_s16 = sphi %s693_s16, %s771_s16   ;;  %s656_s15 = sphi %s691_s15, %s770_s15  }
   0x3   : > { %s60_s20 = ssub.s32 %s664_s17, %s708_s19  ;;  %s63_s21 = sadd.s32 1, %s660_s16 }
   0x4   : > { %p61_p0 = scmp.eq.s32.totalorder %s60_s20, 0  ;;  %p70_p1 = scmp.ne.s32.totalorder %s660_s16, %s656_s15 }
   0x5   : > { %p71_p2 = scmp.eq.s32.totalorder %s664_s17, 0  ;;  %p566_p4 = scmp.ge.s32.totalorder %s664_s17, 5 }
   0x6   : > { %s717_s22 = scalar_select %p61_p0, %s660_s16, %s63_s21  }
   0x7   : > { %p719_p3 = por %p71_p2, %p70_p1  ;;  %154 = sbr.rel (%p566_p4) target bundleno = 40 (0x28), region = 24 }
   0xc   : > { %157 = sbr.rel (!%p719_p3) target bundleno = 26 (0x1a), region = 28  ;;  %s159_s24 = sand.u32 (%p719_p3), 1, %s660_s16  }
   0xd   : > { %s567_s25 = sshll.u32 (%p719_p3), %s664_s17, 2  ;;  %s615_s26 = smul.u32 (%p719_p3), 36, %s159_s24 }
   0xe   : > { %s163_s29 = scalar_lea.vmem (%p719_p3), %s766_s2, %s567_s25 }
   0xf   : > { %v180_v0 = vld [vmem:[%s163_s29] sm:$0xf] (%p719_p3)  ;;  %v182_v1 = vld [vmem:[%s163_s29 + $0x14] sm:$0xf] (%p719_p3)  ;;  %v184_v2 = vld [vmem:[%s163_s29 + $0x28] sm:$0xf] (%p719_p3) }
  0x10   : > { %s161_s30 = scalar_lea.vmem (%p719_p3), [#allocation2], %s615_s26  ;;  %v186_v3 = vld [vmem:[%s163_s29 + $0x3c] sm:$0xf] (%p719_p3)  ;;  %v188_v4 = vld [vmem:[%s163_s29 + $0x50] sm:$0xf] (%p719_p3) }
  0x11   : > { %181 = vst [vmem:[%s161_s30] sm:$0xf] %v180_v0  ;;  %v190_v5 = vld [vmem:[%s163_s29 + $0x64] sm:$0xf]  ;;  %v192_v6 = vld [vmem:[%s163_s29 + $0x78] sm:$0xf] }
  0x12   : > { %183 = vst [vmem:[%s161_s30 + $0x4] sm:$0xf] %v182_v1  ;;  %v194_v7 = vld [vmem:[%s163_s29 + $0x8c] sm:$0xf]  ;;  %v196_v8 = vld [vmem:[%s163_s29 + $0xa0] sm:$0xf] }
  0x13   : > { %185 = vst [vmem:[%s161_s30 + $0x8] sm:$0xf] %v184_v2 }
  0x14   : > { %187 = vst [vmem:[%s161_s30 + $0xc] sm:$0xf] %v186_v3 }
  0x15   : > { %189 = vst [vmem:[%s161_s30 + $0x10] sm:$0xf] %v188_v4 }
  0x16   : > { %191 = vst [vmem:[%s161_s30 + $0x14] sm:$0xf] %v190_v5 }
  0x17   : > { %193 = vst [vmem:[%s161_s30 + $0x18] sm:$0xf] %v192_v6 }
  0x18   : > { %195 = vst [vmem:[%s161_s30 + $0x1c] sm:$0xf] %v194_v7 }
  0x19   : > { %197 = vst [vmem:[%s161_s30 + $0x20] sm:$0xf] %v196_v8 }
  0x1a PF: > { %239 = sbr.rel (!%p719_p3) target bundleno = 40 (0x28), region = 69  ;;  %s241_s5 = sand.u32 (%p719_p3), 1, %s660_s16  }
  0x1b   : > { %s568_s6 = sshll.u32 (%p719_p3), %s664_s17, 2  ;;  %s616_s7 = smul.u32 (%p719_p3), 36, %s241_s5 }
  0x1c   : > { %s245_s10 = scalar_lea.vmem (%p719_p3), %s767_s3, %s568_s6 }
  0x1d   : > { %v262_v9 = vld [vmem:[%s245_s10] sm:$0xf] (%p719_p3)  ;;  %v264_v10 = vld [vmem:[%s245_s10 + $0x14] sm:$0xf] (%p719_p3)  ;;  %v266_v11 = vld [vmem:[%s245_s10 + $0x28] sm:$0xf] (%p719_p3) }
  0x1e   : > { %s243_s11 = scalar_lea.vmem (%p719_p3), [#allocation3], %s616_s7  ;;  %v268_v12 = vld [vmem:[%s245_s10 + $0x3c] sm:$0xf] (%p719_p3)  ;;  %v270_v13 = vld [vmem:[%s245_s10 + $0x50] sm:$0xf] (%p719_p3) }
  0x1f   : > { %263 = vst [vmem:[%s243_s11] sm:$0xf] %v262_v9  ;;  %v272_v14 = vld [vmem:[%s245_s10 + $0x64] sm:$0xf]  ;;  %v274_v15 = vld [vmem:[%s245_s10 + $0x78] sm:$0xf] }
  0x20   : > { %265 = vst [vmem:[%s243_s11 + $0x4] sm:$0xf] %v264_v10  ;;  %v276_v16 = vld [vmem:[%s245_s10 + $0x8c] sm:$0xf]  ;;  %v278_v17 = vld [vmem:[%s245_s10 + $0xa0] sm:$0xf] }
  0x21   : > { %267 = vst [vmem:[%s243_s11 + $0x8] sm:$0xf] %v266_v11 }
  0x22   : > { %269 = vst [vmem:[%s243_s11 + $0xc] sm:$0xf] %v268_v12 }
  0x23   : > { %271 = vst [vmem:[%s243_s11 + $0x10] sm:$0xf] %v270_v13 }
  0x24   : > { %273 = vst [vmem:[%s243_s11 + $0x14] sm:$0xf] %v272_v14 }
  0x25   : > { %275 = vst [vmem:[%s243_s11 + $0x18] sm:$0xf] %v274_v15 }
  0x26   : > { %277 = vst [vmem:[%s243_s11 + $0x1c] sm:$0xf] %v276_v16 }
  0x27   : > { %279 = vst [vmem:[%s243_s11 + $0x20] sm:$0xf] %v278_v17 }
  0x28 PF: > { %p569_p5 = scmp.ge.s32.totalorder %s664_s17, 1  ;;  %p320_p6 = scmp.lt.s32.totalorder %s664_s17, 6 }
  0x2a   : > { %p321_p7 = pnand %p569_p5, %p320_p6 }
  0x2b   : > { %s327_s12 = sand.u32 (!%p321_p7), 1, %s656_s15   ;;  %p362_p8 = scmp.lt.s32.totalorder (!%p321_p7), %s563_s18, 4 }
  0x2c   : > { %324 = sbr.rel (%p321_p7) target bundleno = 208 (0xd0), region = 110 }
  0x2d   : > { %s617_s13 = smul.u32 (!%p321_p7), 36, %s327_s12 }
  0x2f   : > { %s336_s14 = scalar_lea.vmem (!%p321_p7), [#allocation3], %s617_s13  ;;  %s329_s20 = scalar_lea.vmem (!%p321_p7), [#allocation2], %s617_s13 }
  0x31   : > { %v386_v18 = vld [vmem:[%s336_s14 + $0x20] sm:$0xf]  ;;  %v376_v19 = vld [vmem:[%s329_s20 + $0x20] sm:$0xf]  ;;  %vm418_vm0 = vcmask 1043456   ;;  %v610_v27 = vld [vmem:[%s329_s20 + $0x18] sm:$0xff] }
  0x32   : > { %v404_v20 = vunpack.c.l.b16 %v386_v18  ;;  %v452_v21 = vunpack.c.l.b16 %v376_v19  ;;  %v614_v26 = vld [vmem:[%s336_s14 + $0x18] sm:$0xff]  ;;  %v613_v28 = vld [vmem:[%s336_s14 + $0x10] sm:$0xff]  ;;  %v609_v29 = vld [vmem:[%s329_s20 + $0x10] sm:$0xff]  ;;  %vm414_vm1 = vcmask 588800   ;;  %s774_s18 = smov (!%p362_p8, %s563_s18), 4 }
  0x33   : > { %v612_v30 = vld [vmem:[%s336_s14 + $0x8] sm:$0xff]  ;;  %v608_v31 = vld [vmem:[%s329_s20 + $0x8] sm:$0xff]  ;;  %v607_v33 = vld [vmem:[%s329_s20] sm:$0xff]  ;;  %s570_s25 = sshll.u32 %s774_s18, 2 }
  0x34   : > { %v409_v22 = vpack.c.b16 %v404_v20, %v404_v20  ;;  %v457_v23 = vpack.c.b16 %v452_v21, %v452_v21  ;;  %v611_v32 = vld [vmem:[%s336_s14] sm:$0xff]  ;;  %v377_v34 = vld [vmem:[%s765_s1] sm:$0xf]  ;;  %s365_s28 = scalar_lea.vmem %s768_s4, %s570_s25 }
  0x35   : > { %v367_v35 = vld [vmem:[%s764_s0] sm:$0xf] }
  0x36   : > { %v420_v24 = vsel %vm418_vm0, %v409_v22, 0  ;;  %v466_v25 = vsel %vm418_vm0, %v457_v23, 0 }
  0x37   : > { %425 = vmatpush.bf16.msra.mxu0 %v420_v24  ;;  %471 = vmatpush.bf16.msra.mxu1 %v466_v25 }
  0x3b   : > { %426 = vmatpush.bf16.msra.mxu0 %v614_v26  ;;  %472 = vmatpush.bf16.msra.mxu1 %v610_v27 }
  0x3f   : > { %427 = vmatpush.bf16.msra.mxu0 %v613_v28  ;;  %473 = vmatpush.bf16.msra.mxu1 %v609_v29 }
  0x43   : > { %428 = vmatpush.bf16.msra.mxu0 %v612_v30  ;;  %474 = vmatpush.bf16.msra.mxu1 %v608_v31 }
  0x47   : > { %429 = vmatpush.bf16.msra.mxu0 %v611_v32  ;;  %475 = vmatpush.bf16.msra.mxu1 %v607_v33 }
  0x4a   : > { %587 = vmatmul.msk.bf16.vlgmr.msra.gmra.mxu0 %vm414_vm1, %v377_v34  ;;  %604 = vmatmul.msk.bf16.vlgmr.msra.gmra.mxu1 %vm414_vm1, %v367_v35 }
  0xc7   : > { %v431_v36 = vpop.f32.mrf.mxu0  ;;  %v477_v37 = vpop.f32.mrf.mxu1 }
  0xc8   : > { %v478_v38 = vadd.f32 %v477_v37, %v431_v36 }
  0xca   : > { %vm481_vm2 = vcmp.ge.f32.partialorder %v478_v38, 0.0  ;;  %v482_v39 = vmul.f32 0.1, %v478_v38 }
  0xcc   : > { %v483_v40 = vsel %vm481_vm2, %v478_v38, %v482_v39 }
  0xcd   : > { %v484_v41 = vpack.c.bf16 %v483_v40, %v483_v40 }
  0xcf   : > { %485 = vst [vmem:[%s365_s28] sm:$0xf] %v484_v41  ;;  %v433_v42 = vpop.f32.mrf.mxu0  ;;  %v479_v43 = vpop.f32.mrf.mxu1 }
  0xd0 PF: > { %p11_p9 = scmp.ge.s32.totalorder %s708_s19, 7   ;;  %s770_s15 = smov %s660_s16 }
  0xd1   : > { %s771_s16 = smov %s717_s22  ;;  %s772_s17 = smov %s708_s19 }
  0xd2   :  { %13 = sbr.rel (!%p11_p9) target bundleno = 2 (0x2), region = 161 }

// kernel: vsnet_forward.32
= control target key start
LH: loop header
LB: loop body
LE: loop exit
PB: predicated region body
PF: predicated region fallthrough
CT: control target
= control target key end

     0   :  { %vm29_vm0 = vcmask 1043456   ;;  %vm25_vm1 = vcmask 64512   ;;  %s127_s3 = inlined_call_operand.vmem [shape: bf16[8,128], index: 3, kind: input, shape index: {}]   ;;  %s128_s2 = inlined_call_operand.vmem [shape: bf16[8,128], index: 2, kind: input, shape index: {}]   ;;  %s129_s1 = inlined_call_operand.vmem [shape: bf16[8,8], index: 1, kind: input, shape index: {}]   ;;  %s130_s0 = inlined_call_operand.vmem [shape: bf16[8,8], index: 0, kind: input, shape index: {}]   ;;  %s131_s4 = inlined_call_operand.vmem [shape: bf16[8,128], index: 4, kind: input, shape index: {}]   ;;  %s132_s5 = inlined_call_operand.vmem [shape: bf16[8,128], index: 5, kind: output, shape index: {}]  }
   0x1   :  { %v24_v0 = vld [vmem:[%s127_s3] sm:$0xf] }
   0x2   :  { %v22_v1 = vld [vmem:[%s128_s2] sm:$0xf]  ;;  %v31_v2 = vsel %vm29_vm0, %v24_v0, 0 }
   0x3   :  { %v50_v3 = vsel %vm29_vm0, %v22_v1, 0  ;;  %40 = vmatpush.bf16.msra.mxu0 %v31_v2  ;;  %v23_v4 = vld [vmem:[%s129_s1] sm:$0xf] }
   0x4   :  { %59 = vmatpush.bf16.msra.mxu1 %v50_v3  ;;  %v21_v5 = vld [vmem:[%s130_s0] sm:$0xf] }
   0x5   :  { %v68_v6 = vld [vmem:[%s131_s4] sm:$0xf] }
   0x6   :  { %77 = vmatmul.msk.bf16.vlgmr.msra.gmra.mxu0 %vm25_vm1, %v23_v4  ;;  %v69_v10 = vunpack.c.l.bf16 %v68_v6 }
   0x7   :  { %78 = vmatmul.msk.bf16.vlgmr.msra.gmra.mxu1 %vm25_vm1, %v21_v5 }
  0x83   :  { %v42_v7 = vpop.f32.mrf.mxu0 }
  0x84   :  { %v61_v8 = vpop.f32.mrf.mxu1 }
  0x85   :  { %v62_v9 = vadd.f32 %v61_v8, %v42_v7 }
  0x87   :  { %vm65_vm2 = vcmp.ge.f32.partialorder %v62_v9, 0.0  ;;  %v66_v11 = vmul.f32 0.1, %v62_v9 }
  0x89   :  { %v67_v12 = vsel %vm65_vm2, %v62_v9, %v66_v11 }
  0x8a   :  { %v70_v13 = vadd.f32 %v69_v10, %v67_v12 }
  0x8b   :  { %v44_v15 = vpop.f32.mrf.mxu0 }
  0x8c   :  { %v71_v14 = vpack.c.bf16 %v70_v13, %v70_v13  ;;  %v63_v16 = vpop.f32.mrf.mxu1 }
  0x8e   :  { %72 = vst [vmem:[%s132_s5] sm:$0xf] %v71_v14 }

// kernel: vsnet_forward.42
= control target key start
LH: loop header
LB: loop body
LE: loop exit
PB: predicated region body
PF: predicated region fallthrough
CT: control target
= control target key end

     0   :  { %vm26_vm0 = vcmask 1043456   ;;  %vm22_vm1 = vcmask 64512   ;;  %s113_s3 = inlined_call_operand.vmem [shape: bf16[8,128], index: 3, kind: input, shape index: {}]   ;;  %s114_s2 = inlined_call_operand.vmem [shape: bf16[8,128], index: 2, kind: input, shape index: {}]   ;;  %s115_s1 = inlined_call_operand.vmem [shape: bf16[8,8], index: 1, kind: input, shape index: {}]   ;;  %s116_s0 = inlined_call_operand.vmem [shape: bf16[8,8], index: 0, kind: input, shape index: {}]   ;;  %s117_s4 = inlined_call_operand.vmem [shape: bf16[8,128], index: 4, kind: output, shape index: {}]  }
   0x1   :  { %v21_v0 = vld [vmem:[%s113_s3] sm:$0xf] }
   0x2   :  { %v19_v1 = vld [vmem:[%s114_s2] sm:$0xf]  ;;  %v28_v2 = vsel %vm26_vm0, %v21_v0, 0 }
   0x3   :  { %v47_v3 = vsel %vm26_vm0, %v19_v1, 0  ;;  %37 = vmatpush.bf16.msra.mxu0 %v28_v2  ;;  %v20_v4 = vld [vmem:[%s115_s1] sm:$0xf] }
   0x4   :  { %56 = vmatpush.bf16.msra.mxu1 %v47_v3  ;;  %v18_v5 = vld [vmem:[%s116_s0] sm:$0xf] }
   0x6   :  { %71 = vmatmul.msk.bf16.vlgmr.msra.gmra.mxu0 %vm22_vm1, %v20_v4 }
   0x7   :  { %72 = vmatmul.msk.bf16.vlgmr.msra.gmra.mxu1 %vm22_vm1, %v18_v5 }
  0x83   :  { %v39_v6 = vpop.f32.mrf.mxu0 }
  0x84   :  { %v58_v7 = vpop.f32.mrf.mxu1 }
  0x85   :  { %v59_v8 = vadd.f32 %v58_v7, %v39_v6 }
  0x87   :  { %vm62_vm2 = vcmp.ge.f32.partialorder %v59_v8, 0.0  ;;  %v63_v9 = vmul.f32 0.1, %v59_v8 }
  0x89   :  { %v64_v10 = vsel %vm62_vm2, %v59_v8, %v63_v9 }
  0x8a   :  { %v65_v11 = vpack.c.bf16 %v64_v10, %v64_v10 }
  0x8b   :  { %v41_v12 = vpop.f32.mrf.mxu0 }
  0x8c   :  { %66 = vst [vmem:[%s117_s4] sm:$0xf] %v65_v11  ;;  %v60_v13 = vpop.f32.mrf.mxu1 }

// kernel: vsnet_forward.43
= control target key start
LH: loop header
LB: loop body
LE: loop exit
PB: predicated region body
PF: predicated region fallthrough
CT: control target
= control target key end

     0   :  { %vm61_vm0 = vcmask 1043456   ;;  %vm45_vm1 = vcmask 64512   ;;  %s219_s1 = inlined_call_operand.vmem [shape: bf16[8,128], index: 1, kind: input, shape index: {}]   ;;  %s220_s0 = inlined_call_operand.vmem [shape: bf16[72,8], index: 0, kind: input, shape index: {}]   ;;  %s221_s2 = inlined_call_operand.vmem [shape: bf16[72,128], index: 2, kind: output, shape index: {}]  }
   0x1   :  { %v21_v0 = vld [vmem:[%s219_s1] sm:$0xf]  ;;  %v143_v3 = vld [vmem:[%s220_s0 + $0x10] sm:$0xff]  ;;  %v142_v6 = vld [vmem:[%s220_s0 + $0x8] sm:$0xff] }
   0x2   :  { %v20_v1 = vld [vmem:[%s220_s0 + $0x20] sm:$0xf]  ;;  %v63_v2 = vsel %vm61_vm0, %v21_v0, 0  ;;  %v144_v8 = vld [vmem:[%s220_s0 + $0x18] sm:$0xff] }
   0x3   :  { %v39_v4 = vunpack.c.l.b16 %v20_v1  ;;  %169 = vmatpush.bf16.msra.mxu2 %v63_v2  ;;  %170 = vmatpush.bf16.msra.mxu3 %v63_v2  ;;  %v141_v5 = vld [vmem:[%s220_s0] sm:$0xff] }
   0x4   :  { %72 = vmatpush.bf16.msra.mxu0 %v63_v2  ;;  %168 = vmatpush.bf16.msra.mxu1 %v63_v2 }
   0x5   :  { %v44_v7 = vpack.c.b16 %v39_v4, %v39_v4 }
   0x6   :  { %138 = vmatmul.msk.bf16.vlgmr.msra.gmra.mxu2 %vm45_vm1, %v143_v3 }
   0x7   :  { %140 = vmatmul.msk.bf16.vlgmr.msra.gmra.mxu3 %vm45_vm1, %v44_v7  ;;  %136 = vmatmul.msk.bf16.vlgmr.msra.gmra.mxu0 %vm45_vm1, %v141_v5 }
   0x8   :  { %137 = vmatmul.msk.bf16.vlgmr.msra.gmra.mxu1 %vm45_vm1, %v142_v6 }
  0x16   :  { %139 = vmatmul.msk.bf16.gmra.mxu2 %vm45_vm1, %v144_v8 }
  0x84   :  { %v74_v9 = vpop.f32.mrf.mxu0 }
  0x85   :  { %v79_v10 = vpop.f32.mrf.mxu1 }
  0x89   :  { %v84_v11 = vpop.f32.mrf.mxu2 }
  0x8a   :  { %v94_v12 = vpop.f32.mrf.mxu3 }
  0x8b   :  { %v106_v13 = vpack.c.bf16 %v94_v12, %v94_v12 }
  0x8c   :  { %v76_v14 = vpop.f32.mrf.mxu0 }
  0x8d   :  { %115 = vst [vmem:[%s221_s2 + $0x20] sm:$0xf] %v106_v13  ;;  %v81_v15 = vpop.f32.mrf.mxu1  ;;  %v148_v16 = vpack.c.bf16 %v76_v14, %v74_v9 }
  0x8e   :  { %v153_v17 = vpack.c.bf16 %v81_v15, %v79_v10 }
  0x8f   :  { %149 = vst [vmem:[%s221_s2] sm:$0xff] %v148_v16  }
  0x90   :  { %165 = vst [vmem:[%s221_s2 + $0x8] sm:$0xff] %v153_v17  }
  0x91   :  { %v86_v18 = vpop.f32.mrf.mxu2 }
  0x92   :  { %v96_v19 = vpop.f32.mrf.mxu3  ;;  %v158_v20 = vpack.c.bf16 %v86_v18, %v84_v11 }
  0x94   :  { %166 = vst [vmem:[%s221_s2 + $0x10] sm:$0xff] %v158_v20  }
  0x99   :  { %v89_v21 = vpop.f32.mrf.mxu2 }
  0xa1   :  { %v91_v22 = vpop.f32.mrf.mxu2 }
  0xa2   :  { %v163_v23 = vpack.c.bf16 %v91_v22, %v89_v21 }
  0xa4   :  { %167 = vst [vmem:[%s221_s2 + $0x18] sm:$0xff] %v163_v23  }

// kernel: vsnet_forward.46
= control target key start
LH: loop header
LB: loop body
LE: loop exit
PB: predicated region body
PF: predicated region fallthrough
CT: control target
= control target key end

     0   :  { %s544_s9 = smov 0   ;;  %s546_s10 = smov 0   ;;  %s610_s0 = inlined_call_operand.vmem [shape: bf16[32,72], index: 0, kind: input, shape index: {}]   ;;  %s611_s1 = inlined_call_operand.vmem [shape: bf16[72,640], index: 1, kind: input, shape index: {}]   ;;  %s612_s2 = inlined_call_operand.vmem [shape: bf16[32,640], index: 2, kind: output, shape index: {}]  }
   0x1   :  { %s548_s11 = smov 0  }
   0x2 LB: > { %s420_s12 = sadd.s32 4294967295, %s527_s11   ;;  %s561_s13 = sadd.s32 1, %s527_s11   ;;  %s527_s11 = sphi %s548_s11, %s616_s11   ;;  %s523_s10 = sphi %s546_s10, %s615_s10   ;;  %s519_s9 = sphi %s544_s9, %s614_s9  }
   0x3   : > { %s37_s14 = ssub.s32 %s527_s11, %s561_s13  ;;  %s40_s15 = sadd.s32 1, %s523_s10 }
   0x4   : > { %p38_p0 = scmp.eq.s32.totalorder %s37_s14, 0  ;;  %p47_p1 = scmp.ne.s32.totalorder %s523_s10, %s519_s9 }
   0x5   : > { %p48_p2 = scmp.eq.s32.totalorder %s527_s11, 0  ;;  %p77_p3 = scmp.eq.s32.totalorder %s420_s12, 4 }
   0x6   : > { %s572_s16 = scalar_select %p38_p0, %s523_s10, %s40_s15  }
   0x7   : > { %p49_p4 = por %p48_p2, %p47_p1  ;;  %p574_p5 = por %p77_p3, %p47_p1 }
   0x8   : > { %p423_p6 = scmp.ge.s32.totalorder %s527_s11, 5 }
   0xa   : > { %102 = sbr.rel (%p423_p6) target bundleno = 29 (0x1d), region = 20 }
   0xf   : > { %105 = sbr.rel (!%p49_p4) target bundleno = 29 (0x1d), region = 24  ;;  %s107_s18 = sand.u32 (%p49_p4), 1, %s523_s10  }
  0x10   : > { %s424_s19 = sshll.u32 (%p49_p4), %s527_s11, 2  ;;  %s479_s20 = smul.u32 (%p49_p4), 36, %s107_s18 }
  0x11   : > { %s111_s23 = scalar_lea.vmem (%p49_p4), %s611_s1, %s424_s19 }
  0x12   : > { %v128_v0 = vld [vmem:[%s111_s23] sm:$0xf] (%p49_p4)  ;;  %v130_v1 = vld [vmem:[%s111_s23 + $0x14] sm:$0xf] (%p49_p4)  ;;  %v132_v2 = vld [vmem:[%s111_s23 + $0x28] sm:$0xf] (%p49_p4) }
  0x13   : > { %s109_s24 = scalar_lea.vmem (%p49_p4), [#allocation2], %s479_s20  ;;  %v134_v3 = vld [vmem:[%s111_s23 + $0x3c] sm:$0xf] (%p49_p4)  ;;  %v136_v4 = vld [vmem:[%s111_s23 + $0x50] sm:$0xf] (%p49_p4) }
  0x14   : > { %129 = vst [vmem:[%s109_s24] sm:$0xf] %v128_v0  ;;  %v138_v5 = vld [vmem:[%s111_s23 + $0x64] sm:$0xf]  ;;  %v140_v6 = vld [vmem:[%s111_s23 + $0x78] sm:$0xf] }
  0x15   : > { %131 = vst [vmem:[%s109_s24 + $0x4] sm:$0xf] %v130_v1  ;;  %v142_v7 = vld [vmem:[%s111_s23 + $0x8c] sm:$0xf]  ;;  %v144_v8 = vld [vmem:[%s111_s23 + $0xa0] sm:$0xf] }
  0x16   : > { %133 = vst [vmem:[%s109_s24 + $0x8] sm:$0xf] %v132_v2 }
  0x17   : > { %135 = vst [vmem:[%s109_s24 + $0xc] sm:$0xf] %v134_v3 }
  0x18   : > { %137 = vst [vmem:[%s109_s24 + $0x10] sm:$0xf] %v136_v4 }
  0x19   : > { %139 = vst [vmem:[%s109_s24 + $0x14] sm:$0xf] %v138_v5 }
  0x1a   : > { %141 = vst [vmem:[%s109_s24 + $0x18] sm:$0xf] %v140_v6 }
  0x1b   : > { %143 = vst [vmem:[%s109_s24 + $0x1c] sm:$0xf] %v142_v7 }
  0x1c   : > { %145 = vst [vmem:[%s109_s24 + $0x20] sm:$0xf] %v144_v8 }
  0x1d PF: > { %p425_p7 = scmp.ge.s32.totalorder %s527_s11, 1  ;;  %p186_p8 = scmp.lt.s32.totalorder %s527_s11, 6 }
  0x1f   : > { %p187_p9 = pnand %p425_p7, %p186_p8 }
  0x20   : > { %s193_s25 = sand.u32 (!%p187_p9), 1, %s519_s9  }
  0x21   : > { %190 = sbr.rel (%p187_p9) target bundleno = 211 (0xd3), region = 65  ;;  %s426_s4 = sshll.u32 (!%p187_p9), %s193_s25, 4 }
  0x22   : > { %s480_s26 = smul.u32 (!%p187_p9), 36, %s193_s25  ;;  %s212_s5 = scalar_lea.vmem (!%p187_p9), [#allocation3], %s426_s4 }
  0x24   : > { %s195_s27 = scalar_lea.vmem (!%p187_p9), [#allocation2], %s480_s26 }
  0x26   : > { %v226_v9 = vld [vmem:[%s195_s27 + $0x20] sm:$0xf]  ;;  %vm271_vm0 = vcmask 1043456   ;;  %v462_v13 = vld [vmem:[%s195_s27 + $0x18] sm:$0xff]  ;;  %v461_v14 = vld [vmem:[%s195_s27 + $0x10] sm:$0xff]  ;;  %vm264_vm1 = vcmask 588800  }
  0x27   : > { %v254_v10 = vunpack.c.l.b16 %v226_v9  ;;  %v460_v15 = vld [vmem:[%s195_s27 + $0x8] sm:$0xff]  ;;  %v459_v16 = vld [vmem:[%s195_s27] sm:$0xff]  ;;  %s454_s6 = sshll.u32 (%p574_p5), %s420_s12, 2 }
  0x28   : > { %v457_v17 = vld [vmem:[%s610_s0] sm:$0xff]  ;;  %v458_v18 = vld [vmem:[%s610_s0 + $0x8] sm:$0xff]  ;;  %s310_s9 = scalar_lea.vmem (%p574_p5), %s612_s2, %s454_s6 }
  0x29   : > { %v259_v11 = vpack.c.b16 %v254_v10, %v254_v10 }
  0x2b   : > { %v273_v12 = vsel %vm271_vm0, %v259_v11, 0 }
  0x2c   : > { %278 = vmatpush.bf16.msra.mxu0 %v273_v12  ;;  %474 = vmatpush.bf16.msra.mxu1 %v273_v12 }
  0x30   : > { %279 = vmatpush.bf16.msra.mxu0 %v462_v13  ;;  %475 = vmatpush.bf16.msra.mxu1 %v462_v13 }
  0x34   : > { %280 = vmatpush.bf16.msra.mxu0 %v461_v14  ;;  %476 = vmatpush.bf16.msra.mxu1 %v461_v14 }
  0x38   : > { %281 = vmatpush.bf16.msra.mxu0 %v460_v15  ;;  %477 = vmatpush.bf16.msra.mxu1 %v460_v15 }
  0x3c   : > { %282 = vmatpush.bf16.msra.mxu0 %v459_v16  ;;  %478 = vmatpush.bf16.msra.mxu1 %v459_v16 }
  0x3f   : > { %451 = vmatmul.msk.bf16.vlgmr.msra.gmra.mxu0 %vm264_vm1, %v457_v17  ;;  %452 = vmatmul.msk.bf16.vlgmr.msra.gmra.mxu1 %vm264_vm1, %v458_v18 }
  0xbc   : > { %v284_v19 = vpop.f32.mrf.mxu0  ;;  %v289_v20 = vpop.f32.mrf.mxu1 }
  0xc4   : > { %v286_v21 = vpop.f32.mrf.mxu0  ;;  %v291_v22 = vpop.f32.mrf.mxu1  ;;  %308 = sbr.rel (!%p574_p5) target bundleno = 211 (0xd3), region = 73 }
  0xc5   : > { %v466_v23 = vpack.c.bf16 %v286_v21, %v284_v19  ;;  %v471_v24 = vpack.c.bf16 %v291_v22, %v289_v20 }
  0xc7   : > { %467 = vst [vmem:[%s212_s5] sm:$0xff] %v466_v23  }
  0xc8   : > { %473 = vst [vmem:[%s212_s5 + $0x8] sm:$0xff] %v471_v24  }
  0xce   : > { %v327_v25 = vld [vmem:[%s212_s5] sm:$0xf]  ;;  %v329_v26 = vld [vmem:[%s212_s5 + $0x4] sm:$0xf] }
  0xcf   : > { %v331_v27 = vld [vmem:[%s212_s5 + $0x8] sm:$0xf]  ;;  %328 = vst [vmem:[%s310_s9] sm:$0xf] %v327_v25  ;;  %v333_v28 = vld [vmem:[%s212_s5 + $0xc] sm:$0xf] }
  0xd0   : > { %330 = vst [vmem:[%s310_s9 + $0x14] sm:$0xf] %v329_v26 }
  0xd1   : > { %332 = vst [vmem:[%s310_s9 + $0x28] sm:$0xf] %v331_v27 }
  0xd2   : > { %334 = vst [vmem:[%s310_s9 + $0x3c] sm:$0xf] %v333_v28 }
  0xd3 PF: > { %p9_p10 = scmp.ge.s32.totalorder %s561_s13, 7   ;;  %s614_s9 = smov %s523_s10 }
  0xd4   : > { %s615_s10 = smov %s572_s16  ;;  %s616_s11 = smov %s561_s13 }
  0xd5   :  { %11 = sbr.rel (!%p9_p10) target bundleno = 2 (0x2), region = 145 }

// kernel: vsnet_forward.45
= control target key start
LH: loop header
LB: loop body
LE: loop exit
PB: predicated region body
PF: predicated region fallthrough
CT: control target
= control target key end

     0   :  { %s1205_s27 = smov 0   ;;  %s1207_s28 = smov 0   ;;  %s1326_s0 = inlined_call_operand.vmem [shape: bf16[8,72], index: 0, kind: input, shape index: {}]   ;;  %s1327_s1 = inlined_call_operand.vmem [shape: bf16[8,72], index: 1, kind: input, shape index: {}]   ;;  %s1328_s2 = inlined_call_operand.vmem [shape: bf16[8,72], index: 2, kind: input, shape index: {}]   ;;  %s1329_s3 = inlined_call_operand.vmem [shape: bf16[8,72], index: 3, kind: input, shape index: {}]   ;;  %s1330_s4 = inlined_call_operand.vmem [shape: bf16[72,640], index: 4, kind: input, shape index: {}]   ;;  %s1331_s5 = inlined_call_operand.vmem [shape: bf16[72,640], index: 5, kind: input, shape index: {}]   ;;  %s1332_s6 = inlined_call_operand.vmem [shape: bf16[72,640], index: 6, kind: input, shape index: {}]   ;;  %s1333_s7 = inlined_call_operand.vmem [shape: bf16[72,640], index: 7, kind: input, shape index: {}]   ;;  %s1334_s8 = inlined_call_operand.vmem [shape: bf16[8,640], index: 8, kind: output, shape index: {}]  }
   0x1   :  { %s1209_s29 = smov 0  }
   0x2 LB: > { %s1011_s30 = sadd.s32 4294967295, %s1158_s29   ;;  %s1222_s9 = sadd.s32 1, %s1158_s29   ;;  %s1158_s29 = sphi %s1209_s29, %s1338_s29   ;;  %s1154_s28 = sphi %s1207_s28, %s1337_s28   ;;  %s1150_s27 = sphi %s1205_s27, %s1336_s27  }
   0x3   : > { %s106_s10 = ssub.s32 %s1158_s29, %s1222_s9  ;;  %s109_s11 = sadd.s32 1, %s1154_s28 }
   0x4   : > { %p107_p0 = scmp.eq.s32.totalorder %s106_s10, 0  ;;  %p116_p1 = scmp.ne.s32.totalorder %s1154_s28, %s1150_s27 }
   0x5   : > { %p117_p2 = scmp.eq.s32.totalorder %s1158_s29, 0  ;;  %p1014_p4 = scmp.ge.s32.totalorder %s1158_s29, 5 }
   0x6   : > { %s1231_s12 = scalar_select %p107_p0, %s1154_s28, %s109_s11  }
   0x7   : > { %p1233_p3 = por %p117_p2, %p116_p1  ;;  %258 = sbr.rel (%p1014_p4) target bundleno = 68 (0x44), region = 32 }
   0xc   : > { %261 = sbr.rel (!%p1233_p3) target bundleno = 26 (0x1a), region = 36  ;;  %s263_s14 = sand.u32 (%p1233_p3), 1, %s1154_s28  }
   0xd   : > { %s1015_s15 = sshll.u32 (%p1233_p3), %s1158_s29, 2  ;;  %s1107_s16 = smul.u32 (%p1233_p3), 36, %s263_s14 }
   0xe   : > { %s267_s19 = scalar_lea.vmem (%p1233_p3), %s1330_s4, %s1015_s15 }
   0xf   : > { %v284_v0 = vld [vmem:[%s267_s19] sm:$0xf] (%p1233_p3)  ;;  %v286_v1 = vld [vmem:[%s267_s19 + $0x14] sm:$0xf] (%p1233_p3)  ;;  %v288_v2 = vld [vmem:[%s267_s19 + $0x28] sm:$0xf] (%p1233_p3) }
  0x10   : > { %s265_s20 = scalar_lea.vmem (%p1233_p3), [#allocation2], %s1107_s16  ;;  %v290_v3 = vld [vmem:[%s267_s19 + $0x3c] sm:$0xf] (%p1233_p3)  ;;  %v292_v4 = vld [vmem:[%s267_s19 + $0x50] sm:$0xf] (%p1233_p3) }
  0x11   : > { %285 = vst [vmem:[%s265_s20] sm:$0xf] %v284_v0  ;;  %v294_v5 = vld [vmem:[%s267_s19 + $0x64] sm:$0xf]  ;;  %v296_v6 = vld [vmem:[%s267_s19 + $0x78] sm:$0xf] }
  0x12   : > { %287 = vst [vmem:[%s265_s20 + $0x4] sm:$0xf] %v286_v1  ;;  %v298_v7 = vld [vmem:[%s267_s19 + $0x8c] sm:$0xf]  ;;  %v300_v8 = vld [vmem:[%s267_s19 + $0xa0] sm:$0xf] }
  0x13   : > { %289 = vst [vmem:[%s265_s20 + $0x8] sm:$0xf] %v288_v2 }
  0x14   : > { %291 = vst [vmem:[%s265_s20 + $0xc] sm:$0xf] %v290_v3 }
  0x15   : > { %293 = vst [vmem:[%s265_s20 + $0x10] sm:$0xf] %v292_v4 }
  0x16   : > { %295 = vst [vmem:[%s265_s20 + $0x14] sm:$0xf] %v294_v5 }
  0x17   : > { %297 = vst [vmem:[%s265_s20 + $0x18] sm:$0xf] %v296_v6 }
  0x18   : > { %299 = vst [vmem:[%s265_s20 + $0x1c] sm:$0xf] %v298_v7 }
  0x19   : > { %301 = vst [vmem:[%s265_s20 + $0x20] sm:$0xf] %v300_v8 }
  0x1a PF: > { %343 = sbr.rel (!%p1233_p3) target bundleno = 40 (0x28), region = 77  ;;  %s345_s21 = sand.u32 (%p1233_p3), 1, %s1154_s28  }
  0x1b   : > { %s1016_s22 = sshll.u32 (%p1233_p3), %s1158_s29, 2  ;;  %s1108_s23 = smul.u32 (%p1233_p3), 36, %s345_s21 }
  0x1c   : > { %s349_s26 = scalar_lea.vmem (%p1233_p3), %s1331_s5, %s1016_s22 }
  0x1d   : > { %v366_v9 = vld [vmem:[%s349_s26] sm:$0xf] (%p1233_p3)  ;;  %v368_v10 = vld [vmem:[%s349_s26 + $0x14] sm:$0xf] (%p1233_p3)  ;;  %v370_v11 = vld [vmem:[%s349_s26 + $0x28] sm:$0xf] (%p1233_p3) }
  0x1e   : > { %s347_s10 = scalar_lea.vmem (%p1233_p3), [#allocation3], %s1108_s23  ;;  %v372_v12 = vld [vmem:[%s349_s26 + $0x3c] sm:$0xf] (%p1233_p3)  ;;  %v374_v13 = vld [vmem:[%s349_s26 + $0x50] sm:$0xf] (%p1233_p3) }
  0x1f   : > { %367 = vst [vmem:[%s347_s10] sm:$0xf] %v366_v9  ;;  %v376_v14 = vld [vmem:[%s349_s26 + $0x64] sm:$0xf]  ;;  %v378_v15 = vld [vmem:[%s349_s26 + $0x78] sm:$0xf] }
  0x20   : > { %369 = vst [vmem:[%s347_s10 + $0x4] sm:$0xf] %v368_v10  ;;  %v380_v16 = vld [vmem:[%s349_s26 + $0x8c] sm:$0xf]  ;;  %v382_v17 = vld [vmem:[%s349_s26 + $0xa0] sm:$0xf] }
  0x21   : > { %371 = vst [vmem:[%s347_s10 + $0x8] sm:$0xf] %v370_v11 }
  0x22   : > { %373 = vst [vmem:[%s347_s10 + $0xc] sm:$0xf] %v372_v12 }
  0x23   : > { %375 = vst [vmem:[%s347_s10 + $0x10] sm:$0xf] %v374_v13 }
  0x24   : > { %377 = vst [vmem:[%s347_s10 + $0x14] sm:$0xf] %v376_v14 }
  0x25   : > { %379 = vst [vmem:[%s347_s10 + $0x18] sm:$0xf] %v378_v15 }
  0x26   : > { %381 = vst [vmem:[%s347_s10 + $0x1c] sm:$0xf] %v380_v16 }
  0x27   : > { %383 = vst [vmem:[%s347_s10 + $0x20] sm:$0xf] %v382_v17 }
  0x28 PF: > { %425 = sbr.rel (!%p1233_p3) target bundleno = 54 (0x36), region = 118  ;;  %s427_s11 = sand.u32 (%p1233_p3), 1, %s1154_s28  }
  0x29   : > { %s1017_s14 = sshll.u32 (%p1233_p3), %s1158_s29, 2  ;;  %s1109_s15 = smul.u32 (%p1233_p3), 36, %s427_s11 }
  0x2a   : > { %s431_s18 = scalar_lea.vmem (%p1233_p3), %s1332_s6, %s1017_s14 }
  0x2b   : > { %v448_v18 = vld [vmem:[%s431_s18] sm:$0xf] (%p1233_p3)  ;;  %v450_v19 = vld [vmem:[%s431_s18 + $0x14] sm:$0xf] (%p1233_p3)  ;;  %v452_v20 = vld [vmem:[%s431_s18 + $0x28] sm:$0xf] (%p1233_p3) }
  0x2c   : > { %s429_s19 = scalar_lea.vmem (%p1233_p3), [#allocation4], %s1109_s15  ;;  %v454_v21 = vld [vmem:[%s431_s18 + $0x3c] sm:$0xf] (%p1233_p3)  ;;  %v456_v22 = vld [vmem:[%s431_s18 + $0x50] sm:$0xf] (%p1233_p3) }
  0x2d   : > { %449 = vst [vmem:[%s429_s19] sm:$0xf] %v448_v18  ;;  %v458_v23 = vld [vmem:[%s431_s18 + $0x64] sm:$0xf]  ;;  %v460_v24 = vld [vmem:[%s431_s18 + $0x78] sm:$0xf] }
  0x2e   : > { %451 = vst [vmem:[%s429_s19 + $0x4] sm:$0xf] %v450_v19  ;;  %v462_v25 = vld [vmem:[%s431_s18 + $0x8c] sm:$0xf]  ;;  %v464_v26 = vld [vmem:[%s431_s18 + $0xa0] sm:$0xf] }
  0x2f   : > { %453 = vst [vmem:[%s429_s19 + $0x8] sm:$0xf] %v452_v20 }
  0x30   : > { %455 = vst [vmem:[%s429_s19 + $0xc] sm:$0xf] %v454_v21 }
  0x31   : > { %457 = vst [vmem:[%s429_s19 + $0x10] sm:$0xf] %v456_v22 }
  0x32   : > { %459 = vst [vmem:[%s429_s19 + $0x14] sm:$0xf] %v458_v23 }
  0x33   : > { %461 = vst [vmem:[%s429_s19 + $0x18] sm:$0xf] %v460_v24 }
  0x34   : > { %463 = vst [vmem:[%s429_s19 + $0x1c] sm:$0xf] %v462_v25 }
  0x35   : > { %465 = vst [vmem:[%s429_s19 + $0x20] sm:$0xf] %v464_v26 }
  0x36 PF: > { %507 = sbr.rel (!%p1233_p3) target bundleno = 68 (0x44), region = 159  ;;  %s509_s20 = sand.u32 (%p1233_p3), 1, %s1154_s28  }
  0x37   : > { %s1018_s21 = sshll.u32 (%p1233_p3), %s1158_s29, 2  ;;  %s1110_s22 = smul.u32 (%p1233_p3), 36, %s509_s20 }
  0x38   : > { %s513_s25 = scalar_lea.vmem (%p1233_p3), %s1333_s7, %s1018_s21 }
  0x39   : > { %v530_v27 = vld [vmem:[%s513_s25] sm:$0xf] (%p1233_p3)  ;;  %v532_v28 = vld [vmem:[%s513_s25 + $0x14] sm:$0xf] (%p1233_p3)  ;;  %v534_v29 = vld [vmem:[%s513_s25 + $0x28] sm:$0xf] (%p1233_p3) }
  0x3a   : > { %s511_s26 = scalar_lea.vmem (%p1233_p3), [#allocation5], %s1110_s22  ;;  %v536_v30 = vld [vmem:[%s513_s25 + $0x3c] sm:$0xf] (%p1233_p3)  ;;  %v538_v31 = vld [vmem:[%s513_s25 + $0x50] sm:$0xf] (%p1233_p3) }
  0x3b   : > { %531 = vst [vmem:[%s511_s26] sm:$0xf] %v530_v27  ;;  %v540_v32 = vld [vmem:[%s513_s25 + $0x64] sm:$0xf]  ;;  %v542_v33 = vld [vmem:[%s513_s25 + $0x78] sm:$0xf] }
  0x3c   : > { %533 = vst [vmem:[%s511_s26 + $0x4] sm:$0xf] %v532_v28  ;;  %v544_v34 = vld [vmem:[%s513_s25 + $0x8c] sm:$0xf]  ;;  %v546_v35 = vld [vmem:[%s513_s25 + $0xa0] sm:$0xf] }
  0x3d   : > { %535 = vst [vmem:[%s511_s26 + $0x8] sm:$0xf] %v534_v29 }
  0x3e   : > { %537 = vst [vmem:[%s511_s26 + $0xc] sm:$0xf] %v536_v30 }
  0x3f   : > { %539 = vst [vmem:[%s511_s26 + $0x10] sm:$0xf] %v538_v31 }
  0x40   : > { %541 = vst [vmem:[%s511_s26 + $0x14] sm:$0xf] %v540_v32 }
  0x41   : > { %543 = vst [vmem:[%s511_s26 + $0x18] sm:$0xf] %v542_v33 }
  0x42   : > { %545 = vst [vmem:[%s511_s26 + $0x1c] sm:$0xf] %v544_v34 }
  0x43   : > { %547 = vst [vmem:[%s511_s26 + $0x20] sm:$0xf] %v546_v35 }
  0x44 PF: > { %p1019_p5 = scmp.ge.s32.totalorder %s1158_s29, 1  ;;  %p588_p6 = scmp.lt.s32.totalorder %s1158_s29, 6 }
  0x46   : > { %p589_p7 = pnand %p1019_p5, %p588_p6 }
  0x47   : > { %s595_s13 = sand.u32 (!%p589_p7), 1, %s1150_s27   ;;  %p660_p8 = scmp.lt.s32.totalorder (!%p589_p7), %s1011_s30, 4 }
  0x48   : > { %592 = sbr.rel (%p589_p7) target bundleno = 245 (0xf5), region = 200 }
  0x49   : > { %s1111_s10 = smul.u32 (!%p589_p7), 36, %s595_s13 }
  0x4b   : > { %s1269_s11 = scalar_lea.vmem (!%p589_p7), [#allocation3], %s1111_s10  ;;  %s1272_s14 = scalar_lea.vmem (!%p589_p7), [#allocation2], %s1111_s10 }
  0x4c   : > { %s1275_s15 = scalar_lea.vmem (!%p589_p7), [#allocation4], %s1111_s10  ;;  %s1278_s16 = scalar_lea.vmem (!%p589_p7), [#allocation5], %s1111_s10 }
  0x4d   : > { %v684_v36 = vld [vmem:[%s1269_s11 + $0x20] sm:$0xf]  ;;  %v674_v37 = vld [vmem:[%s1272_s14 + $0x20] sm:$0xf]  ;;  %v788_v40 = vld [vmem:[%s1275_s15 + $0x20] sm:$0xf] }
  0x4e   : > { %v702_v38 = vunpack.c.l.b16 %v684_v36  ;;  %v750_v39 = vunpack.c.l.b16 %v674_v37  ;;  %v845_v41 = vld [vmem:[%s1278_s16 + $0x20] sm:$0xf]  ;;  %vm716_vm0 = vcmask 1043456   ;;  %v806_v42 = vunpack.c.l.b16 %v788_v40  ;;  %v1098_v52 = vld [vmem:[%s1269_s11 + $0x18] sm:$0xff]  ;;  %v1102_v54 = vld [vmem:[%s1275_s15 + $0x18] sm:$0xff]  ;;  %s1340_s30 = smov (!%p660_p8, %s1011_s30), 4 }
  0x4f   : > { %v863_v43 = vunpack.c.l.b16 %v845_v41  ;;  %v1094_v53 = vld [vmem:[%s1272_s14 + $0x18] sm:$0xff]  ;;  %v1106_v55 = vld [vmem:[%s1278_s16 + $0x18] sm:$0xff]  ;;  %v1101_v58 = vld [vmem:[%s1275_s15 + $0x10] sm:$0xff]  ;;  %vm712_vm1 = vcmask 588800   ;;  %s1020_s24 = sshll.u32 %s1340_s30, 2 }
  0x50   : > { %v707_v44 = vpack.c.b16 %v702_v38, %v702_v38  ;;  %v755_v45 = vpack.c.b16 %v750_v39, %v750_v39  ;;  %v811_v46 = vpack.c.b16 %v806_v42, %v806_v42  ;;  %v1097_v56 = vld [vmem:[%s1269_s11 + $0x10] sm:$0xff]  ;;  %v1093_v57 = vld [vmem:[%s1272_s14 + $0x10] sm:$0xff]  ;;  %v1105_v59 = vld [vmem:[%s1278_s16 + $0x10] sm:$0xff]  ;;  %s663_s13 = scalar_lea.vmem %s1334_s8, %s1020_s24 }
  0x51   : > { %v868_v47 = vpack.c.b16 %v863_v43, %v863_v43  ;;  %v1096_v60 = vld [vmem:[%s1269_s11 + $0x8] sm:$0xff]  ;;  %v1092_v61 = vld [vmem:[%s1272_s14 + $0x8] sm:$0xff]  ;;  %v1100_v62 = vld [vmem:[%s1275_s15 + $0x8] sm:$0xff] }
  0x52   : > { %v718_v48 = vsel %vm716_vm0, %v707_v44, 0  ;;  %v764_v49 = vsel %vm716_vm0, %v755_v45, 0  ;;  %v820_v50 = vsel %vm716_vm0, %v811_v46, 0  ;;  %v1104_v63 = vld [vmem:[%s1278_s16 + $0x8] sm:$0xff]  ;;  %v1095_v0 = vld [vmem:[%s1269_s11] sm:$0xff]  ;;  %v1099_v2 = vld [vmem:[%s1275_s15] sm:$0xff] }
  0x53   : > { %723 = vmatpush.bf16.msra.mxu0 %v718_v48  ;;  %769 = vmatpush.bf16.msra.mxu1 %v764_v49  ;;  %v877_v51 = vsel %vm716_vm0, %v868_v47, 0  ;;  %v1091_v1 = vld [vmem:[%s1272_s14] sm:$0xff]  ;;  %v1103_v3 = vld [vmem:[%s1278_s16] sm:$0xff] }
  0x54   : > { %825 = vmatpush.bf16.msra.mxu2 %v820_v50  ;;  %882 = vmatpush.bf16.msra.mxu3 %v877_v51  ;;  %v675_v4 = vld [vmem:[%s1327_s1] sm:$0xf] }
  0x55   : > { %v665_v5 = vld [vmem:[%s1326_s0] sm:$0xf] }
  0x56   : > { %v779_v6 = vld [vmem:[%s1328_s2] sm:$0xf] }
  0x57   : > { %724 = vmatpush.bf16.msra.mxu0 %v1098_v52  ;;  %770 = vmatpush.bf16.msra.mxu1 %v1094_v53  ;;  %v836_v7 = vld [vmem:[%s1329_s3] sm:$0xf] }
  0x58   : > { %826 = vmatpush.bf16.msra.mxu2 %v1102_v54  ;;  %883 = vmatpush.bf16.msra.mxu3 %v1106_v55 }
  0x5b   : > { %725 = vmatpush.bf16.msra.mxu0 %v1097_v56  ;;  %771 = vmatpush.bf16.msra.mxu1 %v1093_v57 }
  0x5c   : > { %827 = vmatpush.bf16.msra.mxu2 %v1101_v58  ;;  %884 = vmatpush.bf16.msra.mxu3 %v1105_v59 }
  0x5f   : > { %726 = vmatpush.bf16.msra.mxu0 %v1096_v60  ;;  %772 = vmatpush.bf16.msra.mxu1 %v1092_v61 }
  0x60   : > { %828 = vmatpush.bf16.msra.mxu2 %v1100_v62  ;;  %885 = vmatpush.bf16.msra.mxu3 %v1104_v63 }
  0x63   : > { %727 = vmatpush.bf16.msra.mxu0 %v1095_v0  ;;  %773 = vmatpush.bf16.msra.mxu1 %v1091_v1 }
  0x64   : > { %829 = vmatpush.bf16.msra.mxu2 %v1099_v2  ;;  %886 = vmatpush.bf16.msra.mxu3 %v1103_v3 }
  0x66   : > { %1037 = vmatmul.msk.bf16.vlgmr.msra.gmra.mxu0 %vm712_vm1, %v675_v4  ;;  %1054 = vmatmul.msk.bf16.vlgmr.msra.gmra.mxu1 %vm712_vm1, %v665_v5 }
  0x67   : > { %1071 = vmatmul.msk.bf16.vlgmr.msra.gmra.mxu2 %vm712_vm1, %v779_v6  ;;  %1088 = vmatmul.msk.bf16.vlgmr.msra.gmra.mxu3 %vm712_vm1, %v836_v7 }
  0xe3   : > { %v729_v8 = vpop.f32.mrf.mxu0  ;;  %v775_v9 = vpop.f32.mrf.mxu1 }
  0xe4   : > { %v776_v10 = vadd.f32 %v775_v9, %v729_v8 }
  0xea   : > { %v831_v11 = vpop.f32.mrf.mxu2  ;;  %v888_v12 = vpop.f32.mrf.mxu3 }
  0xeb   : > { %v835_v13 = vadd.f32 %v831_v11, %v776_v10  ;;  %v731_v14 = vpop.f32.mrf.mxu0  ;;  %v777_v15 = vpop.f32.mrf.mxu1 }
  0xed   : > { %v892_v16 = vadd.f32 %v888_v12, %v835_v13 }
  0xef   : > { %vm893_vm2 = vcmp.ge.f32.partialorder %v892_v16, 0.0  ;;  %v894_v17 = vmul.f32 0.1, %v892_v16 }
  0xf1   : > { %v895_v18 = vsel %vm893_vm2, %v892_v16, %v894_v17 }
  0xf2   : > { %v896_v19 = vpack.c.bf16 %v895_v18, %v895_v18  ;;  %v833_v20 = vpop.f32.mrf.mxu2  ;;  %v890_v21 = vpop.f32.mrf.mxu3 }
  0xf4   : > { %897 = vst [vmem:[%s663_s13] sm:$0xf] %v896_v19 }
  0xf5 PF: > { %p15_p9 = scmp.ge.s32.totalorder %s1222_s9, 7   ;;  %s1336_s27 = smov %s1154_s28 }
  0xf6   : > { %s1337_s28 = smov %s1231_s12  ;;  %s1338_s29 = smov %s1222_s9 }
  0xf7   :  { %17 = sbr.rel (!%p15_p9) target bundleno = 2 (0x2), region = 275 }

// kernel: vsnet_forward.47
= control target key start
LH: loop header
LB: loop body
LE: loop exit
PB: predicated region body
PF: predicated region fallthrough
CT: control target
= control target key end

     0   :  { %s388_s9 = smov 0   ;;  %s418_s0 = inlined_call_operand.vmem [shape: bf16[1,8], index: 0, kind: input, shape index: {}]   ;;  %s419_s1 = inlined_call_operand.vmem [shape: bf16[8,2304], index: 1, kind: input, shape index: {}]   ;;  %s420_s2 = inlined_call_operand.vmem [shape: f32[1,2304], index: 2, kind: output, shape index: {}]  }
   0x1 LB: > { %s343_s10 = sadd.s32 4294967295, %s371_s9   ;;  %p347_p0 = scmp.ge.s32.totalorder %s371_s9, 1  ;;  %s371_s9 = sphi %s388_s9, %s12_s9  }
   0x2   : > { %p113_p1 = scmp.lt.s32.totalorder %s371_s9, 4 }
   0x4   : > { %p114_p2 = pnand %p347_p0, %p113_p1 }
   0x5   : > { %s134_s11 = smul.u32 (!%p114_p2), 6, %s343_s10 }
   0x6   : > { %117 = sbr.rel (%p114_p2) target bundleno = 174 (0xae), region = 28 }
   0x7   : > { %p135_p3 = scmp.lt.s32.totalorder (!%p114_p2), %s134_s11, 17 }
   0xb   : > { %s422_s11 = smov (!%p135_p3, %s134_s11), 17  ;;  %vm169_vm0 = vcmask 1043456   ;;  %v146_v19 = vld [vmem:[%s418_s0] sm:$0x1]  ;;  %vm165_vm1 = vcmask 64512   ;;  %v288_v32 = vlaneseq  ;;  %vm277_vm2 = vcmask 1040384  }
   0xc   : > { %s348_s12 = sshll.u32 %s422_s11, 2  ;;  %vm281_vm3 = vcmask 1043459   ;;  %vm279_vm4 = vcmask 1041408   ;;  %vm283_vm5 = vcmask 1044483   ;;  %vm285_vm6 = vcmask 1042432   ;;  %s143_s20 = scalar_lea.vmem %s420_s2, %s422_s11 }
   0xd   : > { %s138_s15 = scalar_lea.vmem %s419_s1, %s348_s12  ;;  %vm290_vm7 = vcmp.lt.s32.totalorder %v288_v32, 768 }
   0xe   : > { %v147_v0 = vld [vmem:[%s138_s15] sm:$0xff]  ;;  %v148_v1 = vld [vmem:[%s138_s15 + $0x8] sm:$0xff]  ;;  %v149_v2 = vld [vmem:[%s138_s15 + $0x10] sm:$0xff] }
   0xf   : > { %v153_v3 = vunpack.c.l.b16 %v147_v0  ;;  %v154_v4 = vunpack.c.h.b16 %v147_v0  ;;  %v155_v5 = vunpack.c.l.b16 %v148_v1  ;;  %v156_v6 = vunpack.c.h.b16 %v148_v1 }
  0x10   : > { %v157_v7 = vunpack.c.l.b16 %v149_v2  ;;  %v158_v8 = vunpack.c.h.b16 %v149_v2 }
  0x11   : > { %v159_v9 = vpack.c.b16 %v153_v3, %v153_v3  ;;  %v160_v10 = vpack.c.b16 %v154_v4, %v154_v4  ;;  %v161_v11 = vpack.c.b16 %v155_v5, %v155_v5  ;;  %v162_v12 = vpack.c.b16 %v156_v6, %v156_v6 }
  0x12   : > { %v163_v13 = vpack.c.b16 %v157_v7, %v157_v7  ;;  %v164_v14 = vpack.c.b16 %v158_v8, %v158_v8 }
  0x13   : > { %v171_v15 = vsel %vm169_vm0, %v159_v9, 0  ;;  %v174_v16 = vsel %vm169_vm0, %v160_v10, 0  ;;  %v177_v17 = vsel %vm169_vm0, %v161_v11, 0  ;;  %v180_v18 = vsel %vm169_vm0, %v162_v12, 0 }
  0x14   : > { %195 = vmatpush.bf16.msra.mxu0 %v171_v15  ;;  %208 = vmatpush.bf16.msra.mxu1 %v174_v16  ;;  %v183_v20 = vsel %vm169_vm0, %v163_v13, 0  ;;  %v186_v21 = vsel %vm169_vm0, %v164_v14, 0 }
  0x15   : > { %221 = vmatpush.bf16.msra.mxu2 %v177_v17  ;;  %234 = vmatpush.bf16.msra.mxu3 %v180_v18 }
  0x17   : > { %349 = vmatmul.msk.bf16.vlgmr.msra.gmra.mxu0 %vm165_vm1, %v146_v19  ;;  %350 = vmatmul.msk.bf16.vlgmr.msra.gmra.mxu1 %vm165_vm1, %v146_v19 }
  0x18   : > { %247 = vmatpush.bf16.msrb.mxu0 %v183_v20  ;;  %260 = vmatpush.bf16.msrb.mxu1 %v186_v21 }
  0x19   : > { %351 = vmatmul.msk.bf16.vlgmr.msra.gmra.mxu2 %vm165_vm1, %v146_v19  ;;  %352 = vmatmul.msk.bf16.vlgmr.msra.gmra.mxu3 %vm165_vm1, %v146_v19 }
  0x27   : > { %353 = vmatmul.msk.bf16.vlgmr.msrb.gmra.mxu0 %vm165_vm1, %v146_v19  ;;  %354 = vmatmul.msk.bf16.vlgmr.msrb.gmra.mxu1 %vm165_vm1, %v146_v19 }
  0x94   : > { %v197_v22 = vpop.f32.mrf.mxu0  ;;  %v210_v23 = vpop.f32.mrf.mxu1 }
  0x95   : > { %v272_v28 = vrot.slane %v210_v23, 7 }
  0x97   : > { %v278_v38 = vsel %vm277_vm2, %v197_v22, %v272_v28 }
  0x9c   : > { %v223_v24 = vpop.f32.mrf.mxu2  ;;  %v236_v25 = vpop.f32.mrf.mxu3 }
  0x9d   : > { %v199_v26 = vpop.f32.mrf.mxu0  ;;  %v212_v27 = vpop.f32.mrf.mxu1  ;;  %v274_v29 = vrot.slane %v236_v25, 5  ;;  %v273_v33 = vrot.slane %v223_v24, 6 }
  0x9f   : > { %v280_v40 = vsel %vm279_vm4, %v278_v38, %v273_v33 }
  0xa4   : > { %v225_v30 = vpop.f32.mrf.mxu2  ;;  %v238_v31 = vpop.f32.mrf.mxu3 }
  0xa5   : > { %v249_v34 = vpop.f32.mrf.mxu0  ;;  %v262_v35 = vpop.f32.mrf.mxu1 }
  0xa6   : > { %v275_v36 = vrot.slane %v249_v34, 4  ;;  %v276_v37 = vrot.slane %v262_v35, 3 }
  0xa8   : > { %v282_v39 = vsel %vm281_vm3, %v274_v29, %v275_v36 }
  0xa9   : > { %v284_v41 = vsel %vm283_vm5, %v282_v39, %v276_v37 }
  0xaa   : > { %v286_v42 = vsel %vm285_vm6, %v280_v40, %v284_v41 }
  0xab   : > { %292 = vst.msk [vmem:[%s143_s20] sm:$0x3f] %vm290_vm7, %v286_v42 }
  0xad   : > { %v251_v43 = vpop.f32.mrf.mxu0  ;;  %v264_v44 = vpop.f32.mrf.mxu1 }
  0xae PF: > { %s12_s9 = sadd.s32 1, %s371_s9  }
  0xaf   : > { %p9_p4 = scmp.ge.s32.totalorder %s12_s9, 5  }
  0xb1   :  { %11 = sbr.rel (!%p9_p4) target bundleno = 1 (0x1), region = 58 }

// kernel: vsnet_forward.48
= control target key start
LH: loop header
LB: loop body
LE: loop exit
PB: predicated region body
PF: predicated region fallthrough
CT: control target
= control target key end

     0   :  { %vm24_vm0 = vcmask 1043456   ;;  %vm20_vm1 = vcmask 64512   ;;  %s85_s1 = inlined_call_operand.vmem [shape: bf16[8,128], index: 1, kind: input, shape index: {}]   ;;  %s86_s0 = inlined_call_operand.vmem [shape: bf16[16,8], index: 0, kind: input, shape index: {}]   ;;  %s87_s2 = inlined_call_operand.vmem [shape: bf16[16,128], index: 2, kind: output, shape index: {}]  }
   0x1   :  { %v14_v0 = vld [vmem:[%s85_s1] sm:$0xf] }
   0x2   :  { %v26_v1 = vsel %vm24_vm0, %v14_v0, 0  ;;  %v55_v2 = vld [vmem:[%s86_s0] sm:$0xff] }
   0x3   :  { %35 = vmatpush.bf16.msra.mxu0 %v26_v1 }
   0x6   :  { %54 = vmatmul.msk.bf16.vlgmr.msra.gmra.mxu0 %vm20_vm1, %v55_v2 }
  0x83   :  { %v37_v3 = vpop.f32.mrf.mxu0 }
  0x8b   :  { %v39_v4 = vpop.f32.mrf.mxu0 }
  0x8c   :  { %v59_v5 = vpack.c.bf16 %v39_v4, %v37_v3 }
  0x8e   :  { %60 = vst [vmem:[%s87_s2] sm:$0xff] %v59_v5  }

// kernel: vsnet_forward.49
= control target key start
LH: loop header
LB: loop body
LE: loop exit
PB: predicated region body
PF: predicated region fallthrough
CT: control target
= control target key end

     0   :  { %s458_s12 = smov 0   ;;  %s460_s13 = smov 0   ;;  %s516_s0 = inlined_call_operand.vmem [shape: bf16[16,8], index: 0, kind: input, shape index: {}]   ;;  %s517_s1 = inlined_call_operand.vmem [shape: bf16[8,256], index: 1, kind: input, shape index: {}]   ;;  %s518_s2 = inlined_call_operand.vmem [shape: f32[16,256], index: 2, kind: input, shape index: {}]   ;;  %s519_s3 = inlined_call_operand.vmem [shape: f32[16,256], index: 3, kind: output, shape index: {}]  }
   0x1   :  { %s462_s14 = smov 0  }
   0x2 LB: > { %s471_s15 = sadd.s32 4294967295, %s436_s14   ;;  %s473_s16 = sadd.s32 1, %s436_s14   ;;  %s436_s14 = sphi %s462_s14, %s523_s14   ;;  %s432_s13 = sphi %s460_s13, %s522_s13   ;;  %s428_s12 = sphi %s458_s12, %s521_s12  }
   0x3   : > { %s64_s17 = ssub.s32 %s436_s14, %s473_s16  ;;  %s67_s18 = sadd.s32 1, %s432_s13 }
   0x4   : > { %p65_p0 = scmp.eq.s32.totalorder %s64_s17, 0  ;;  %p74_p1 = scmp.ne.s32.totalorder %s432_s13, %s428_s12 }
   0x5   : > { %p75_p2 = scmp.eq.s32.totalorder %s436_s14, 0  ;;  %p104_p3 = scmp.eq.s32.totalorder %s471_s15, 1 }
   0x6   : > { %s481_s19 = scalar_select %p65_p0, %s432_s13, %s67_s18  }
   0x7   : > { %p76_p4 = por %p75_p2, %p74_p1  ;;  %p483_p5 = por %p104_p3, %p74_p1 }
   0x8   : > { %p373_p6 = scmp.ge.s32.totalorder %s436_s14, 2 }
   0xa   : > { %129 = sbr.rel (%p373_p6) target bundleno = 21 (0x15), region = 20 }
   0xf   : > { %139 = sbr.rel (!%p76_p4) target bundleno = 21 (0x15), region = 28  ;;  %s141_s21 = sand.u32 (%p76_p4), 1, %s432_s13  }
  0x10   : > { %s375_s22 = sshll.u32 (%p76_p4), %s436_s14, 3  ;;  %s374_s23 = sshll.u32 (%p76_p4), %s141_s21, 4 }
  0x11   : > { %s145_s26 = scalar_lea.vmem (%p76_p4), %s518_s2, %s375_s22  ;;  %s143_s27 = scalar_lea.vmem (%p76_p4), [#allocation2], %s374_s23 }
  0x12   : > { %v176_v0 = vld [vmem:[%s145_s26] sm:$0xff] (%p76_p4)  ;;  %v178_v1 = vld [vmem:[%s145_s26 + $0x10] sm:$0xff] (%p76_p4) }
  0x13   : > { %177 = vst [vmem:[%s143_s27] sm:$0xff] (%p76_p4), %v176_v0 }
  0x14   : > { %179 = vst [vmem:[%s143_s27 + $0x8] sm:$0xff] %v178_v1 }
  0x15 PF: > { %p376_p7 = scmp.ge.s32.totalorder %s436_s14, 1  ;;  %p184_p8 = scmp.lt.s32.totalorder %s436_s14, 3 }
  0x17   : > { %p185_p9 = pnand %p376_p7, %p184_p8 }
  0x18   : > { %p217_p10 = scmp.lt.s32.totalorder (!%p185_p9), %s471_s15, 1  ;;  %s191_s8 = sand.u32 (!%p185_p9), 1, %s428_s12  }
  0x19   : > { %188 = sbr.rel (%p185_p9) target bundleno = 184 (0xb8), region = 66  ;;  %s377_s9 = sshll.u32 (!%p185_p9), %s191_s8, 4 }
  0x1a   : > { %s193_s10 = scalar_lea.vmem (!%p185_p9), [#allocation2], %s377_s9  ;;  %s216_s11 = scalar_lea.vmem (!%p185_p9), [#allocation3], %s377_s9 }
  0x1e   : > { %s218_s28 = scalar_select %p217_p10, %s471_s15, 1  ;;  %vm236_vm0 = vcmask 1043456   ;;  %v389_v4 = vld [vmem:[%s516_s0] sm:$0xff]  ;;  %vm232_vm1 = vcmask 64512   ;;  %v226_v8 = vld [vmem:[%s193_s10 + $0x8] sm:$0xff] }
  0x1f   : > { %v225_v5 = vld [vmem:[%s193_s10] sm:$0xff]  ;;  %s386_s14 = sshll.u32 (%p483_p5), %s471_s15, 3 }
  0x20   : > { %s379_s29 = sshll.u32 %s218_s28, 2  ;;  %s264_s18 = scalar_lea.vmem (%p483_p5), %s519_s3, %s386_s14 }
  0x21   : > { %s220_s5 = scalar_lea.vmem %s517_s1, %s379_s29 }
  0x22   : > { %v224_v2 = vld [vmem:[%s220_s5] sm:$0xf] }
  0x23   : > { %v238_v3 = vsel %vm236_vm0, %v224_v2, 0 }
  0x24   : > { %247 = vmatpush.bf16.msra.mxu0 %v238_v3 }
  0x27   : > { %384 = vmatmul.msk.bf16.vlgmr.msra.gmra.mxu0 %vm232_vm1, %v389_v4 }
  0xa4   : > { %v249_v6 = vpop.f32.mrf.mxu0 }
  0xa5   : > { %v250_v7 = vadd.f32 %v249_v6, %v225_v5 }
  0xa7   : > { %254 = vst [vmem:[%s216_s11] sm:$0xff] %v250_v7 }
  0xab   : > { %262 = sbr.rel (!%p483_p5) target bundleno = 184 (0xb8), region = 74 }
  0xac   : > { %v251_v9 = vpop.f32.mrf.mxu0 }
  0xad   : > { %v252_v10 = vadd.f32 %v251_v9, %v226_v8 }
  0xae   : > { %v295_v11 = vld [vmem:[%s216_s11] sm:$0xff] (%p483_p5) }
  0xaf   : > { %255 = vst [vmem:[%s216_s11 + $0x8] sm:$0xff] %v252_v10 }
  0xb0   : > { %296 = vst [vmem:[%s264_s18] sm:$0xff] %v295_v11 }
  0xb6   : > { %v297_v12 = vld [vmem:[%s216_s11 + $0x8] sm:$0xff] }
  0xb7   : > { %298 = vst [vmem:[%s264_s18 + $0x10] sm:$0xff] %v297_v12 }
  0xb8 PF: > { %p10_p11 = scmp.ge.s32.totalorder %s473_s16, 4   ;;  %s521_s12 = smov %s432_s13 }
  0xb9   : > { %s522_s13 = smov %s481_s19  ;;  %s523_s14 = smov %s473_s16 }
  0xba   :  { %12 = sbr.rel (!%p10_p11) target bundleno = 2 (0x2), region = 146 }

</bundles_post_ra>
